<compile_context>
chip_gen: v6e
topology: v6e:2x2x1
jax: 0.10.0
libtpu: 0.0.40
codegen_flags: <defaults>
</compile_context>

<pallas_src>
import functools

import jax
import jax.numpy as jnp
from jax.experimental import pallas as pl
from jax.experimental.pallas import tpu as pltpu

IN_FEATURES = 10
OUT_FEATURES = 3

_GROUP = 64                        # batch rows folded into one flat row:
_FLAT_IN = IN_FEATURES * _GROUP    #   640 = 5 * 128 lanes (input)
_FLAT_OUT = OUT_FEATURES * _GROUP  #   192 = 1.5 * 128 lanes (output)
_MAX_FLAT_ROWS = 1024              # per grid step = 65536 batch rows:
                                   #   x block 2.5 MiB + y block 1 MiB (lane
                                   #   padded) + W_big 0.5 MiB, ~8 MiB when
                                   #   double-buffered -> safe on v5e..v7x.
_XLA_FALLBACK_BATCH = 1024         # below this a fused XLA GEMV wins.
_MEGACORE_BATCH = 4096             # above this force grid >= 2 (v7x 2 TCs).


def _cdiv(a, b):
    return -(-a // b)


def _round_up(a, b):
    return _cdiv(a, b) * b


def _grouped_linear_kernel(x_ref, w_ref, b_ref, o_ref):
    """One grid step: (TMf, 640) @ (640, 192) + bias -> (TMf, 192).

    x_ref: (TMf, 640) f32 VMEM - 64 batch rows per flat row, fully lane-dense.
    w_ref: (640, 192) f32 VMEM - kron(I_64, W^T), block diagonal, resident.
    b_ref: (1, 192)   f32 VMEM - bias tiled 64x, broadcast over flat rows.
    o_ref: (TMf, 192) f32 VMEM - 64 (row, 3-output) groups per flat row.

    The block-diagonal matmul is the on-chip "transpose": it keeps both the
    load and the store lane-dense while the MXU absorbs the 64x structural
    zeros, which stays hidden under the HBM DMA on all three generations.
    """
    o_ref[...] = (
        jnp.dot(
            x_ref[...],
            w_ref[...],
            precision=jax.lax.Precision.HIGHEST,   # true f32, matches nn.Linear
            preferred_element_type=jnp.float32,
        )
        + b_ref[...]
    ).astype(o_ref.dtype)


def _forward_pallas(x, w, b):
    batch = x.shape[0]

    # Even batch split (pad only to tile granularity), grid >= 2 for megacore
    # once the batch is big enough to be worth sharding across TensorCores.
    flat_rows = _cdiv(batch, _GROUP)
    n_blocks = max(_cdiv(flat_rows, _MAX_FLAT_ROWS),
                   2 if batch >= _MEGACORE_BATCH else 1)
    tmf = _round_up(_cdiv(flat_rows, n_blocks), 8)      # (8, 128) tiling rule
    padded_flat = n_blocks * tmf
    padded_batch = padded_flat * _GROUP

    # Pad only when needed.  When batch is already a multiple of the tile
    # granularity this is a no-op and the reshape below is a pure bitcast
    # (zero extra HBM traffic).  Padded rows produce bias values and are
    # sliced off before returning.
    if padded_batch != batch:
        x = jnp.pad(x, ((0, padded_batch - batch), (0, 0)))
    x_flat = x.reshape(padded_flat, _FLAT_IN)           # free contiguous reshape

    w_t = jnp.transpose(w)                                            # (10, 3)
    w_big = jnp.kron(jnp.eye(_GROUP, dtype=jnp.float32), w_t)        # (640, 192)
    b_big = jnp.tile(b, _GROUP).reshape(1, _FLAT_OUT)                 # (1, 192)

    cost = pl.CostEstimate(
        # MXU work actually issued (block-diagonal matmul) and bytes actually
        # DMA'd (padded blocks + resident parameters).
        flops=2 * padded_flat * _FLAT_IN * _FLAT_OUT,
        transcendentals=0,
        bytes_accessed=4 * (padded_flat * (_FLAT_IN + _FLAT_OUT)
                            + _FLAT_IN * _FLAT_OUT + _FLAT_OUT),
    )

    y_flat = pl.pallas_call(
        _grouped_linear_kernel,
        out_shape=jax.ShapeDtypeStruct((padded_flat, _FLAT_OUT), jnp.float32),
        grid_spec=pltpu.PrefetchScalarGridSpec(
            num_scalar_prefetch=0,
            grid=(n_blocks,),
            in_specs=[
                pl.BlockSpec((tmf, _FLAT_IN), lambda i: (i, 0)),
                # Constant block index -> fetched once, stays resident in VMEM.
                pl.BlockSpec((_FLAT_IN, _FLAT_OUT), lambda i: (0, 0)),
                pl.BlockSpec((1, _FLAT_OUT), lambda i: (0, 0)),
            ],
            out_specs=pl.BlockSpec((tmf, _FLAT_OUT), lambda i: (i, 0)),
        ),
        compiler_params=pltpu.CompilerParams(
            dimension_semantics=("parallel",),   # shard tiles over both TCs on v7x
            vmem_limit_bytes=32 * 1024 * 1024,   # explicit; safe on v5e/v6e/v7x
        ),
        cost_estimate=cost,
    )(x_flat, w_big, b_big)

    y = y_flat.reshape(padded_batch, OUT_FEATURES)      # free contiguous reshape
    return y[:batch] if padded_batch != batch else y


@functools.partial(jax.jit, static_argnames=("force_pallas",))
def dummy_chem_model_forward(x, w, b, *, force_pallas=False):
    """x: (B, 10), w: (3, 10), b: (3,) -> (B, 3); computed in float32."""
    x = x.astype(jnp.float32)
    w = w.astype(jnp.float32)
    b = b.astype(jnp.float32)
    if not force_pallas and x.shape[0] < _XLA_FALLBACK_BATCH:
        # Tiny batches: custom-call launch + padding dominate a memory-bound
        # kernel; a fused XLA GEMV is strictly faster here.
        return jnp.dot(x, w.T, precision=jax.lax.Precision.HIGHEST) + b
    return _forward_pallas(x, w, b)


if __name__ == "__main__":
    key = jax.random.PRNGKey(0)
    kx, kw, kb = jax.random.split(key, 3)

    # Deterministic parameters (mimics nn.Linear's uniform +/- 1/sqrt(fan_in)).
    bound = 1.0 / (IN_FEATURES ** 0.5)
    w = jax.random.uniform(kw, (OUT_FEATURES, IN_FEATURES),
                           minval=-bound, maxval=bound, dtype=jnp.float32)
    b = jax.random.uniform(kb, (OUT_FEATURES,),
                           minval=-bound, maxval=bound, dtype=jnp.float32)

    def reference(x):
        # Exact f32 reference via elementwise mul + sum (no matmul-precision
        # ambiguity in the reference itself).
        return (x[:, None, :] * w[None, :, :]).sum(-1) + b

    def check(batch, force_pallas):
        x = jax.random.normal(kx, (batch, IN_FEATURES), dtype=jnp.float32)
        y = dummy_chem_model_forward(x, w, b, force_pallas=force_pallas)
        jax.block_until_ready(y)
        assert y.shape == (batch, OUT_FEATURES)
        assert jnp.allclose(y, reference(x), atol=1e-4, rtol=1e-4)

    # Small shape consistent with the module, forced through the Pallas kernel.
    check(2, force_pallas=True)
    # Copy-free multi-tile path (batch divides cleanly -> bitcast reshape, grid=2).
    check(16384, force_pallas=False)
    # Ragged batch: exercises the pad + output-slice path (grid=2, ~2% padding).
    check(5000, force_pallas=False)
    # Tiny batch via the XLA fallback.
    check(2, force_pallas=False)

    print("KERNEL_OK")
</pallas_src>

<mosaic_0001>
module attributes {stable_mosaic.version = 11 : i64} {
  func.func @_grouped_linear_kernel(%arg0: i32, %arg1: memref<8x640xf32, #tpu.memory_space<vmem>>, %arg2: memref<640x192xf32, #tpu.memory_space<vmem>>, %arg3: memref<1x192xf32, #tpu.memory_space<vmem>>, %arg4: memref<8x192xf32, #tpu.memory_space<vmem>>) attributes {dimension_semantics = [#tpu.dimension_semantics<parallel>], iteration_bounds = array<i64: 1>, scalar_prefetch = 0 : i64, scratch_operands = 0 : i64, tpu.core_type = #tpu.core_type<tc>, window_params = [{transform_indices = @transform_0, window_bounds = array<i64: 8, 640>}, {pipeline_mode = #tpu.pipeline_mode<synchronous>, transform_indices = @transform_1, window_bounds = array<i64: 640, 192>}, {pipeline_mode = #tpu.pipeline_mode<synchronous>, transform_indices = @transform_2, window_bounds = array<i64: 1, 192>}, {transform_indices = @transform_3, window_bounds = array<i64: 8, 192>}]} {
    %c0 = arith.constant 0 : index
    %c0_0 = arith.constant 0 : index
    %0 = vector.load %arg1[%c0, %c0_0] : memref<8x640xf32, #tpu.memory_space<vmem>>, vector<8x640xf32>
    %c0_1 = arith.constant 0 : index
    %c0_2 = arith.constant 0 : index
    %1 = vector.load %arg2[%c0_1, %c0_2] : memref<640x192xf32, #tpu.memory_space<vmem>>, vector<640x192xf32>
    %cst = arith.constant dense<0.000000e+00> : vector<8x192xf32>
    %2 = tpu.matmul %0, %1, %cst {dimension_numbers = #tpu.dot_dimension_numbers<[1], [0], [0], [1], [0, 0, 1, 1], [], []>, precision = #tpu.contract_precision<fp32>} : vector<8x640xf32>, vector<640x192xf32>, vector<8x192xf32> -> vector<8x192xf32>
    %c0_3 = arith.constant 0 : index
    %c0_4 = arith.constant 0 : index
    %3 = vector.load %arg3[%c0_3, %c0_4] : memref<1x192xf32, #tpu.memory_space<vmem>>, vector<1x192xf32>
    %4 = vector.broadcast %3 : vector<1x192xf32> to vector<8x192xf32>
    %5 = arith.addf %2, %4 : vector<8x192xf32>
    %c0_5 = arith.constant 0 : index
    %c0_6 = arith.constant 0 : index
    %6 = vector.load %arg4[%c0_5, %c0_6] : memref<8x192xf32, #tpu.memory_space<vmem>>, vector<8x192xf32>
    tpu.vector_store %arg4[%c0_5, %c0_6], %5 {strides = array<i32>} : memref<8x192xf32, #tpu.memory_space<vmem>>, vector<8x192xf32>,
    return
  }
  func.func @transform_0(%arg0: i32) -> (i32, i32) {
    %c0_i32 = arith.constant 0 : i32
    %c0_i32_0 = arith.constant 0 : i32
    return %arg0, %c0_i32 : i32, i32
  }
  func.func @transform_1(%arg0: i32) -> (i32, i32) {
    %c0_i32 = arith.constant 0 : i32
    %c0_i32_0 = arith.constant 0 : i32
    %c0_i32_1 = arith.constant 0 : i32
    return %c0_i32, %c0_i32_0 : i32, i32
  }
  func.func @transform_2(%arg0: i32) -> (i32, i32) {
    %c0_i32 = arith.constant 0 : i32
    %c0_i32_0 = arith.constant 0 : i32
    %c0_i32_1 = arith.constant 0 : i32
    return %c0_i32, %c0_i32_0 : i32, i32
  }
  func.func @transform_3(%arg0: i32) -> (i32, i32) {
    %c0_i32 = arith.constant 0 : i32
    %c0_i32_0 = arith.constant 0 : i32
    return %arg0, %c0_i32 : i32, i32
  }
}

</mosaic_0001>

<bundles_post_ra>
// kernel: tile.8
= control target key start
LH: loop header
LB: loop body
LE: loop exit
PB: predicated region body
PF: predicated region fallthrough
CT: control target
= control target key end

     0   :  { %s64_s0 = inlined_call_operand.vmem [shape: f32[3], index: 0, kind: input, shape index: {}]   ;;  %s65_s1 = inlined_call_operand.vmem [shape: f32[64,3], index: 1, kind: output, shape index: {}]  }
   0x1   :  { %v4_v0 = vld [vmem:[%s64_s0] ss:$0 sm:$0xff] }
   0x2   :  { %5 = vst [vmem:[%s65_s1] sm:$0xff] %v4_v0  ;;  %20 = vst [vmem:[%s65_s1 + $0x8] sm:$0xff] %v4_v0 }
   0x3   :  { %21 = vst [vmem:[%s65_s1 + $0x10] sm:$0xff] %v4_v0  ;;  %22 = vst [vmem:[%s65_s1 + $0x18] sm:$0xff] %v4_v0 }
   0x4   :  { %23 = vst [vmem:[%s65_s1 + $0x20] sm:$0xff] %v4_v0  ;;  %24 = vst [vmem:[%s65_s1 + $0x28] sm:$0xff] %v4_v0 }
   0x5   :  { %25 = vst [vmem:[%s65_s1 + $0x30] sm:$0xff] %v4_v0  ;;  %26 = vst [vmem:[%s65_s1 + $0x38] sm:$0xff] %v4_v0 }

// kernel: tile.9
= control target key start
LH: loop header
LB: loop body
LE: loop exit
PB: predicated region body
PF: predicated region fallthrough
CT: control target
= control target key end

     0   :  { %vm9_vm0 = vcmask 15360   ;;  %s553_s12 = smov 126   ;;  %s554_s13 = smov 120   ;;  %vm3_vm1 = vcmask 23552   ;;  %vm13_vm2 = vcmask 7168   ;;  %vm16_vm3 = vcmask 1048560   ;;  %s827_s0 = inlined_call_operand.vmem [shape: f32[64,3], index: 0, kind: input, shape index: {}]   ;;  %s828_s1 = inlined_call_operand.vmem [shape: f32[1,192], index: 1, kind: output, shape index: {}]  }
   0x1   :  { %v425_v0 = vld [vmem:[%s827_s0 + $0x2a] sm:$0x1]   ;;  %v428_v3 = vld [vmem:[%s827_s0 + $0x28] sm:$0x1]   ;;  %v427_v4 = vld [vmem:[%s827_s0 + $0x29] sm:$0x1]  }
   0x2   :  { %v426_v1 = vld [vmem:[%s827_s0 + $0x2a] sm:$0x1]   ;;  %26 = vrot.lane.b32.xlu1 %v428_v3, %s554_s13  ;;  %v429_v5 = vld [vmem:[%s827_s0 + $0x27] sm:$0x1]   ;;  %s555_s18 = smov 123   ;;  %s556_s19 = smov 117  }
   0x3   :  { %v10_v2 = vsel %vm9_vm0, %v426_v1, %v425_v0  ;;  %v430_v6 = vld [vmem:[%s827_s0 + $0x26] sm:$0x1]   ;;  %v431_v7 = vld [vmem:[%s827_s0 + $0x25] sm:$0x1]   ;;  %s557_s24 = smov 114   ;;  %s558_s25 = smov 111  }
   0x4   :  { %11 = vrot.lane.b32.xlu0 %v10_v2, %s553_s12  ;;  %v432_v8 = vld [vmem:[%s827_s0 + $0x24] sm:$0x1]   ;;  %v433_v9 = vld [vmem:[%s827_s0 + $0x23] sm:$0x1]   ;;  %s559_s30 = smov 108   ;;  %s560_s2 = smov 105  }
   0x5   :  { %v434_v10 = vld [vmem:[%s827_s0 + $0x22] sm:$0x1]   ;;  %v435_v11 = vld [vmem:[%s827_s0 + $0x21] sm:$0x1]   ;;  %s561_s7 = smov 102   ;;  %s562_s8 = smov 99  }
   0x6   :  { %32 = vrot.lane.b32.xlu1 %v429_v5, %s556_s19  ;;  %v436_v12 = vld [vmem:[%s827_s0 + $0x20] sm:$0x1]   ;;  %v437_v13 = vld [vmem:[%s827_s0 + $0x1f] sm:$0x1]   ;;  %s563_s13 = smov 96   ;;  %s564_s14 = smov 93  }
   0x7   :  { %v438_v14 = vld [vmem:[%s827_s0 + $0x1e] sm:$0x1]   ;;  %v439_v15 = vld [vmem:[%s827_s0 + $0x1d] sm:$0x1]   ;;  %s565_s19 = smov 90   ;;  %s566_s20 = smov 87  }
   0x8   :  { %20 = vrot.lane.b32.xlu0 %v427_v4, %s555_s18  ;;  %v440_v16 = vld [vmem:[%s827_s0 + $0x1c] sm:$0x1]   ;;  %v441_v17 = vld [vmem:[%s827_s0 + $0x1b] sm:$0x1]   ;;  %v2_v18 = vld [vmem:[%s827_s0] sm:$0x1]  }
   0x9   :  { %s567_s27 = smov 84   ;;  %s568_s28 = smov 81   ;;  %4 = vst.msk [vmem:[#allocation0] sm:$0x1] %vm3_vm1, %v2_v18   ;;  %v442_v19 = vld [vmem:[%s827_s0 + $0x1a] sm:$0x1]  }
   0xa   :  { %44 = vrot.lane.b32.xlu1 %v431_v7, %s558_s25  ;;  %v443_v20 = vld [vmem:[%s827_s0 + $0x19] sm:$0x1]   ;;  %s569_s4 = smov 78   ;;  %s570_s5 = smov 75   ;;  %v444_v21 = vld [vmem:[%s827_s0 + $0x18] sm:$0x1]  }
   0xb   :  { %v445_v22 = vld [vmem:[%s827_s0 + $0x17] sm:$0x1]   ;;  %s571_s10 = smov 72   ;;  %s572_s11 = smov 69   ;;  %v446_v23 = vld [vmem:[%s827_s0 + $0x16] sm:$0x1]  }
   0xc   :  { %38 = vrot.lane.b32.xlu0 %v430_v6, %s557_s24  ;;  %v447_v24 = vld [vmem:[%s827_s0 + $0x15] sm:$0x1]   ;;  %s573_s16 = smov 66   ;;  %s574_s17 = smov 63   ;;  %v448_v25 = vld [vmem:[%s827_s0 + $0x3f] sm:$0x1]  }
   0xd   :  { %v449_v26 = vld [vmem:[%s827_s0 + $0x14] sm:$0x1]   ;;  %s575_s22 = smov 61   ;;  %s576_s23 = smov 60   ;;  %v450_v27 = vld [vmem:[%s827_s0 + $0x3e] sm:$0x1]  }
   0xe   :  { %56 = vrot.lane.b32.xlu1 %v433_v9, %s560_s2  ;;  %v451_v28 = vld [vmem:[%s827_s0 + $0x13] sm:$0x1]   ;;  %s578_s29 = smov 57   ;;  %v452_v29 = vld [vmem:[%s827_s0 + $0x3d] sm:$0x1]   ;;  %s580_s6 = smov 54  }
   0xf   :  { %v453_v30 = vld [vmem:[%s827_s0 + $0x12] sm:$0x1]   ;;  %v454_v31 = vld [vmem:[%s827_s0 + $0x3c] sm:$0x1]   ;;  %v455_v32 = vld [vmem:[%s827_s0 + $0x11] sm:$0x1]  }
  0x10   :  { %50 = vrot.lane.b32.xlu0 %v432_v8, %s559_s30  ;;  %s582_s12 = smov 51   ;;  %v456_v33 = vld [vmem:[%s827_s0 + $0x3b] sm:$0x1]   ;;  %v457_v34 = vld [vmem:[%s827_s0 + $0x10] sm:$0x1]   ;;  %s584_s18 = smov 48  }
  0x11   :  { %v458_v35 = vld [vmem:[%s827_s0 + $0x3a] sm:$0x1]   ;;  %v459_v36 = vld [vmem:[%s827_s0 + $0xf] sm:$0x1]   ;;  %s586_s24 = smov 45   ;;  %s588_s30 = smov 42  }
  0x12   :  { %68 = vrot.lane.b32.xlu1 %v435_v11, %s562_s8  ;;  %v460_v37 = vld [vmem:[%s827_s0 + $0x39] sm:$0x1]   ;;  %v461_v38 = vld [vmem:[%s827_s0 + $0xe] sm:$0x1]   ;;  %v462_v39 = vld [vmem:[%s827_s0 + $0x38] sm:$0x1]  }
  0x13   :  { %v463_v40 = vld [vmem:[%s827_s0 + $0xd] sm:$0x1]   ;;  %v464_v41 = vld [vmem:[%s827_s0 + $0x37] sm:$0x1]   ;;  %v465_v42 = vld [vmem:[%s827_s0 + $0xc] sm:$0x1]  }
  0x14   :  { %62 = vrot.lane.b32.xlu0 %v434_v10, %s561_s7  ;;  %s590_s7 = smov 39   ;;  %v466_v43 = vld [vmem:[%s827_s0 + $0x36] sm:$0x1]   ;;  %v467_v44 = vld [vmem:[%s827_s0 + $0xb] sm:$0x1]   ;;  %s596_s25 = smov 30  }
  0x15   :  { %v468_v45 = vld [vmem:[%s827_s0 + $0x35] sm:$0x1]   ;;  %v469_v46 = vld [vmem:[%s827_s0 + $0xa] sm:$0x1]   ;;  %v470_v47 = vld [vmem:[%s827_s0 + $0x34] sm:$0x1]  }
  0x16   :  { %80 = vrot.lane.b32.xlu1 %v437_v13, %s564_s14  ;;  %v471_v48 = vld [vmem:[%s827_s0 + $0x9] sm:$0x1]   ;;  %s598_s2 = smov 27   ;;  %v472_v49 = vld [vmem:[%s827_s0 + $0x33] sm:$0x1]   ;;  %s600_s8 = smov 24  }
  0x17   :  { %v473_v50 = vld [vmem:[%s827_s0 + $0x8] sm:$0x1]   ;;  %v474_v51 = vld [vmem:[%s827_s0 + $0x32] sm:$0x1]   ;;  %v475_v52 = vld [vmem:[%s827_s0 + $0x7] sm:$0x1]  }
  0x18   :  { %74 = vrot.lane.b32.xlu0 %v436_v12, %s563_s13  ;;  %s592_s13 = smov 36   ;;  %s602_s14 = smov 21   ;;  %v476_v53 = vld [vmem:[%s827_s0 + $0x31] sm:$0x1]   ;;  %v477_v54 = vld [vmem:[%s827_s0 + $0x6] sm:$0x1]  }
  0x19   :  { %v478_v55 = vld [vmem:[%s827_s0 + $0x30] sm:$0x1]   ;;  %v479_v56 = vld [vmem:[%s827_s0 + $0x5] sm:$0x1]   ;;  %s606_s26 = smov 15   ;;  %s608_s3 = smov 12  }
  0x1a   :  { %92 = vrot.lane.b32.xlu1 %v439_v15, %s566_s20  ;;  %s604_s20 = smov 18   ;;  %v480_v57 = vld [vmem:[%s827_s0 + $0x2f] sm:$0x1]   ;;  %v481_v58 = vld [vmem:[%s827_s0 + $0x4] sm:$0x1]   ;;  %s610_s9 = smov 9  }
  0x1b   :  { %v482_v59 = vld [vmem:[%s827_s0 + $0x2e] sm:$0x1]   ;;  %v483_v60 = vld [vmem:[%s827_s0 + $0x3] sm:$0x1]   ;;  %v484_v61 = vld [vmem:[%s827_s0 + $0x2d] sm:$0x1]  }
  0x1c   :  { %86 = vrot.lane.b32.xlu0 %v438_v14, %s565_s19  ;;  %s594_s19 = smov 33   ;;  %v485_v62 = vld [vmem:[%s827_s0 + $0x2] sm:$0x1]   ;;  %vm28_vm4 = vcmask 1007552   ;;  %vm22_vm5 = vcmask 1032152   ;;  %s612_s15 = smov 6  }
  0x1d   :  { %v486_v1 = vld [vmem:[%s827_s0 + $0x2c] sm:$0x1]   ;;  %v487_v2 = vld [vmem:[%s827_s0 + $0x1] sm:$0x1]   ;;  %vm34_vm6 = vcmask 982952   ;;  %vm40_vm7 = vcmask 958352  }
  0x1e   :  { %104 = vrot.lane.b32.xlu1 %v441_v17, %s568_s28  ;;  %s577_s28 = smov 58   ;;  %s614_s21 = smov 3   ;;  %v488_v5 = vld [vmem:[%s827_s0 + $0x2b] sm:$0x1]   ;;  %vm46_vm8 = vcmask 933752   ;;  %vm52_vm9 = vcmask 909152  }
  0x1f   :  { %s615_s0 = smov 1   ;;  %vm58_vm10 = vcmask 884552   ;;  %vm64_vm11 = vcmask 859952   ;;  %vm70_vm12 = vcmask 835352   ;;  %vm76_vm13 = vcmask 810752  }
  0x20   :  { %98 = vrot.lane.b32.xlu0 %v440_v16, %s567_s27  ;;  %vm82_vm14 = vcmask 786152   ;;  %vm88_vm15 = vcmask 761552   ;;  %vm94_vm0 = vcmask 736952   ;;  %vm100_vm1 = vcmask 712352  }
  0x22   :  { %116 = vrot.lane.b32.xlu1 %v443_v20, %s570_s5  ;;  %s579_s5 = smov 55  }
  0x24   :  { %110 = vrot.lane.b32.xlu0 %v442_v19, %s569_s4 }
  0x26   :  { %128 = vrot.lane.b32.xlu1 %v445_v22, %s572_s11  ;;  %s581_s11 = smov 52  }
  0x28   :  { %122 = vrot.lane.b32.xlu0 %v444_v21, %s571_s10 }
  0x2a   :  { %140 = vrot.lane.b32.xlu1 %v447_v24, %s574_s17  ;;  %s583_s17 = smov 49  }
  0x2c   :  { %134 = vrot.lane.b32.xlu0 %v446_v23, %s573_s16 }
  0x2e   :  { %153 = vrot.lane.b32.xlu1 %v449_v26, %s576_s23  ;;  %s585_s23 = smov 46  }
  0x30   :  { %146 = vrot.lane.b32.xlu0 %v448_v25, %s575_s22 }
  0x32   :  { %166 = vrot.lane.b32.xlu1 %v451_v28, %s578_s29  ;;  %s587_s29 = smov 43  }
  0x34   :  { %159 = vrot.lane.b32.xlu0 %v450_v27, %s577_s28 }
  0x36   :  { %179 = vrot.lane.b32.xlu1 %v453_v30, %s580_s6  ;;  %s589_s6 = smov 40  }
  0x38   :  { %172 = vrot.lane.b32.xlu0 %v452_v29, %s579_s5 }
  0x3a   :  { %192 = vrot.lane.b32.xlu1 %v455_v32, %s582_s12  ;;  %s591_s12 = smov 37  }
  0x3c   :  { %185 = vrot.lane.b32.xlu0 %v454_v31, %s581_s11 }
  0x3e   :  { %205 = vrot.lane.b32.xlu1 %v457_v34, %s584_s18  ;;  %s593_s18 = smov 34  }
  0x40   :  { %198 = vrot.lane.b32.xlu0 %v456_v33, %s583_s17 }
  0x42   :  { %218 = vrot.lane.b32.xlu1 %v459_v36, %s586_s24  ;;  %s595_s24 = smov 31  }
  0x44   :  { %211 = vrot.lane.b32.xlu0 %v458_v35, %s585_s23 }
  0x46   :  { %231 = vrot.lane.b32.xlu1 %v461_v38, %s588_s30  ;;  %s597_s30 = smov 28  }
  0x48   :  { %224 = vrot.lane.b32.xlu0 %v460_v37, %s587_s29 }
  0x4a   :  { %244 = vrot.lane.b32.xlu1 %v463_v40, %s590_s7  ;;  %s599_s7 = smov 25  }
  0x4c   :  { %237 = vrot.lane.b32.xlu0 %v462_v39, %s589_s6 }
  0x4e   :  { %257 = vrot.lane.b32.xlu1 %v465_v42, %s592_s13  ;;  %s601_s13 = smov 22  }
  0x50   :  { %250 = vrot.lane.b32.xlu0 %v464_v41, %s591_s12 }
  0x52   :  { %270 = vrot.lane.b32.xlu1 %v467_v44, %s594_s19  ;;  %s603_s19 = smov 19  }
  0x54   :  { %263 = vrot.lane.b32.xlu0 %v466_v43, %s593_s18 }
  0x56   :  { %283 = vrot.lane.b32.xlu1 %v469_v46, %s596_s25  ;;  %s605_s25 = smov 16  }
  0x58   :  { %276 = vrot.lane.b32.xlu0 %v468_v45, %s595_s24 }
  0x5a   :  { %296 = vrot.lane.b32.xlu1 %v471_v48, %s598_s2  ;;  %s607_s2 = smov 13  }
  0x5c   :  { %289 = vrot.lane.b32.xlu0 %v470_v47, %s597_s30 }
  0x5e   :  { %309 = vrot.lane.b32.xlu1 %v473_v50, %s600_s8  ;;  %s609_s8 = smov 10  }
  0x60   :  { %302 = vrot.lane.b32.xlu0 %v472_v49, %s599_s7 }
  0x62   :  { %322 = vrot.lane.b32.xlu1 %v475_v52, %s602_s14  ;;  %s611_s14 = smov 7  }
  0x64   :  { %315 = vrot.lane.b32.xlu0 %v474_v51, %s601_s13 }
  0x66   :  { %335 = vrot.lane.b32.xlu1 %v477_v54, %s604_s20  ;;  %s613_s20 = smov 4  }
  0x68   :  { %328 = vrot.lane.b32.xlu0 %v476_v53, %s603_s19 }
  0x6a   :  { %348 = vrot.lane.b32.xlu1 %v479_v56, %s606_s26 }
  0x6c   :  { %341 = vrot.lane.b32.xlu0 %v478_v55, %s605_s25 }
  0x6e   :  { %361 = vrot.lane.b32.xlu1 %v481_v58, %s608_s3 }
  0x70   :  { %354 = vrot.lane.b32.xlu0 %v480_v57, %s607_s2 }
  0x72   :  { %374 = vrot.lane.b32.xlu1 %v483_v60, %s610_s9 }
  0x74   :  { %367 = vrot.lane.b32.xlu0 %v482_v59, %s609_s8  ;;  %v27_v0 = vpop.permute.xlu1 %26  }
  0x76   :  { %v12_v63 = vpop.permute.xlu0 %11   ;;  %387 = vrot.lane.b32.xlu1 %v485_v62, %s612_s15 }
  0x77   :  { %15 = vst.msk [vmem:[#allocation0 + $0x8] sm:$0x1] %vm13_vm2, %v12_v63   ;;  %vm106_vm2 = vcmask 687752  }
  0x78   :  { %17 = vst.msk [vmem:[#allocation0] sm:$0x1] %vm16_vm3, %v12_v63   ;;  %380 = vrot.lane.b32.xlu0 %v484_v61, %s611_s14  ;;  %v33_v4 = vpop.permute.xlu1 %32   ;;  %vm112_vm3 = vcmask 663152  }
  0x7a   :  { %v21_v3 = vpop.permute.xlu0 %20   ;;  %400 = vrot.lane.b32.xlu1 %v487_v2, %s614_s21 }
  0x7b   :  { %23 = vst.msk [vmem:[#allocation0] sm:$0x1] %vm22_vm5, %v21_v3   ;;  %vm124_vm5 = vcmask 613952  }
  0x7c   :  { %29 = vst.msk [vmem:[#allocation0] sm:$0x1] %vm28_vm4, %v27_v0   ;;  %393 = vrot.lane.b32.xlu0 %v486_v1, %s613_s20  ;;  %v45_v7 = vpop.permute.xlu1 %44   ;;  %vm118_vm4 = vcmask 638552  }
  0x7d   :  { %35 = vst.msk [vmem:[#allocation0] sm:$0x1] %vm34_vm6, %v33_v4   ;;  %vm130_vm6 = vcmask 589352  }
  0x7e   :  { %v39_v6 = vpop.permute.xlu0 %38  }
  0x7f   :  { %41 = vst.msk [vmem:[#allocation0] sm:$0x1] %vm40_vm7, %v39_v6   ;;  %vm136_vm7 = vcmask 564752  }
  0x80   :  { %406 = vrot.lane.b32.xlu0 %v488_v5, %s615_s0  ;;  %47 = vst.msk [vmem:[#allocation0] sm:$0x1] %vm46_vm8, %v45_v7   ;;  %v57_v9 = vpop.permute.xlu1 %56   ;;  %vm142_vm8 = vcmask 540152  }
  0x82   :  { %v51_v8 = vpop.permute.xlu0 %50  }
  0x83   :  { %53 = vst.msk [vmem:[#allocation0] sm:$0x1] %vm52_vm9, %v51_v8   ;;  %vm148_vm9 = vcmask 523752  }
  0x84   :  { %59 = vst.msk [vmem:[#allocation0] sm:$0x1] %vm58_vm10, %v57_v9   ;;  %v69_v11 = vpop.permute.xlu1 %68   ;;  %vm155_vm10 = vcmask 515552  }
  0x86   :  { %v63_v10 = vpop.permute.xlu0 %62  }
  0x87   :  { %65 = vst.msk [vmem:[#allocation0] sm:$0x1] %vm64_vm11, %v63_v10   ;;  %vm161_vm11 = vcmask 499152  }
  0x88   :  { %71 = vst.msk [vmem:[#allocation0] sm:$0x1] %vm70_vm12, %v69_v11   ;;  %v81_v13 = vpop.permute.xlu1 %80   ;;  %vm168_vm12 = vcmask 490952  }
  0x8a   :  { %v75_v12 = vpop.permute.xlu0 %74  }
  0x8b   :  { %77 = vst.msk [vmem:[#allocation0] sm:$0x1] %vm76_vm13, %v75_v12   ;;  %vm174_vm13 = vcmask 474552  }
  0x8c   :  { %83 = vst.msk [vmem:[#allocation0] sm:$0x1] %vm82_vm14, %v81_v13   ;;  %v93_v15 = vpop.permute.xlu1 %92   ;;  %vm181_vm14 = vcmask 466352  }
  0x8e   :  { %v87_v14 = vpop.permute.xlu0 %86  }
  0x8f   :  { %89 = vst.msk [vmem:[#allocation0] sm:$0x1] %vm88_vm15, %v87_v14   ;;  %vm187_vm15 = vcmask 449952  }
  0x90   :  { %95 = vst.msk [vmem:[#allocation0] sm:$0x1] %vm94_vm0, %v93_v15   ;;  %v105_v17 = vpop.permute.xlu1 %104   ;;  %vm194_vm0 = vcmask 441752  }
  0x92   :  { %v99_v16 = vpop.permute.xlu0 %98  }
  0x93   :  { %101 = vst.msk [vmem:[#allocation0] sm:$0x1] %vm100_vm1, %v99_v16   ;;  %vm200_vm1 = vcmask 425352  }
  0x94   :  { %107 = vst.msk [vmem:[#allocation0] sm:$0x1] %vm106_vm2, %v105_v17   ;;  %v117_v19 = vpop.permute.xlu1 %116   ;;  %vm207_vm2 = vcmask 417152  }
  0x96   :  { %v111_v18 = vpop.permute.xlu0 %110  }
  0x97   :  { %113 = vst.msk [vmem:[#allocation0] sm:$0x1] %vm112_vm3, %v111_v18   ;;  %vm213_vm3 = vcmask 400752  }
  0x98   :  { %119 = vst.msk [vmem:[#allocation0] sm:$0x1] %vm118_vm4, %v117_v19   ;;  %v129_v21 = vpop.permute.xlu1 %128   ;;  %vm220_vm4 = vcmask 392552  }
  0x9a   :  { %v123_v20 = vpop.permute.xlu0 %122  }
  0x9b   :  { %125 = vst.msk [vmem:[#allocation0] sm:$0x1] %vm124_vm5, %v123_v20   ;;  %vm226_vm5 = vcmask 376152  }
  0x9c   :  { %131 = vst.msk [vmem:[#allocation0] sm:$0x1] %vm130_vm6, %v129_v21   ;;  %v141_v23 = vpop.permute.xlu1 %140   ;;  %vm233_vm6 = vcmask 367952  }
  0x9e   :  { %v135_v22 = vpop.permute.xlu0 %134  }
  0x9f   :  { %137 = vst.msk [vmem:[#allocation0] sm:$0x1] %vm136_vm7, %v135_v22   ;;  %vm239_vm7 = vcmask 351552  }
  0xa0   :  { %143 = vst.msk [vmem:[#allocation0] sm:$0x1] %vm142_vm8, %v141_v23   ;;  %v154_v25 = vpop.permute.xlu1 %153   ;;  %vm246_vm8 = vcmask 343352  }
  0xa1   :  { %156 = vst.msk [vmem:[#allocation0] sm:$0x1] %vm155_vm10, %v154_v25   ;;  %vm259_vm10 = vcmask 318752  }
  0xa2   :  { %v147_v24 = vpop.permute.xlu0 %146  }
  0xa3   :  { %150 = vst.msk [vmem:[#allocation0 + $0x8] sm:$0x1] %vm148_vm9, %v147_v24   ;;  %vm252_vm9 = vcmask 326952  }
  0xa4   :  { %v167_v27 = vpop.permute.xlu1 %166  }
  0xa5   :  { %169 = vst.msk [vmem:[#allocation0] sm:$0x1] %vm168_vm12, %v167_v27   ;;  %vm272_vm12 = vcmask 294152  }
  0xa6   :  { %v160_v26 = vpop.permute.xlu0 %159  }
  0xa7   :  { %163 = vst.msk [vmem:[#allocation0 + $0x8] sm:$0x1] %vm161_vm11, %v160_v26   ;;  %vm265_vm11 = vcmask 302352  }
  0xa8   :  { %v180_v29 = vpop.permute.xlu1 %179  }
  0xa9   :  { %182 = vst.msk [vmem:[#allocation0] sm:$0x1] %vm181_vm14, %v180_v29   ;;  %vm285_vm14 = vcmask 269552  }
  0xaa   :  { %v173_v28 = vpop.permute.xlu0 %172  }
  0xab   :  { %176 = vst.msk [vmem:[#allocation0 + $0x8] sm:$0x1] %vm174_vm13, %v173_v28   ;;  %vm278_vm13 = vcmask 277752  }
  0xac   :  { %v193_v31 = vpop.permute.xlu1 %192  }
  0xad   :  { %195 = vst.msk [vmem:[#allocation0] sm:$0x1] %vm194_vm0, %v193_v31   ;;  %vm298_vm0 = vcmask 244952  }
  0xae   :  { %v186_v30 = vpop.permute.xlu0 %185  }
  0xaf   :  { %189 = vst.msk [vmem:[#allocation0 + $0x8] sm:$0x1] %vm187_vm15, %v186_v30   ;;  %vm291_vm15 = vcmask 253152  }
  0xb0   :  { %v206_v33 = vpop.permute.xlu1 %205  }
  0xb1   :  { %208 = vst.msk [vmem:[#allocation0] sm:$0x1] %vm207_vm2, %v206_v33   ;;  %vm311_vm2 = vcmask 220352  }
  0xb2   :  { %v199_v32 = vpop.permute.xlu0 %198  }
  0xb3   :  { %202 = vst.msk [vmem:[#allocation0 + $0x8] sm:$0x1] %vm200_vm1, %v199_v32   ;;  %vm304_vm1 = vcmask 228552  }
  0xb4   :  { %v219_v35 = vpop.permute.xlu1 %218  }
  0xb5   :  { %221 = vst.msk [vmem:[#allocation0] sm:$0x1] %vm220_vm4, %v219_v35   ;;  %vm324_vm4 = vcmask 195752  }
  0xb6   :  { %v212_v34 = vpop.permute.xlu0 %211  }
  0xb7   :  { %215 = vst.msk [vmem:[#allocation0 + $0x8] sm:$0x1] %vm213_vm3, %v212_v34   ;;  %vm317_vm3 = vcmask 203952  }
  0xb8   :  { %v232_v37 = vpop.permute.xlu1 %231  }
  0xb9   :  { %234 = vst.msk [vmem:[#allocation0] sm:$0x1] %vm233_vm6, %v232_v37   ;;  %vm337_vm6 = vcmask 171152  }
  0xba   :  { %v225_v36 = vpop.permute.xlu0 %224  }
  0xbb   :  { %228 = vst.msk [vmem:[#allocation0 + $0x8] sm:$0x1] %vm226_vm5, %v225_v36   ;;  %vm330_vm5 = vcmask 179352  }
  0xbc   :  { %v245_v39 = vpop.permute.xlu1 %244  }
  0xbd   :  { %247 = vst.msk [vmem:[#allocation0] sm:$0x1] %vm246_vm8, %v245_v39   ;;  %vm350_vm8 = vcmask 146552  }
  0xbe   :  { %v238_v38 = vpop.permute.xlu0 %237  }
  0xbf   :  { %241 = vst.msk [vmem:[#allocation0 + $0x8] sm:$0x1] %vm239_vm7, %v238_v38   ;;  %vm343_vm7 = vcmask 154752  }
  0xc0   :  { %v258_v41 = vpop.permute.xlu1 %257  }
  0xc1   :  { %260 = vst.msk [vmem:[#allocation0] sm:$0x1] %vm259_vm10, %v258_v41   ;;  %vm363_vm10 = vcmask 121952  }
  0xc2   :  { %v251_v40 = vpop.permute.xlu0 %250  }
  0xc3   :  { %254 = vst.msk [vmem:[#allocation0 + $0x8] sm:$0x1] %vm252_vm9, %v251_v40   ;;  %vm356_vm9 = vcmask 130152  }
  0xc4   :  { %v271_v43 = vpop.permute.xlu1 %270  }
  0xc5   :  { %273 = vst.msk [vmem:[#allocation0] sm:$0x1] %vm272_vm12, %v271_v43   ;;  %vm376_vm12 = vcmask 97352  }
  0xc6   :  { %v264_v42 = vpop.permute.xlu0 %263  }
  0xc7   :  { %267 = vst.msk [vmem:[#allocation0 + $0x8] sm:$0x1] %vm265_vm11, %v264_v42   ;;  %vm369_vm11 = vcmask 105552  }
  0xc8   :  { %v284_v45 = vpop.permute.xlu1 %283  }
  0xc9   :  { %286 = vst.msk [vmem:[#allocation0] sm:$0x1] %vm285_vm14, %v284_v45   ;;  %vm389_vm14 = vcmask 72752  }
  0xca   :  { %v277_v44 = vpop.permute.xlu0 %276  }
  0xcb   :  { %280 = vst.msk [vmem:[#allocation0 + $0x8] sm:$0x1] %vm278_vm13, %v277_v44   ;;  %vm382_vm13 = vcmask 80952  }
  0xcc   :  { %v297_v47 = vpop.permute.xlu1 %296  }
  0xcd   :  { %299 = vst.msk [vmem:[#allocation0] sm:$0x1] %vm298_vm0, %v297_v47   ;;  %vm402_vm0 = vcmask 48152  }
  0xce   :  { %v290_v46 = vpop.permute.xlu0 %289  }
  0xcf   :  { %293 = vst.msk [vmem:[#allocation0 + $0x8] sm:$0x1] %vm291_vm15, %v290_v46   ;;  %vm395_vm15 = vcmask 56352  }
  0xd0   :  { %v310_v49 = vpop.permute.xlu1 %309  }
  0xd1   :  { %312 = vst.msk [vmem:[#allocation0] sm:$0x1] %vm311_vm2, %v310_v49  }
  0xd2   :  { %v303_v48 = vpop.permute.xlu0 %302  }
  0xd3   :  { %306 = vst.msk [vmem:[#allocation0 + $0x8] sm:$0x1] %vm304_vm1, %v303_v48   ;;  %vm408_vm1 = vcmask 31752  }
  0xd4   :  { %v323_v51 = vpop.permute.xlu1 %322  }
  0xd5   :  { %325 = vst.msk [vmem:[#allocation0] sm:$0x1] %vm324_vm4, %v323_v51  }
  0xd6   :  { %v316_v50 = vpop.permute.xlu0 %315  }
  0xd7   :  { %319 = vst.msk [vmem:[#allocation0 + $0x8] sm:$0x1] %vm317_vm3, %v316_v50  }
  0xd8   :  { %v336_v53 = vpop.permute.xlu1 %335  }
  0xd9   :  { %338 = vst.msk [vmem:[#allocation0] sm:$0x1] %vm337_vm6, %v336_v53  }
  0xda   :  { %v329_v52 = vpop.permute.xlu0 %328  }
  0xdb   :  { %332 = vst.msk [vmem:[#allocation0 + $0x8] sm:$0x1] %vm330_vm5, %v329_v52  }
  0xdc   :  { %v349_v55 = vpop.permute.xlu1 %348  }
  0xdd   :  { %351 = vst.msk [vmem:[#allocation0] sm:$0x1] %vm350_vm8, %v349_v55  }
  0xde   :  { %v342_v54 = vpop.permute.xlu0 %341  }
  0xdf   :  { %345 = vst.msk [vmem:[#allocation0 + $0x8] sm:$0x1] %vm343_vm7, %v342_v54  }
  0xe0   :  { %v362_v57 = vpop.permute.xlu1 %361  }
  0xe1   :  { %364 = vst.msk [vmem:[#allocation0] sm:$0x1] %vm363_vm10, %v362_v57  }
  0xe2   :  { %v355_v56 = vpop.permute.xlu0 %354  }
  0xe3   :  { %358 = vst.msk [vmem:[#allocation0 + $0x8] sm:$0x1] %vm356_vm9, %v355_v56  }
  0xe4   :  { %v375_v59 = vpop.permute.xlu1 %374  }
  0xe5   :  { %377 = vst.msk [vmem:[#allocation0] sm:$0x1] %vm376_vm12, %v375_v59  }
  0xe6   :  { %v368_v58 = vpop.permute.xlu0 %367  }
  0xe7   :  { %371 = vst.msk [vmem:[#allocation0 + $0x8] sm:$0x1] %vm369_vm11, %v368_v58  }
  0xe8   :  { %v388_v61 = vpop.permute.xlu1 %387  }
  0xe9   :  { %390 = vst.msk [vmem:[#allocation0] sm:$0x1] %vm389_vm14, %v388_v61  }
  0xea   :  { %v381_v60 = vpop.permute.xlu0 %380  }
  0xeb   :  { %384 = vst.msk [vmem:[#allocation0 + $0x8] sm:$0x1] %vm382_vm13, %v381_v60  }
  0xec   :  { %v401_v63 = vpop.permute.xlu1 %400  }
  0xed   :  { %403 = vst.msk [vmem:[#allocation0] sm:$0x1] %vm402_vm0, %v401_v63  }
  0xee   :  { %v394_v62 = vpop.permute.xlu0 %393  }
  0xef   :  { %397 = vst.msk [vmem:[#allocation0 + $0x8] sm:$0x1] %vm395_vm15, %v394_v62  }
  0xf2   :  { %v407_v0 = vpop.permute.xlu0 %406  }
  0xf3   :  { %410 = vst.msk [vmem:[#allocation0 + $0x8] sm:$0x1] %vm408_vm1, %v407_v0  }
  0xf4   :  { %v415_v1 = vld [vmem:[#allocation0] sm:$0x1] }
  0xf5   :  { %418 = vst [vmem:[%s828_s1] sm:$0x1] %v415_v1 }
  0xfa   :  { %v420_v2 = vld [vmem:[#allocation0 + $0x8] sm:$0x1] }
  0xfb   :  { %489 = vst [vmem:[%s828_s1 + $0x1] sm:$0x1] %v420_v2 }

// kernel: dummy_chem_model_forward.1
= control target key start
LH: loop header
LB: loop body
LE: loop exit
PB: predicated region body
PF: predicated region fallthrough
CT: control target
= control target key end

     0   :  { %vm3615_vm0 = vcmask 523264   ;;  %s7129_s1 = inlined_call_operand.vmem [shape: f32[640,192], index: 1, kind: input, shape index: {}]   ;;  %s7130_s0 = inlined_call_operand.vmem [shape: f32[8,640], index: 0, kind: input, shape index: {}]   ;;  %s7131_s2 = inlined_call_operand.vmem [shape: f32[1,192], index: 2, kind: input, shape index: {}]   ;;  %s7132_s3 = inlined_call_operand.vmem [shape: f32[8,192], index: 3, kind: output, shape index: {}]  }
   0x1   :  { %v50_v0 = vld [vmem:[%s7129_s1 + $0xf8] sm:$0xff]  ;;  %v49_v1 = vld [vmem:[%s7129_s1 + $0xf0] sm:$0xff]  ;;  %v48_v2 = vld [vmem:[%s7129_s1 + $0xe8] sm:$0xff] }
   0x2   :  { %v3652_v3 = vand.u32 4294901760, %v50_v0  ;;  %v3654_v4 = vand.u32 4294901760, %v49_v1  ;;  %v3656_v5 = vand.u32 4294901760, %v48_v2  ;;  %v47_v6 = vld [vmem:[%s7129_s1 + $0xe0] sm:$0xff]  ;;  %v46_v7 = vld [vmem:[%s7129_s1 + $0xd8] sm:$0xff]  ;;  %v45_v8 = vld [vmem:[%s7129_s1 + $0xd0] sm:$0xff] }
   0x3   :  { %v3667_v9 = vand.u32 4294901760, %v47_v6  ;;  %v3669_v10 = vand.u32 4294901760, %v46_v7  ;;  %v3671_v11 = vand.u32 4294901760, %v45_v8  ;;  %v44_v12 = vld [vmem:[%s7129_s1 + $0xc8] sm:$0xff]  ;;  %v43_v13 = vld [vmem:[%s7129_s1 + $0xc0] sm:$0xff]  ;;  %v42_v14 = vld [vmem:[%s7129_s1 + $0xb8] sm:$0xff] }
   0x4   :  { %192 = vmatprep.subr.mxu0 %v3652_v3  ;;  %v3683_v15 = vand.u32 4294901760, %v44_v12  ;;  %v3685_v16 = vand.u32 4294901760, %v43_v13  ;;  %v3687_v17 = vand.u32 4294901760, %v42_v14  ;;  %v3690_v18 = vsub.f32 %v50_v0, %v3652_v3  ;;  %v3695_v19 = vld [vmem:[%s7129_s1 + $0xb0] sm:$0xff]  ;;  %v3700_v20 = vld [vmem:[%s7129_s1 + $0xa8] sm:$0xff]  ;;  %v3705_v21 = vld [vmem:[%s7129_s1 + $0xa0] sm:$0xff] }
   0x5   :  { %194 = vmatpush1.msra.mxu0 %v3654_v4  ;;  %v3709_v22 = vand.u32 4294901760, %v3695_v19  ;;  %v3712_v23 = vsub.f32 %v49_v1, %v3654_v4  ;;  %v3715_v24 = vand.u32 4294901760, %v3700_v20  ;;  %v3718_v25 = vsub.f32 %v48_v2, %v3656_v5  ;;  %v3723_v26 = vld [vmem:[%s7129_s1 + $0x98] sm:$0xff]  ;;  %v3728_v27 = vld [vmem:[%s7129_s1 + $0x90] sm:$0xff]  ;;  %v3733_v28 = vld [vmem:[%s7129_s1 + $0x88] sm:$0xff] }
   0x6   :  { %196 = vmatprep.subr.mxu0 %v3656_v5  ;;  %v7146_v29 = vand.u32 4294901760, %v3690_v18  ;;  %v3738_v30 = vand.u32 4294901760, %v3705_v21  ;;  %v3741_v31 = vsub.f32 %v47_v6, %v3667_v9  ;;  %v3744_v32 = vand.u32 4294901760, %v3723_v26  ;;  %v3758_v37 = vld [vmem:[%s7129_s1 + $0x80] sm:$0xff]  ;;  %v3785_v46 = vld [vmem:[%s7129_s1 + $0x78] sm:$0xff]  ;;  %v3798_v51 = vld [vmem:[%s7129_s1 + $0x70] sm:$0xff] }
   0x7   :  { %198 = vmatpush1.msra.mxu0 %v3667_v9  ;;  %v7145_v33 = vand.u32 4294901760, %v3712_v23  ;;  %v7143_v34 = vand.u32 4294901760, %v3718_v25  ;;  %v3750_v35 = vsub.f32 %v46_v7, %v3669_v10  ;;  %v3753_v36 = vand.u32 4294901760, %v3728_v27  ;;  %v3808_v56 = vld [vmem:[%s7129_s1 + $0x68] sm:$0xff]  ;;  %v3823_v61 = vld [vmem:[%s7129_s1 + $0x60] sm:$0xff]  ;;  %v3838_v2 = vld [vmem:[%s7129_s1 + $0x58] sm:$0xff] }
   0x8   :  { %7619 = vst [vmem:[#allocation2_spill] sm:$0xff] %v3738_v30  ;;  %7620 = vst [vmem:[#allocation3_spill] sm:$0xff] %v3744_v32  ;;  %200 = vmatprep.subr.mxu0 %v3669_v10  ;;  %v339_v38 = vsub.f32 %v3690_v18, %v7146_v29  ;;  %v7142_v39 = vand.u32 4294901760, %v3741_v31  ;;  %v3766_v40 = vsub.f32 %v45_v8, %v3671_v11  ;;  %v3769_v41 = vand.u32 4294901760, %v3733_v28 }
   0x9   :  { %7621 = vst [vmem:[#allocation4_spill] sm:$0xff] %v3753_v36  ;;  %202 = vmatpush1.msra.mxu0 %v3671_v11  ;;  %v345_v42 = vsub.f32 %v3712_v23, %v7145_v33  ;;  %v351_v43 = vsub.f32 %v3718_v25, %v7143_v34  ;;  %v7140_v44 = vand.u32 4294901760, %v3750_v35  ;;  %v3780_v45 = vsub.f32 %v44_v12, %v3683_v15  ;;  %v3974_v33 = vld [vmem:[%s7129_s1 + $0x18] sm:$0xff] }
   0xa   :  { %7622 = vst [vmem:[#allocation5_spill] sm:$0xff] %v3769_v41  ;;  %204 = vmatprep.subr.mxu0 %v3683_v15  ;;  %v340_v47 = vand.u32 4294901760, %v339_v38  ;;  %v357_v48 = vsub.f32 %v3741_v31, %v7142_v39  ;;  %v7138_v49 = vand.u32 4294901760, %v3766_v40  ;;  %v3793_v50 = vand.u32 4294901760, %v3758_v37 }
   0xb   :  { %206 = vmatpush1.msra.mxu0 %v3685_v16  ;;  %v346_v52 = vand.u32 4294901760, %v345_v42  ;;  %v352_v53 = vand.u32 4294901760, %v351_v43  ;;  %v363_v54 = vsub.f32 %v3750_v35, %v7140_v44  ;;  %v7137_v55 = vand.u32 4294901760, %v3780_v45  ;;  %v3947_v44 = vld [vmem:[%s7129_s1 + $0x28] sm:$0xff] }
   0xc   :  { %7623 = vst [vmem:[#allocation6_spill] sm:$0xff] %v3793_v50  ;;  %208 = vmatprep.subr.mxu0 %v3687_v17  ;;  %341 = vmatprep.subr.mxu1 %v340_v47  ;;  %v358_v57 = vand.u32 4294901760, %v357_v48  ;;  %v369_v58 = vsub.f32 %v3766_v40, %v7138_v49  ;;  %v3815_v59 = vsub.f32 %v43_v13, %v3685_v16  ;;  %v3818_v60 = vand.u32 4294901760, %v3785_v46  ;;  %v3852_v13 = vld [vmem:[%s7129_s1 + $0x50] sm:$0xff] }
   0xd   :  { %210 = vmatpush1.msra.mxu0 %v3709_v22  ;;  %347 = vmatpush1.msra.mxu1 %v346_v52  ;;  %v364_v62 = vand.u32 4294901760, %v363_v54  ;;  %v375_v63 = vsub.f32 %v3780_v45, %v7137_v55  ;;  %v3830_v0 = vsub.f32 %v42_v14, %v3687_v17  ;;  %v3833_v1 = vand.u32 4294901760, %v3798_v51  ;;  %v3931_v49 = vld [vmem:[%s7129_s1 + $0x30] sm:$0xff] }
   0xe   :  { %7624 = vst [vmem:[#allocation7_spill] sm:$0xff] %v3818_v60  ;;  %212 = vmatprep.subr.mxu0 %v3715_v24  ;;  %353 = vmatprep.subr.mxu1 %v352_v53  ;;  %v370_v6 = vand.u32 4294901760, %v369_v58  ;;  %v7135_v7 = vand.u32 4294901760, %v3815_v59  ;;  %v3844_v8 = vsub.f32 %v3695_v19, %v3709_v22  ;;  %v3847_v12 = vand.u32 4294901760, %v3808_v56 }
   0xf   :  { %7625 = vst [vmem:[#allocation8_spill] sm:$0xff] %v3833_v1  ;;  %214 = vmatpush1.msra.mxu0 %v3738_v30  ;;  %359 = vmatpush1.msra.mxu1 %v358_v57  ;;  %v376_v14 = vand.u32 4294901760, %v375_v63  ;;  %v7133_v38 = vand.u32 4294901760, %v3830_v0  ;;  %v3858_v42 = vsub.f32 %v3700_v20, %v3715_v24  ;;  %v3861_v19 = vand.u32 4294901760, %v3823_v61  ;;  %v3878_v20 = vld [vmem:[%s7129_s1 + $0x48] sm:$0xff] }
  0x10   :  { %7626 = vst [vmem:[#allocation9_spill] sm:$0xff] %v3847_v12  ;;  %216 = vmatprep.subr.mxu0 %v3744_v32  ;;  %365 = vmatprep.subr.mxu1 %v364_v62  ;;  %v381_v43 = vsub.f32 %v3815_v59, %v7135_v7  ;;  %v7134_v47 = vand.u32 4294901760, %v3844_v8  ;;  %v3870_v48 = vsub.f32 %v3705_v21, %v3738_v30  ;;  %v3873_v52 = vand.u32 4294901760, %v3838_v2 }
  0x11   :  { %7627 = vst [vmem:[#allocation10_spill] sm:$0xff] %v3861_v19  ;;  %218 = vmatpush1.msra.mxu0 %v3753_v36  ;;  %371 = vmatpush1.msra.mxu1 %v370_v6  ;;  %v387_v53 = vsub.f32 %v3830_v0, %v7133_v38  ;;  %v7136_v54 = vand.u32 4294901760, %v3858_v42  ;;  %v3887_v21 = vsub.f32 %v3723_v26, %v3744_v32  ;;  %v3890_v57 = vand.u32 4294901760, %v3852_v13  ;;  %v3904_v26 = vld [vmem:[%s7129_s1 + $0x40] sm:$0xff] }
  0x12   :  { %7628 = vst [vmem:[#allocation11_spill] sm:$0xff] %v3873_v52  ;;  %220 = vmatprep.subr.mxu0 %v3769_v41  ;;  %377 = vmatprep.subr.mxu1 %v376_v14  ;;  %v382_v58 = vand.u32 4294901760, %v381_v43  ;;  %v393_v62 = vsub.f32 %v3844_v8, %v7134_v47  ;;  %v7139_v63 = vand.u32 4294901760, %v3870_v48  ;;  %v3899_v6 = vsub.f32 %v3728_v27, %v3753_v36  ;;  %v3917_v27 = vld [vmem:[%s7129_s1 + $0x38] sm:$0xff]  ;;  %v4085_v36 = vld [vmem:[%s7129_s1 + $0x1e8] sm:$0xff] }
  0x13   :  { %7629 = vst [vmem:[#allocation12_spill] sm:$0xff] %v3890_v57  ;;  %222 = vmatpush1.msra.mxu0 %v3793_v50  ;;  %v388_v38 = vand.u32 4294901760, %v387_v53  ;;  %v399_v14 = vsub.f32 %v3858_v42, %v7136_v54  ;;  %v7141_v43 = vand.u32 4294901760, %v3887_v21  ;;  %v3912_v47 = vand.u32 4294901760, %v3878_v20 }
  0x14   :  { %383 = vmatpush1.msra.mxu1 %v382_v58  ;;  %224 = vmatprep.subr.mxu0 %v3818_v60  ;;  %v394_v7 = vand.u32 4294901760, %v393_v62  ;;  %v405_v53 = vsub.f32 %v3870_v48, %v7139_v63  ;;  %v7144_v54 = vand.u32 4294901760, %v3899_v6  ;;  %v3926_v55 = vsub.f32 %v3733_v28, %v3769_v41  ;;  %v4069_v41 = vld [vmem:[%s7129_s1 + $0x1f0] sm:$0xff] }
  0x15   :  { %7630 = vst [vmem:[#allocation13_spill] sm:$0xff] %v3912_v47  ;;  %389 = vmatprep.subr.mxu1 %v388_v38  ;;  %226 = vmatpush1.msra.mxu0 %v3833_v1  ;;  %v400_v58 = vand.u32 4294901760, %v399_v14  ;;  %v411_v62 = vsub.f32 %v3887_v21, %v7141_v43  ;;  %v3938_v63 = vand.u32 4294901760, %v3904_v26  ;;  %v3942_v28 = vsub.f32 %v3758_v37, %v3793_v50  ;;  %v3960_v37 = vld [vmem:[%s7129_s1 + $0x20] sm:$0xff] }
  0x16   :  { %395 = vmatpush1.msra.mxu1 %v394_v7  ;;  %228 = vmatprep.subr.mxu0 %v3847_v12  ;;  %v406_v38 = vand.u32 4294901760, %v405_v53  ;;  %v417_v14 = vsub.f32 %v3899_v6, %v7144_v54  ;;  %v7149_v43 = vand.u32 4294901760, %v3926_v55  ;;  %v3955_v39 = vand.u32 4294901760, %v3917_v27 }
  0x17   :  { %7631 = vst [vmem:[#allocation14_spill] sm:$0xff] %v3938_v63  ;;  %401 = vmatprep.subr.mxu1 %v400_v58  ;;  %230 = vmatpush1.msra.mxu0 %v3861_v19  ;;  %v412_v7 = vand.u32 4294901760, %v411_v62  ;;  %v7150_v53 = vand.u32 4294901760, %v3942_v28  ;;  %v3966_v34 = vsub.f32 %v3785_v46, %v3818_v60  ;;  %v3969_v54 = vand.u32 4294901760, %v3931_v49 }
  0x18   :  { %7632 = vst [vmem:[#allocation15_spill] sm:$0xff] %v3955_v39  ;;  %407 = vmatpush1.msra.mxu1 %v406_v38  ;;  %232 = vmatprep.subr.mxu0 %v3873_v52  ;;  %v418_v58 = vand.u32 4294901760, %v417_v14  ;;  %v423_v62 = vsub.f32 %v3926_v55, %v7149_v43  ;;  %v3982_v46 = vsub.f32 %v3798_v51, %v3833_v1  ;;  %v3985_v29 = vand.u32 4294901760, %v3947_v44  ;;  %v4002_v51 = vld [vmem:[%s7129_s1 + $0x10] sm:$0xff] }
  0x19   :  { %7633 = vst [vmem:[#allocation16_spill] sm:$0xff] %v3969_v54  ;;  %413 = vmatprep.subr.mxu1 %v412_v7  ;;  %234 = vmatpush1.msra.mxu0 %v3890_v57  ;;  %v429_v38 = vsub.f32 %v3942_v28, %v7150_v53  ;;  %v3994_v60 = vsub.f32 %v3808_v56, %v3847_v12  ;;  %v3997_v43 = vand.u32 4294901760, %v3960_v37  ;;  %v4011_v56 = vand.u32 4294901760, %v3974_v33  ;;  %v4016_v12 = vld [vmem:[%s7129_s1 + $0x8] sm:$0xff] }
  0x1a   :  { %7634 = vst [vmem:[#allocation17_spill] sm:$0xff] %v3985_v29  ;;  %419 = vmatpush1.msra.mxu1 %v418_v58  ;;  %236 = vmatprep.subr.mxu0 %v3912_v47  ;;  %v424_v7 = vand.u32 4294901760, %v423_v62  ;;  %v4008_v14 = vsub.f32 %v3823_v61, %v3861_v19  ;;  %v7638_v1 = vand.u32 4294901760, %v3966_v34  ;;  %v4025_v61 = vsub.f32 %v3838_v2, %v3873_v52  ;;  %v4042_v2 = vld [vmem:[%s7129_s1] sm:$0xff] }
  0x1b   :  { %7635 = vst [vmem:[#allocation18_spill] sm:$0xff] %v3997_v43  ;;  %7637 = vst [vmem:[#allocation20_spill] sm:$0xff] %v4011_v56  ;;  %238 = vmatpush1.msra.mxu0 %v3938_v63  ;;  %v430_v58 = vand.u32 4294901760, %v429_v38  ;;  %v7167_v53 = vand.u32 4294901760, %v3994_v60  ;;  %v7640_v19 = vand.u32 4294901760, %v3982_v46  ;;  %v4033_v38 = vand.u32 4294901760, %v4002_v51 }
  0x1c   :  { %7636 = vst [vmem:[#allocation19_spill] sm:$0xff] %v4008_v14  ;;  %v435_v62 = vsub.f32 %v3966_v34, %v7638_v1  ;;  %7639 = vst [vmem:[#allocation21_spill] sm:$0xff] %v4025_v61  ;;  %425 = vmatprep.subr.mxu1 %v424_v7  ;;  %240 = vmatprep.subr.mxu0 %v3955_v39  ;;  %v4037_v1 = vsub.f32 %v3852_v13, %v3890_v57  ;;  %v4050_v52 = vand.u32 4294901760, %v4016_v12  ;;  %v4055_v13 = vld [vmem:[%s7129_s1 + $0x1f8] sm:$0xff] }
  0x1d   :  { %v441_v50 = vsub.f32 %v3982_v46, %v7640_v19  ;;  %7641 = vst [vmem:[#allocation22_spill] sm:$0xff] %v4033_v38  ;;  %431 = vmatpush1.msra.mxu1 %v430_v58  ;;  %242 = vmatpush1.msra.mxu0 %v3969_v54  ;;  %v447_v19 = vsub.f32 %v3994_v60, %v7167_v53  ;;  %v7644_v58 = vand.u32 4294901760, %v4008_v14 }
  0x1e   :  { %7642 = vst [vmem:[#allocation23_spill] sm:$0xff] %v4037_v1  ;;  %v436_v7 = vand.u32 4294901760, %v435_v62  ;;  %7643 = vst [vmem:[#allocation24_spill] sm:$0xff] %v4050_v52  ;;  %244 = vmatprep.subr.mxu0 %v3985_v29  ;;  %v4064_v53 = vsub.f32 %v3878_v20, %v3912_v47  ;;  %v4080_v20 = vsub.f32 %v3904_v26, %v3938_v63  ;;  %v4098_v26 = vld [vmem:[%s7129_s1 + $0x1e0] sm:$0xff]  ;;  %v4112_v47 = vld [vmem:[%s7129_s1 + $0x1d8] sm:$0xff] }
  0x1f   :  { %v442_v57 = vand.u32 4294901760, %v441_v50  ;;  %v453_v62 = vsub.f32 %v4008_v14, %v7644_v58  ;;  %v448_v32 = vand.u32 4294901760, %v447_v19  ;;  %246 = vmatpush1.msra.mxu0 %v3997_v43  ;;  %v7646_v50 = vand.u32 4294901760, %v4025_v61 }
  0x20   :  { %7645 = vst [vmem:[#allocation25_spill] sm:$0xff] %v4064_v53  ;;  %437 = vmatprep.subr.mxu1 %v436_v7  ;;  %v4076_v58 = vand.u32 4294901760, %v4042_v2  ;;  %7648 = vst [vmem:[#allocation27_spill] sm:$0xff] %v4080_v20  ;;  %248 = vmatprep.subr.mxu0 %v4011_v56  ;;  %v7649_v19 = vand.u32 4294901760, %v4037_v1  ;;  %v4132_v14 = vsub.f32 %v3947_v44, %v3985_v29  ;;  %v4149_v44 = vand.u32 4294901760, %v4112_v47  ;;  %v4154_v29 = vld [vmem:[%s7129_s1 + $0x1c8] sm:$0xff] }
  0x21   :  { %v459_v30 = vsub.f32 %v4025_v61, %v7646_v50  ;;  %443 = vmatpush1.msra.mxu1 %v442_v57  ;;  %v454_v7 = vand.u32 4294901760, %v453_v62  ;;  %v4093_v61 = vand.u32 4294901760, %v4055_v13  ;;  %250 = vmatpush1.msra.mxu0 %v4033_v38  ;;  %v4104_v62 = vsub.f32 %v3917_v27, %v3955_v39 }
  0x22   :  { %7647 = vst [vmem:[#allocation26_spill] sm:$0xff] %v4076_v58  ;;  %v465_v50 = vsub.f32 %v4037_v1, %v7649_v19  ;;  %449 = vmatprep.subr.mxu1 %v448_v32  ;;  %v4107_v19 = vand.u32 4294901760, %v4069_v41  ;;  %252 = vmatprep.subr.mxu0 %v4050_v52  ;;  %v4120_v27 = vsub.f32 %v3931_v49, %v3969_v54  ;;  %v4123_v57 = vand.u32 4294901760, %v4085_v36  ;;  %v4140_v49 = vld [vmem:[%s7129_s1 + $0x1d0] sm:$0xff] }
  0x23   :  { %7650 = vst [vmem:[#allocation28_spill] sm:$0xff] %v4093_v61  ;;  %v460_v63 = vand.u32 4294901760, %v459_v30  ;;  %7651 = vst [vmem:[#allocation29_spill] sm:$0xff] %v4104_v62  ;;  %455 = vmatpush1.msra.mxu1 %v454_v7  ;;  %v7653_v30 = vand.u32 4294901760, %v4064_v53  ;;  %254 = vmatpush1.msra.mxu0 %v4076_v58  ;;  %v7656_v39 = vand.u32 4294901760, %v4080_v20 }
  0x24   :  { %7652 = vst [vmem:[#allocation30_spill] sm:$0xff] %v4107_v19  ;;  %v466_v1 = vand.u32 4294901760, %v465_v50  ;;  %7654 = vst [vmem:[#allocation31_spill] sm:$0xff] %v4120_v27  ;;  %256 = vmatprep.subr.mxu0 %v4093_v61  ;;  %v4146_v50 = vsub.f32 %v3960_v37, %v3997_v43  ;;  %v4163_v37 = vsub.f32 %v3974_v33, %v4011_v56  ;;  %v7663_v43 = vand.u32 4294901760, %v4120_v27  ;;  %v4180_v33 = vld [vmem:[%s7129_s1 + $0x1c0] sm:$0xff] }
  0x25   :  { %v471_v32 = vsub.f32 %v4064_v53, %v7653_v30  ;;  %7655 = vst [vmem:[#allocation32_spill] sm:$0xff] %v4123_v57  ;;  %461 = vmatprep.subr.mxu1 %v460_v63  ;;  %v477_v7 = vsub.f32 %v4080_v20, %v7656_v39  ;;  %7657 = vst [vmem:[#allocation33_spill] sm:$0xff] %v4132_v14  ;;  %v4135_v30 = vand.u32 4294901760, %v4098_v26  ;;  %258 = vmatpush2.msra.mxu0 %v4107_v19 }
  0x26   :  { %467 = vmatpush1.msra.mxu1 %v466_v1  ;;  %7659 = vst [vmem:[#allocation35_spill] sm:$0xff] %v4146_v50  ;;  %7660 = vst [vmem:[#allocation36_spill] sm:$0xff] %v4149_v44  ;;  %v7661_v1 = vand.u32 4294901760, %v4104_v62  ;;  %v7198_v39 = vand.u32 4294901760, %v4132_v14  ;;  %v489_v20 = vsub.f32 %v4120_v27, %v7663_v43  ;;  %260 = vmatprep.subr.mxu0 %v4123_v57  ;;  %v4171_v53 = vand.u32 4294901760, %v4140_v49 }
  0x27   :  { %7658 = vst [vmem:[#allocation34_spill] sm:$0xff] %v4135_v30  ;;  %v472_v63 = vand.u32 4294901760, %v471_v32  ;;  %v478_v54 = vand.u32 4294901760, %v477_v7  ;;  %7662 = vst [vmem:[#allocation37_spill] sm:$0xff] %v4163_v37  ;;  %262 = vmatpush2.msra.mxu0 %v4135_v30  ;;  %v4188_v56 = vand.u32 4294901760, %v4154_v29  ;;  %v4202_v7 = vsub.f32 %v4016_v12, %v4050_v52  ;;  %v4250_v52 = vld [vmem:[%s7129_s1 + $0x198] sm:$0xff] }
  0x28   :  { %v483_v32 = vsub.f32 %v4104_v62, %v7661_v1  ;;  %7664 = vst [vmem:[#allocation38_spill] sm:$0xff] %v4171_v53  ;;  %v4175_v1 = vsub.f32 %v4002_v51, %v4033_v38  ;;  %v495_v43 = vsub.f32 %v4132_v14, %v7198_v39  ;;  %v4193_v51 = vld [vmem:[%s7129_s1 + $0x1b8] sm:$0xff]  ;;  %v490_v38 = vand.u32 4294901760, %v489_v20  ;;  %264 = vmatprep.subr.mxu0 %v4149_v44  ;;  %v4207_v14 = vld [vmem:[%s7129_s1 + $0x1b0] sm:$0xff]  ;;  %v4223_v39 = vld [vmem:[%s7129_s1 + $0x1a8] sm:$0xff] }
  0x29   :  { %473 = vmatprep.subr.mxu1 %v472_v63  ;;  %7666 = vst [vmem:[#allocation40_spill] sm:$0xff] %v4188_v56  ;;  %7668 = vst [vmem:[#allocation41_spill] sm:$0xff] %v4202_v7  ;;  %v7669_v20 = vand.u32 4294901760, %v4163_v37  ;;  %266 = vmatpush2.msra.mxu0 %v4171_v53  ;;  %v4218_v12 = vsub.f32 %v4042_v2, %v4076_v58  ;;  %v4236_v2 = vld [vmem:[%s7129_s1 + $0x1a0] sm:$0xff] }
  0x2a   :  { %7665 = vst [vmem:[#allocation39_spill] sm:$0xff] %v4175_v1  ;;  %479 = vmatpush1.msra.mxu1 %v478_v54  ;;  %v484_v63 = vand.u32 4294901760, %v483_v32  ;;  %v7667_v54 = vand.u32 4294901760, %v4146_v50  ;;  %v496_v27 = vand.u32 4294901760, %v495_v43  ;;  %v7672_v43 = vand.u32 4294901760, %v4175_v1  ;;  %268 = vmatprep.subr.mxu0 %v4188_v56 }
  0x2b   :  { %v507_v62 = vsub.f32 %v4163_v37, %v7669_v20  ;;  %7671 = vst [vmem:[#allocation43_spill] sm:$0xff] %v4218_v12  ;;  %v4231_v37 = vand.u32 4294901760, %v4193_v51 }
  0x2c   :  { %v501_v32 = vsub.f32 %v4146_v50, %v7667_v54  ;;  %485 = vmatprep.subr.mxu1 %v484_v63  ;;  %v4214_v54 = vand.u32 4294901760, %v4180_v33  ;;  %v513_v20 = vsub.f32 %v4175_v1, %v7672_v43  ;;  %v4245_v43 = vand.u32 4294901760, %v4207_v14 }
  0x2d   :  { %491 = vmatpush1.msra.mxu1 %v490_v38  ;;  %7673 = vst [vmem:[#allocation44_spill] sm:$0xff] %v4231_v37  ;;  %v508_v58 = vand.u32 4294901760, %v507_v62  ;;  %v7676_v62 = vand.u32 4294901760, %v4202_v7  ;;  %v4261_v38 = vand.u32 4294901760, %v4223_v39 }
  0x2e   :  { %7670 = vst [vmem:[#allocation42_spill] sm:$0xff] %v4214_v54  ;;  %v502_v63 = vand.u32 4294901760, %v501_v32  ;;  %497 = vmatprep.subr.mxu1 %v496_v27  ;;  %270 = vmatpush2.msra.mxu0 %v4214_v54  ;;  %v4242_v32 = vsub.f32 %v4055_v13, %v4093_v61  ;;  %7675 = vst [vmem:[#allocation46_spill] sm:$0xff] %v4245_v43  ;;  %v514_v1 = vand.u32 4294901760, %v513_v20  ;;  %v7679_v61 = vand.u32 4294901760, %v4218_v12 }
  0x2f   :  { %v519_v27 = vsub.f32 %v4202_v7, %v7676_v62  ;;  %272 = vmatprep.subr.mxu0 %v4231_v37  ;;  %v4258_v13 = vsub.f32 %v4069_v41, %v4107_v19  ;;  %7678 = vst [vmem:[#allocation48_spill] sm:$0xff] %v4261_v38  ;;  %v4270_v20 = vsub.f32 %v4085_v36, %v4123_v57  ;;  %v4273_v62 = vand.u32 4294901760, %v4236_v2  ;;  %v4278_v41 = vld [vmem:[%s7129_s1 + $0x190] sm:$0xff]  ;;  %v4292_v57 = vld [vmem:[%s7129_s1 + $0x188] sm:$0xff] }
  0x30   :  { %7674 = vst [vmem:[#allocation45_spill] sm:$0xff] %v4242_v32  ;;  %503 = vmatpush1.msra.mxu1 %v502_v63  ;;  %v525_v50 = vsub.f32 %v4218_v12, %v7679_v61  ;;  %274 = vmatpush2.msra.mxu0 %v4245_v43  ;;  %v4284_v63 = vsub.f32 %v4098_v26, %v4135_v30  ;;  %v4287_v36 = vand.u32 4294901760, %v4250_v52  ;;  %v4344_v7 = vld [vmem:[%s7129_s1 + $0x170] sm:$0xff] }
  0x31   :  { %7677 = vst [vmem:[#allocation47_spill] sm:$0xff] %v4258_v13  ;;  %509 = vmatprep.subr.mxu1 %v508_v58  ;;  %7680 = vst [vmem:[#allocation49_spill] sm:$0xff] %v4270_v20  ;;  %v520_v58 = vand.u32 4294901760, %v519_v27  ;;  %276 = vmatprep.subr.mxu0 %v4261_v38  ;;  %v7233_v61 = vand.u32 4294901760, %v4270_v20  ;;  %v4301_v26 = vsub.f32 %v4112_v47, %v4149_v44  ;;  %v7686_v30 = vand.u32 4294901760, %v4258_v13  ;;  %v4318_v47 = vld [vmem:[%s7129_s1 + $0x180] sm:$0xff] }
  0x32   :  { %7681 = vst [vmem:[#allocation50_spill] sm:$0xff] %v4273_v62  ;;  %515 = vmatpush1.msra.mxu1 %v514_v1  ;;  %7682 = vst [vmem:[#allocation51_spill] sm:$0xff] %v4284_v63  ;;  %v526_v19 = vand.u32 4294901760, %v525_v50  ;;  %v7684_v1 = vand.u32 4294901760, %v4242_v32  ;;  %278 = vmatpush2.msra.mxu0 %v4273_v62  ;;  %v4309_v50 = vand.u32 4294901760, %v4278_v41  ;;  %v4325_v44 = vand.u32 4294901760, %v4292_v57 }
  0x33   :  { %7683 = vst [vmem:[#allocation52_spill] sm:$0xff] %v4287_v36  ;;  %7685 = vst [vmem:[#allocation53_spill] sm:$0xff] %v4301_v26  ;;  %521 = vmatprep.subr.mxu1 %v520_v58  ;;  %v537_v12 = vsub.f32 %v4258_v13, %v7686_v30  ;;  %280 = vmatprep.subr.mxu0 %v4287_v36  ;;  %v543_v30 = vsub.f32 %v4270_v20, %v7233_v61  ;;  %v7690_v13 = vand.u32 4294901760, %v4284_v63 }
  0x34   :  { %v531_v27 = vsub.f32 %v4242_v32, %v7684_v1  ;;  %7687 = vst [vmem:[#allocation54_spill] sm:$0xff] %v4309_v50  ;;  %v4313_v1 = vsub.f32 %v4140_v49, %v4171_v53  ;;  %527 = vmatpush1.msra.mxu1 %v526_v19  ;;  %7689 = vst [vmem:[#allocation56_spill] sm:$0xff] %v4325_v44  ;;  %v4330_v49 = vld [vmem:[%s7129_s1 + $0x178] sm:$0xff]  ;;  %282 = vmatpush2.msra.mxu0 %v4309_v50 }
  0x35   :  { %v538_v53 = vand.u32 4294901760, %v537_v12  ;;  %v549_v19 = vsub.f32 %v4284_v63, %v7690_v13  ;;  %v4339_v61 = vsub.f32 %v4154_v29, %v4188_v56  ;;  %v544_v20 = vand.u32 4294901760, %v543_v30  ;;  %284 = vmatprep.subr.mxu0 %v4325_v44  ;;  %v4386_v56 = vld [vmem:[%s7129_s1 + $0x158] sm:$0xff] }
  0x36   :  { %7688 = vst [vmem:[#allocation55_spill] sm:$0xff] %v4313_v1  ;;  %v532_v58 = vand.u32 4294901760, %v531_v27  ;;  %v7692_v12 = vand.u32 4294901760, %v4301_v26  ;;  %v4351_v13 = vand.u32 4294901760, %v4318_v47  ;;  %v4355_v29 = vsub.f32 %v4180_v33, %v4214_v54  ;;  %v4360_v27 = vld [vmem:[%s7129_s1 + $0x168] sm:$0xff]  ;;  %v4372_v33 = vld [vmem:[%s7129_s1 + $0x160] sm:$0xff] }
  0x37   :  { %7691 = vst [vmem:[#allocation57_spill] sm:$0xff] %v4339_v61  ;;  %v7695_v30 = vand.u32 4294901760, %v4313_v1 }
  0x38   :  { %533 = vmatprep.subr.mxu1 %v532_v58  ;;  %v555_v32 = vsub.f32 %v4301_v26, %v7692_v12  ;;  %7693 = vst [vmem:[#allocation58_spill] sm:$0xff] %v4351_v13  ;;  %7694 = vst [vmem:[#allocation59_spill] sm:$0xff] %v4355_v29  ;;  %v550_v58 = vand.u32 4294901760, %v549_v19  ;;  %v4367_v26 = vand.u32 4294901760, %v4330_v49  ;;  %286 = vmatpush2.msra.mxu0 %v4351_v13 }
  0x39   :  { %539 = vmatpush2.msra.mxu1 %v538_v53  ;;  %v561_v12 = vsub.f32 %v4313_v1, %v7695_v30  ;;  %v4378_v19 = vsub.f32 %v4193_v51, %v4231_v37  ;;  %v4381_v30 = vand.u32 4294901760, %v4344_v7  ;;  %v4394_v51 = vsub.f32 %v4207_v14, %v4245_v43  ;;  %v4414_v14 = vld [vmem:[%s7129_s1 + $0x150] sm:$0xff] }
  0x3a   :  { %7696 = vst [vmem:[#allocation60_spill] sm:$0xff] %v4367_v26  ;;  %545 = vmatprep.subr.mxu1 %v544_v20  ;;  %v556_v54 = vand.u32 4294901760, %v555_v32  ;;  %v7699_v32 = vand.u32 4294901760, %v4339_v61  ;;  %288 = vmatprep.subr.mxu0 %v4367_v26  ;;  %v4397_v53 = vand.u32 4294901760, %v4360_v27  ;;  %v7702_v37 = vand.u32 4294901760, %v4355_v29 }
  0x3b   :  { %7697 = vst [vmem:[#allocation61_spill] sm:$0xff] %v4378_v19  ;;  %7698 = vst [vmem:[#allocation62_spill] sm:$0xff] %v4381_v30  ;;  %551 = vmatpush2.msra.mxu1 %v550_v58  ;;  %v562_v1 = vand.u32 4294901760, %v561_v12  ;;  %290 = vmatpush2.msra.mxu0 %v4381_v30  ;;  %v4406_v12 = vsub.f32 %v4223_v39, %v4261_v38  ;;  %v4420_v58 = vsub.f32 %v4236_v2, %v4273_v62  ;;  %v4428_v38 = vld [vmem:[%s7129_s1 + $0x148] sm:$0xff] }
  0x3c   :  { %v567_v20 = vsub.f32 %v4339_v61, %v7699_v32  ;;  %7700 = vst [vmem:[#allocation63_spill] sm:$0xff] %v4394_v51  ;;  %7701 = vst [vmem:[#allocation64_spill] sm:$0xff] %v4397_v53  ;;  %557 = vmatprep.subr.mxu1 %v556_v54  ;;  %v573_v63 = vsub.f32 %v4355_v29, %v7702_v37  ;;  %v4409_v32 = vand.u32 4294901760, %v4372_v33  ;;  %292 = vmatprep.subr.mxu0 %v4397_v53  ;;  %v4480_v61 = vld [vmem:[%s7129_s1 + $0x130] sm:$0xff] }
  0x3d   :  { %7703 = vst [vmem:[#allocation65_spill] sm:$0xff] %v4406_v12  ;;  %563 = vmatpush2.msra.mxu1 %v562_v1  ;;  %7705 = vst [vmem:[#allocation67_spill] sm:$0xff] %v4420_v58  ;;  %v4423_v39 = vand.u32 4294901760, %v4386_v56  ;;  %v7707_v1 = vand.u32 4294901760, %v4378_v19  ;;  %v7266_v37 = vand.u32 4294901760, %v4406_v12  ;;  %v4437_v2 = vsub.f32 %v4250_v52, %v4287_v36  ;;  %v4454_v52 = vld [vmem:[%s7129_s1 + $0x140] sm:$0xff] }
  0x3e   :  { %7704 = vst [vmem:[#allocation66_spill] sm:$0xff] %v4409_v32  ;;  %v568_v54 = vand.u32 4294901760, %v567_v20  ;;  %v574_v43 = vand.u32 4294901760, %v573_v63  ;;  %294 = vmatpush2.msra.mxu0 %v4409_v32  ;;  %v7709_v62 = vand.u32 4294901760, %v4394_v51  ;;  %v4445_v63 = vand.u32 4294901760, %v4414_v14 }
  0x3f   :  { %7706 = vst [vmem:[#allocation68_spill] sm:$0xff] %v4423_v39  ;;  %v579_v20 = vsub.f32 %v4378_v19, %v7707_v1  ;;  %7708 = vst [vmem:[#allocation69_spill] sm:$0xff] %v4437_v2  ;;  %296 = vmatprep.subr.mxu0 %v4423_v39  ;;  %v4449_v1 = vsub.f32 %v4278_v41, %v4309_v50  ;;  %v4461_v36 = vand.u32 4294901760, %v4428_v38  ;;  %v4466_v41 = vld [vmem:[%s7129_s1 + $0x138] sm:$0xff] }
  0x40   :  { %569 = vmatprep.subr.mxu1 %v568_v54  ;;  %v585_v29 = vsub.f32 %v4394_v51, %v7709_v62  ;;  %7710 = vst [vmem:[#allocation70_spill] sm:$0xff] %v4445_v63  ;;  %v591_v62 = vsub.f32 %v4406_v12, %v7266_v37  ;;  %v7713_v51 = vand.u32 4294901760, %v4420_v58  ;;  %298 = vmatpush2.msra.mxu0 %v4445_v63 }
  0x41   :  { %7711 = vst [vmem:[#allocation71_spill] sm:$0xff] %v4449_v1  ;;  %575 = vmatpush2.msra.mxu1 %v574_v43  ;;  %v580_v54 = vand.u32 4294901760, %v579_v20  ;;  %7712 = vst [vmem:[#allocation72_spill] sm:$0xff] %v4461_v36  ;;  %v4475_v37 = vsub.f32 %v4292_v57, %v4325_v44  ;;  %300 = vmatprep.subr.mxu0 %v4461_v36  ;;  %v4491_v57 = vsub.f32 %v4318_v47, %v4351_v13  ;;  %v4496_v20 = vld [vmem:[%s7129_s1 + $0x128] sm:$0xff]  ;;  %v4508_v47 = vld [vmem:[%s7129_s1 + $0x120] sm:$0xff] }
  0x42   :  { %v586_v50 = vand.u32 4294901760, %v585_v29  ;;  %v597_v43 = vsub.f32 %v4420_v58, %v7713_v51  ;;  %v592_v12 = vand.u32 4294901760, %v591_v62  ;;  %v7715_v29 = vand.u32 4294901760, %v4437_v2  ;;  %v4522_v44 = vld [vmem:[%s7129_s1 + $0x118] sm:$0xff] }
  0x43   :  { %7714 = vst [vmem:[#allocation73_spill] sm:$0xff] %v4475_v37  ;;  %581 = vmatprep.subr.mxu1 %v580_v54  ;;  %v4487_v51 = vand.u32 4294901760, %v4454_v52  ;;  %7717 = vst [vmem:[#allocation75_spill] sm:$0xff] %v4491_v57  ;;  %v7718_v62 = vand.u32 4294901760, %v4449_v1 }
  0x44   :  { %v603_v19 = vsub.f32 %v4437_v2, %v7715_v29  ;;  %587 = vmatpush2.msra.mxu1 %v586_v50  ;;  %v598_v54 = vand.u32 4294901760, %v597_v43  ;;  %v4503_v2 = vand.u32 4294901760, %v4466_v41  ;;  %v4514_v43 = vsub.f32 %v4330_v49, %v4367_v26 }
  0x45   :  { %7716 = vst [vmem:[#allocation74_spill] sm:$0xff] %v4487_v51  ;;  %v609_v29 = vsub.f32 %v4449_v1, %v7718_v62  ;;  %593 = vmatprep.subr.mxu1 %v592_v12  ;;  %302 = vmatpush2.msra.mxu0 %v4487_v51  ;;  %v4517_v62 = vand.u32 4294901760, %v4480_v61  ;;  %v4530_v49 = vsub.f32 %v4344_v7, %v4381_v30  ;;  %v4533_v50 = vand.u32 4294901760, %v4496_v20  ;;  %v4550_v7 = vld [vmem:[%s7129_s1 + $0x110] sm:$0xff] }
  0x46   :  { %v604_v13 = vand.u32 4294901760, %v603_v19  ;;  %7719 = vst [vmem:[#allocation76_spill] sm:$0xff] %v4514_v43  ;;  %599 = vmatpush2.msra.mxu1 %v598_v54  ;;  %v7720_v19 = vand.u32 4294901760, %v4475_v37  ;;  %304 = vmatprep.subr.mxu0 %v4503_v2  ;;  %v7723_v26 = vand.u32 4294901760, %v4491_v57  ;;  %v4556_v54 = vsub.f32 %v4372_v33, %v4409_v32 }
  0x47   :  { %v610_v1 = vand.u32 4294901760, %v609_v29  ;;  %7721 = vst [vmem:[#allocation77_spill] sm:$0xff] %v4530_v49  ;;  %7722 = vst [vmem:[#allocation78_spill] sm:$0xff] %v4533_v50  ;;  %306 = vmatpush2.msra.mxu0 %v4517_v62  ;;  %v4542_v29 = vsub.f32 %v4360_v27, %v4397_v53  ;;  %v4559_v27 = vand.u32 4294901760, %v4522_v44  ;;  %v4564_v53 = vld [vmem:[%s7129_s1 + $0x108] sm:$0xff]  ;;  %v4573_v33 = vsub.f32 %v4386_v56, %v4423_v39  ;;  %v4590_v56 = vld [vmem:[%s7129_s1 + $0x100] sm:$0xff] }
  0x48   :  { %v615_v12 = vsub.f32 %v4475_v37, %v7720_v19  ;;  %605 = vmatprep.subr.mxu1 %v604_v13  ;;  %v621_v58 = vsub.f32 %v4491_v57, %v7723_v26  ;;  %v4545_v19 = vand.u32 4294901760, %v4508_v47  ;;  %308 = vmatprep.subr.mxu0 %v4533_v50  ;;  %7726 = vst [vmem:[#allocation81_spill] sm:$0xff] %v4556_v54  ;;  %v7730_v32 = vand.u32 4294901760, %v4530_v49 }
  0x49   :  { %7724 = vst [vmem:[#allocation79_spill] sm:$0xff] %v4542_v29  ;;  %611 = vmatpush2.msra.mxu1 %v610_v1  ;;  %7727 = vst [vmem:[#allocation82_spill] sm:$0xff] %v4559_v27  ;;  %v7728_v1 = vand.u32 4294901760, %v4514_v43  ;;  %v7301_v26 = vand.u32 4294901760, %v4542_v29  ;;  %v4597_v39 = vand.u32 4294901760, %v4564_v53 }
  0x4a   :  { %7725 = vst [vmem:[#allocation80_spill] sm:$0xff] %v4545_v19  ;;  %v616_v13 = vand.u32 4294901760, %v615_v12  ;;  %v622_v30 = vand.u32 4294901760, %v621_v58  ;;  %310 = vmatpush2.msra.mxu0 %v4545_v19  ;;  %7729 = vst [vmem:[#allocation83_spill] sm:$0xff] %v4573_v33  ;;  %v633_v57 = vsub.f32 %v4530_v49, %v7730_v32  ;;  %v4581_v58 = vand.u32 4294901760, %v4550_v7 }
  0x4b   :  { %v627_v12 = vsub.f32 %v4514_v43, %v7728_v1  ;;  %312 = vmatprep.subr.mxu0 %v4559_v27  ;;  %v4585_v1 = vsub.f32 %v4414_v14, %v4445_v63  ;;  %v639_v32 = vsub.f32 %v4542_v29, %v7301_v26  ;;  %v15_v14 = vld [vmem:[%s7130_s0 + $0x8] sm:$0xff]  ;;  %v7732_v49 = vand.u32 4294901760, %v4556_v54  ;;  %v14_v26 = vld [vmem:[%s7130_s0] sm:$0xff] }
  0x4c   :  { %617 = vmatprep.subr.mxu1 %v616_v13  ;;  %v634_v63 = vand.u32 4294901760, %v633_v57  ;;  %314 = vmatpush2.msra.mxu0 %v4581_v58  ;;  %v7734_v57 = vand.u32 4294901760, %v4573_v33 }
  0x4d   :  { %7731 = vst [vmem:[#allocation84_spill] sm:$0xff] %v4585_v1  ;;  %623 = vmatpush2.msra.mxu1 %v622_v30  ;;  %v628_v13 = vand.u32 4294901760, %v627_v12  ;;  %v645_v43 = vsub.f32 %v4556_v54, %v7732_v49  ;;  %v4609_v12 = vsub.f32 %v4428_v38, %v4461_v36  ;;  %v640_v37 = vand.u32 4294901760, %v639_v32  ;;  %316 = vmatprep.subr.mxu0 %v4597_v39 }
  0x4e   :  { %v651_v29 = vsub.f32 %v4573_v33, %v7734_v57  ;;  %v4619_v49 = vand.u32 4294901760, %v4590_v56  ;;  %v4623_v30 = vsub.f32 %v4454_v52, %v4487_v51  ;;  %v7736_v36 = vand.u32 4294901760, %v4585_v1 }
  0x4f   :  { %7733 = vst [vmem:[#allocation85_spill] sm:$0xff] %v4609_v12  ;;  %629 = vmatprep.subr.mxu1 %v628_v13  ;;  %v646_v38 = vand.u32 4294901760, %v645_v43  ;;  %v7313_v32 = vand.u32 4294901760, %v4609_v12  ;;  %v4629_v54 = vand.u32 4294901760, %v15_v14  ;;  %v4635_v52 = vsub.f32 %v4466_v41, %v4503_v2 }
  0x50   :  { %7735 = vst [vmem:[#allocation86_spill] sm:$0xff] %v4623_v30  ;;  %635 = vmatpush2.msra.mxu1 %v634_v63  ;;  %v657_v13 = vsub.f32 %v4585_v1, %v7736_v36  ;;  %v652_v57 = vand.u32 4294901760, %v651_v29  ;;  %318 = vmatpush2.msra.mxu0 %v4619_v49  ;;  %v7312_v33 = vand.u32 4294901760, %v4623_v30  ;;  %v4637_v63 = vand.u32 4294901760, %v14_v26 }
  0x51   :  { %7737 = vst [vmem:[#allocation87_spill] sm:$0xff] %v4629_v54  ;;  %641 = vmatprep.subr.mxu1 %v640_v37  ;;  %7738 = vst [vmem:[#allocation88_spill] sm:$0xff] %v4635_v52  ;;  %v663_v36 = vsub.f32 %v4609_v12, %v7313_v32  ;;  %v4643_v51 = vsub.f32 %v15_v14, %v4629_v54  ;;  %731 = vmatprep.subr.mxu0 %v3690_v18  ;;  %v7316_v29 = vand.u32 4294901760, %v4635_v52 }
  0x52   :  { %7739 = vst [vmem:[#allocation89_spill] sm:$0xff] %v4637_v63  ;;  %647 = vmatpush2.msra.mxu1 %v646_v38  ;;  %v658_v43 = vand.u32 4294901760, %v657_v13  ;;  %v4648_v37 = vsub.f32 %v4480_v61, %v4517_v62  ;;  %v669_v41 = vsub.f32 %v4623_v30, %v7312_v33  ;;  %v4655_v38 = vsub.f32 %v14_v26, %v4637_v63 }
  0x53   :  { %653 = vmatprep.subr.mxu1 %v652_v57  ;;  %v4659_v14 = vsub.f32 %v4496_v20, %v4533_v50  ;;  %721 = vmatprep.mubr.f32.mxu1 %v4629_v54  ;;  %v664_v13 = vand.u32 4294901760, %v663_v36  ;;  %v7317_v61 = vand.u32 4294901760, %v4643_v51  ;;  %v4666_v33 = vsub.f32 %v4508_v47, %v4545_v19 }
  0x54   :  { %7740 = vst [vmem:[#allocation90_spill] sm:$0xff] %v4648_v37  ;;  %659 = vmatpush2.msra.mxu1 %v658_v43  ;;  %v7320_v57 = vand.u32 4294901760, %v4648_v37  ;;  %v670_v32 = vand.u32 4294901760, %v669_v41  ;;  %v675_v26 = vsub.f32 %v4635_v52, %v7316_v29  ;;  %v7325_v20 = vand.u32 4294901760, %v4655_v38 }
  0x55   :  { %7741 = vst [vmem:[#allocation91_spill] sm:$0xff] %v4659_v14  ;;  %v7326_v50 = vand.u32 4294901760, %v4659_v14  ;;  %665 = vmatprep.subr.mxu1 %v664_v13  ;;  %v322_v43 = vsub.f32 %v4643_v51, %v7317_v61  ;;  %v4682_v41 = vsub.f32 %v4522_v44, %v4559_v27  ;;  %v4692_v54 = vsub.f32 %v4550_v7, %v4581_v58 }
  0x56   :  { %v681_v36 = vsub.f32 %v4648_v37, %v7320_v57  ;;  %671 = vmatpush2.msra.mxu1 %v670_v32  ;;  %v676_v29 = vand.u32 4294901760, %v675_v26  ;;  %v328_v13 = vsub.f32 %v4655_v38, %v7325_v20  ;;  %v7744_v19 = vand.u32 4294901760, %v4666_v33 }
  0x57   :  { %7742 = vst [vmem:[#allocation92_spill] sm:$0xff] %v4682_v41  ;;  %v687_v61 = vsub.f32 %v4659_v14, %v7326_v50  ;;  %7743 = vst [vmem:[#allocation93_spill] sm:$0xff] %v4692_v54  ;;  %v323_v57 = vand.u32 4294901760, %v322_v43  ;;  %v7330_v32 = vand.u32 4294901760, %v4682_v41  ;;  %v7329_v20 = vand.u32 4294901760, %v4692_v54 }
  0x58   :  { %v682_v47 = vand.u32 4294901760, %v681_v36  ;;  %v693_v44 = vsub.f32 %v4666_v33, %v7744_v19  ;;  %677 = vmatprep.subr.mxu1 %v676_v29  ;;  %v329_v26 = vand.u32 4294901760, %v328_v13  ;;  %v4701_v50 = vsub.f32 %v4564_v53, %v4597_v39 }
  0x59   :  { %v688_v27 = vand.u32 4294901760, %v687_v61  ;;  %324 = vmatprep.mubr.f32.mxu0 %v323_v57  ;;  %v699_v43 = vsub.f32 %v4682_v41, %v7330_v32  ;;  %v4708_v19 = vsub.f32 %v4590_v56, %v4619_v49  ;;  %v705_v29 = vsub.f32 %v4692_v54, %v7329_v20  ;;  %v7760_v20 = vld [vmem:[#allocation8_spill] sm:$0xff]  ;;  %v7761_v32 = vld [vmem:[#allocation33_spill] sm:$0xff] }
  0x5a   :  { %7745 = vst [vmem:[#allocation94_spill] sm:$0xff] %v4701_v50  ;;  %683 = vmatpush2.msra.mxu1 %v682_v47  ;;  %v694_v7 = vand.u32 4294901760, %v693_v44  ;;  %330 = vmatmul.mubr.f32.vlgmr.msra.gmra.mxu0 %v329_v26  ;;  %v7328_v53 = vand.u32 4294901760, %v4701_v50  ;;  %v7747_v44 = vld [vmem:[#allocation19_spill] sm:$0xff]  ;;  %v7748_v26 = vld [vmem:[#allocation2_spill] sm:$0xff] }
  0x5b   :  { %7746 = vst [vmem:[#allocation95_spill] sm:$0xff] %v4708_v19  ;;  %689 = vmatprep.subr.mxu1 %v688_v27  ;;  %734 = vmatpush1.msra.mxu0 %v3712_v23  ;;  %v700_v61 = vand.u32 4294901760, %v699_v43  ;;  %v7327_v57 = vand.u32 4294901760, %v4708_v19  ;;  %v706_v36 = vand.u32 4294901760, %v705_v29  ;;  %v7750_v43 = vld [vmem:[#allocation3_spill] sm:$0xff] }
  0x5c   :  { %695 = vmatpush2.msra.mxu1 %v694_v7  ;;  %737 = vmatprep.subr.mxu0 %v3718_v25  ;;  %v711_v56 = vsub.f32 %v4701_v50, %v7328_v53  ;;  %v7749_v7 = vld [vmem:[#allocation21_spill] sm:$0xff]  ;;  %v7751_v29 = vld [vmem:[#allocation23_spill] sm:$0xff] }
  0x5d   :  { %923 = vmatprep.mubr.f32.mxu0 %v4643_v51  ;;  %740 = vmatpush1.msra.mxu0 %v3741_v31  ;;  %v717_v27 = vsub.f32 %v4708_v19, %v7327_v57  ;;  %v7758_v57 = vld [vmem:[#allocation7_spill] sm:$0xff] }
  0x5e   :  { %701 = vmatprep.subr.mxu1 %v700_v61  ;;  %743 = vmatprep.subr.mxu0 %v3750_v35  ;;  %v712_v47 = vand.u32 4294901760, %v711_v56  ;;  %v7752_v61 = vld [vmem:[#allocation4_spill] sm:$0xff]  ;;  %v7754_v56 = vld [vmem:[#allocation5_spill] sm:$0xff]  ;;  %v7759_v53 = vld [vmem:[#allocation31_spill] sm:$0xff] }
  0x5f   :  { %707 = vmatpush2.msra.mxu1 %v706_v36  ;;  %746 = vmatpush1.msra.mxu0 %v3766_v40  ;;  %v718_v13 = vand.u32 4294901760, %v717_v27  ;;  %v7753_v36 = vld [vmem:[#allocation25_spill] sm:$0xff]  ;;  %v7755_v27 = vld [vmem:[#allocation27_spill] sm:$0xff] }
  0x60   :  { %713 = vmatprep.subr.mxu1 %v712_v47  ;;  %749 = vmatprep.subr.mxu0 %v3780_v45  ;;  %v7756_v47 = vld [vmem:[#allocation6_spill] sm:$0xff] }
  0x61   :  { %719 = vmatpush2.msra.mxu1 %v718_v13  ;;  %752 = vmatpush1.msra.mxu0 %v3815_v59  ;;  %v7757_v13 = vld [vmem:[#allocation29_spill] sm:$0xff] }
  0x62   :  { %723 = vmatmul.mubr.f32.vlgmr.msra.gmra.mxu1 %v4637_v63  ;;  %755 = vmatprep.subr.mxu0 %v3830_v0  ;;  %v7762_v63 = vld [vmem:[#allocation9_spill] sm:$0xff] }
  0x63   :  { %933 = vmatprep.subr.mxu1 %v3652_v3  ;;  %758 = vmatpush1.msra.mxu0 %v3844_v8 }
  0x64   :  { %935 = vmatpush1.msra.mxu1 %v3654_v4  ;;  %761 = vmatprep.subr.mxu0 %v3858_v42 }
  0x65   :  { %937 = vmatprep.subr.mxu1 %v3656_v5  ;;  %764 = vmatpush1.msra.mxu0 %v3870_v48 }
  0x66   :  { %939 = vmatpush1.msra.mxu1 %v3667_v9  ;;  %767 = vmatprep.subr.mxu0 %v3887_v21 }
  0x67   :  { %941 = vmatprep.subr.mxu1 %v3669_v10  ;;  %770 = vmatpush1.msra.mxu0 %v3899_v6 }
  0x68   :  { %943 = vmatpush1.msra.mxu1 %v3671_v11  ;;  %773 = vmatprep.subr.mxu0 %v3926_v55 }
  0x69   :  { %945 = vmatprep.subr.mxu1 %v3683_v15  ;;  %776 = vmatpush1.msra.mxu0 %v3942_v28 }
  0x6a   :  { %947 = vmatpush1.msra.mxu1 %v3685_v16  ;;  %779 = vmatprep.subr.mxu0 %v3966_v34 }
  0x6b   :  { %949 = vmatprep.subr.mxu1 %v3687_v17  ;;  %782 = vmatpush1.msra.mxu0 %v3982_v46 }
  0x6c   :  { %951 = vmatpush1.msra.mxu1 %v3709_v22  ;;  %785 = vmatprep.subr.mxu0 %v3994_v60 }
  0x6d   :  { %953 = vmatprep.subr.mxu1 %v3715_v24  ;;  %788 = vmatpush1.msra.mxu0 %v7747_v44 }
  0x6e   :  { %955 = vmatpush1.msra.mxu1 %v7748_v26  ;;  %791 = vmatprep.subr.mxu0 %v7749_v7 }
  0x6f   :  { %957 = vmatprep.subr.mxu1 %v7750_v43  ;;  %794 = vmatpush1.msra.mxu0 %v7751_v29 }
  0x70   :  { %959 = vmatpush1.msra.mxu1 %v7752_v61  ;;  %797 = vmatprep.subr.mxu0 %v7753_v36  ;;  %v7763_v61 = vld [vmem:[#allocation35_spill] sm:$0xff]  ;;  %v7764_v36 = vld [vmem:[#allocation10_spill] sm:$0xff] }
  0x71   :  { %961 = vmatprep.subr.mxu1 %v7754_v56  ;;  %800 = vmatpush1.msra.mxu0 %v7755_v27  ;;  %v7765_v56 = vld [vmem:[#allocation37_spill] sm:$0xff]  ;;  %v7766_v27 = vld [vmem:[#allocation11_spill] sm:$0xff] }
  0x72   :  { %963 = vmatpush1.msra.mxu1 %v7756_v47  ;;  %803 = vmatprep.subr.mxu0 %v7757_v13  ;;  %v7767_v47 = vld [vmem:[#allocation39_spill] sm:$0xff]  ;;  %v7768_v13 = vld [vmem:[#allocation12_spill] sm:$0xff] }
  0x73   :  { %965 = vmatprep.subr.mxu1 %v7758_v57  ;;  %806 = vmatpush1.msra.mxu0 %v7759_v53  ;;  %v7769_v57 = vld [vmem:[#allocation41_spill] sm:$0xff] }
  0x74   :  { %967 = vmatpush1.msra.mxu1 %v7760_v20  ;;  %809 = vmatprep.subr.mxu0 %v7761_v32  ;;  %v7770_v53 = vld [vmem:[#allocation13_spill] sm:$0xff]  ;;  %v7771_v20 = vld [vmem:[#allocation43_spill] sm:$0xff]  ;;  %v7772_v32 = vld [vmem:[#allocation14_spill] sm:$0xff] }
  0x75   :  { %969 = vmatprep.subr.mxu1 %v7762_v63  ;;  %812 = vmatpush1.msra.mxu0 %v7763_v61  ;;  %v7773_v63 = vld [vmem:[#allocation45_spill] sm:$0xff]  ;;  %v7774_v61 = vld [vmem:[#allocation15_spill] sm:$0xff] }
  0x76   :  { %971 = vmatpush1.msra.mxu1 %v7764_v36  ;;  %815 = vmatprep.subr.mxu0 %v7765_v56  ;;  %v7775_v36 = vld [vmem:[#allocation47_spill] sm:$0xff]  ;;  %v7776_v56 = vld [vmem:[#allocation16_spill] sm:$0xff] }
  0x77   :  { %973 = vmatprep.subr.mxu1 %v7766_v27  ;;  %818 = vmatpush1.msra.mxu0 %v7767_v47  ;;  %v7777_v27 = vld [vmem:[#allocation49_spill] sm:$0xff] }
  0x78   :  { %975 = vmatpush1.msra.mxu1 %v7768_v13  ;;  %821 = vmatprep.subr.mxu0 %v7769_v57  ;;  %v7778_v47 = vld [vmem:[#allocation17_spill] sm:$0xff]  ;;  %v7779_v13 = vld [vmem:[#allocation51_spill] sm:$0xff]  ;;  %v7780_v57 = vld [vmem:[#allocation18_spill] sm:$0xff] }
  0x79   :  { %977 = vmatprep.subr.mxu1 %v7770_v53  ;;  %824 = vmatpush1.msra.mxu0 %v7771_v20  ;;  %v7781_v53 = vld [vmem:[#allocation53_spill] sm:$0xff]  ;;  %v7782_v20 = vld [vmem:[#allocation20_spill] sm:$0xff] }
  0x7a   :  { %979 = vmatpush1.msra.mxu1 %v7772_v32  ;;  %827 = vmatprep.subr.mxu0 %v7773_v63  ;;  %v7783_v32 = vld [vmem:[#allocation55_spill] sm:$0xff]  ;;  %v7784_v63 = vld [vmem:[#allocation22_spill] sm:$0xff] }
  0x7b   :  { %981 = vmatprep.subr.mxu1 %v7774_v61  ;;  %830 = vmatpush2.msra.mxu0 %v7775_v36  ;;  %v7785_v61 = vld [vmem:[#allocation57_spill] sm:$0xff]  ;;  %v7786_v36 = vld [vmem:[#allocation24_spill] sm:$0xff] }
  0x7c   :  { %983 = vmatpush1.msra.mxu1 %v7776_v56  ;;  %833 = vmatprep.subr.mxu0 %v7777_v27  ;;  %v7787_v56 = vld [vmem:[#allocation59_spill] sm:$0xff]  ;;  %v7788_v27 = vld [vmem:[#allocation26_spill] sm:$0xff] }
  0x7d   :  { %985 = vmatprep.subr.mxu1 %v7778_v47  ;;  %836 = vmatpush2.msra.mxu0 %v7779_v13  ;;  %v7789_v47 = vld [vmem:[#allocation61_spill] sm:$0xff]  ;;  %v7790_v13 = vld [vmem:[#allocation28_spill] sm:$0xff] }
  0x7e   :  { %987 = vmatpush1.msra.mxu1 %v7780_v57  ;;  %839 = vmatprep.subr.mxu0 %v7781_v53  ;;  %v7791_v57 = vld [vmem:[#allocation63_spill] sm:$0xff]  ;;  %v7792_v53 = vld [vmem:[#allocation30_spill] sm:$0xff] }
  0x7f   :  { %989 = vmatprep.subr.mxu1 %v7782_v20  ;;  %842 = vmatpush2.msra.mxu0 %v7783_v32  ;;  %v7793_v20 = vld [vmem:[#allocation65_spill] sm:$0xff]  ;;  %v7794_v32 = vld [vmem:[#allocation32_spill] sm:$0xff] }
  0x80   :  { %991 = vmatpush1.msra.mxu1 %v7784_v63  ;;  %845 = vmatprep.subr.mxu0 %v7785_v61  ;;  %v7795_v63 = vld [vmem:[#allocation67_spill] sm:$0xff]  ;;  %v7796_v61 = vld [vmem:[#allocation34_spill] sm:$0xff] }
  0x81   :  { %993 = vmatprep.subr.mxu1 %v7786_v36  ;;  %848 = vmatpush2.msra.mxu0 %v7787_v56  ;;  %v7797_v36 = vld [vmem:[#allocation69_spill] sm:$0xff]  ;;  %v7798_v56 = vld [vmem:[#allocation36_spill] sm:$0xff] }
  0x82   :  { %995 = vmatpush1.msra.mxu1 %v7788_v27  ;;  %851 = vmatprep.subr.mxu0 %v7789_v47  ;;  %v7799_v27 = vld [vmem:[#allocation71_spill] sm:$0xff]  ;;  %v7800_v47 = vld [vmem:[#allocation38_spill] sm:$0xff] }
  0x83   :  { %997 = vmatprep.subr.mxu1 %v7790_v13  ;;  %854 = vmatpush2.msra.mxu0 %v7791_v57  ;;  %v7801_v13 = vld [vmem:[#allocation73_spill] sm:$0xff]  ;;  %v7802_v57 = vld [vmem:[#allocation40_spill] sm:$0xff] }
  0x84   :  { %999 = vmatpush2.msra.mxu1 %v7792_v53  ;;  %857 = vmatprep.subr.mxu0 %v7793_v20  ;;  %v7803_v53 = vld [vmem:[#allocation75_spill] sm:$0xff]  ;;  %v7804_v20 = vld [vmem:[#allocation42_spill] sm:$0xff] }
  0x85   :  { %1001 = vmatprep.subr.mxu1 %v7794_v32  ;;  %860 = vmatpush2.msra.mxu0 %v7795_v63  ;;  %v7805_v32 = vld [vmem:[#allocation76_spill] sm:$0xff] }
  0x86   :  { %1003 = vmatpush2.msra.mxu1 %v7796_v61  ;;  %863 = vmatprep.subr.mxu0 %v7797_v36  ;;  %v7806_v63 = vld [vmem:[#allocation44_spill] sm:$0xff]  ;;  %v7807_v61 = vld [vmem:[#allocation77_spill] sm:$0xff]  ;;  %v7808_v36 = vld [vmem:[#allocation46_spill] sm:$0xff] }
  0x87   :  { %1005 = vmatprep.subr.mxu1 %v7798_v56  ;;  %866 = vmatpush2.msra.mxu0 %v7799_v27  ;;  %v7809_v56 = vld [vmem:[#allocation79_spill] sm:$0xff]  ;;  %v7810_v27 = vld [vmem:[#allocation48_spill] sm:$0xff] }
  0x88   :  { %1007 = vmatpush2.msra.mxu1 %v7800_v47  ;;  %869 = vmatprep.subr.mxu0 %v7801_v13  ;;  %v7811_v47 = vld [vmem:[#allocation81_spill] sm:$0xff]  ;;  %v7812_v13 = vld [vmem:[#allocation50_spill] sm:$0xff] }
  0x89   :  { %1009 = vmatprep.subr.mxu1 %v7802_v57  ;;  %872 = vmatpush2.msra.mxu0 %v7803_v53  ;;  %v7813_v57 = vld [vmem:[#allocation83_spill] sm:$0xff]  ;;  %v7814_v53 = vld [vmem:[#allocation52_spill] sm:$0xff] }
  0x8a   :  { %1011 = vmatpush2.msra.mxu1 %v7804_v20  ;;  %875 = vmatprep.subr.mxu0 %v7805_v32  ;;  %v7815_v32 = vld [vmem:[#allocation54_spill] sm:$0xff] }
  0x8b   :  { %1013 = vmatprep.subr.mxu1 %v7806_v63  ;;  %878 = vmatpush2.msra.mxu0 %v7807_v61  ;;  %v7816_v61 = vld [vmem:[#allocation56_spill] sm:$0xff] }
  0x8c   :  { %1015 = vmatpush2.msra.mxu1 %v7808_v36  ;;  %881 = vmatprep.subr.mxu0 %v7809_v56  ;;  %v7817_v56 = vld [vmem:[#allocation58_spill] sm:$0xff] }
  0x8d   :  { %1017 = vmatprep.subr.mxu1 %v7810_v27  ;;  %884 = vmatpush2.msra.mxu0 %v7811_v47  ;;  %v7818_v47 = vld [vmem:[#allocation60_spill] sm:$0xff] }
  0x8e   :  { %1019 = vmatpush2.msra.mxu1 %v7812_v13  ;;  %887 = vmatprep.subr.mxu0 %v7813_v57  ;;  %v7819_v57 = vld [vmem:[#allocation62_spill] sm:$0xff] }
  0x8f   :  { %1021 = vmatprep.subr.mxu1 %v7814_v53  ;;  %890 = vmatpush2.msra.mxu0 %v4585_v1  ;;  %v7820_v1 = vld [vmem:[#allocation64_spill] sm:$0xff] }
  0x90   :  { %1023 = vmatpush2.msra.mxu1 %v7815_v32  ;;  %893 = vmatprep.subr.mxu0 %v4609_v12  ;;  %v7821_v12 = vld [vmem:[#allocation66_spill] sm:$0xff] }
  0x91   :  { %1025 = vmatprep.subr.mxu1 %v7816_v61  ;;  %896 = vmatpush2.msra.mxu0 %v4623_v30  ;;  %v7822_v30 = vld [vmem:[#allocation68_spill] sm:$0xff] }
  0x92   :  { %1027 = vmatpush2.msra.mxu1 %v7817_v56  ;;  %899 = vmatprep.subr.mxu0 %v4635_v52  ;;  %v7823_v52 = vld [vmem:[#allocation70_spill] sm:$0xff] }
  0x93   :  { %1029 = vmatprep.subr.mxu1 %v7818_v47  ;;  %902 = vmatpush2.msra.mxu0 %v4648_v37  ;;  %v7824_v37 = vld [vmem:[#allocation72_spill] sm:$0xff] }
  0x94   :  { %1031 = vmatpush2.msra.mxu1 %v7819_v57  ;;  %905 = vmatprep.subr.mxu0 %v4659_v14  ;;  %v7825_v14 = vld [vmem:[#allocation74_spill] sm:$0xff] }
  0x95   :  { %1033 = vmatprep.subr.mxu1 %v7820_v1  ;;  %908 = vmatpush2.msra.mxu0 %v4666_v33 }
  0x96   :  { %1035 = vmatpush2.msra.mxu1 %v7821_v12  ;;  %911 = vmatprep.subr.mxu0 %v4682_v41  ;;  %v7826_v41 = vand.u32 4294901760, %v3690_v18  ;;  %v7833_v18 = vand.u32 4294901760, %v3750_v35  ;;  %v7838_v35 = vand.u32 4294901760, %v4655_v38 }
  0x97   :  { %1037 = vmatprep.subr.mxu1 %v7822_v30  ;;  %914 = vmatpush2.msra.mxu0 %v4692_v54  ;;  %v7827_v54 = vand.u32 4294901760, %v3712_v23  ;;  %v7834_v23 = vand.u32 4294901760, %v3766_v40  ;;  %v7840_v40 = vand.u32 4294901760, %v3844_v8 }
  0x98   :  { %1039 = vmatpush2.msra.mxu1 %v7823_v52  ;;  %917 = vmatprep.subr.mxu0 %v4701_v50  ;;  %v7828_v52 = vld [vmem:[#allocation78_spill] sm:$0xff] }
  0x99   :  { %1041 = vmatprep.subr.mxu1 %v7824_v37  ;;  %920 = vmatpush2.msra.mxu0 %v4708_v19  ;;  %v7829_v37 = vand.u32 4294901760, %v3718_v25  ;;  %v7830_v19 = vld [vmem:[#allocation80_spill] sm:$0xff]  ;;  %v7832_v50 = vld [vmem:[#allocation82_spill] sm:$0xff]  ;;  %v7835_v25 = vand.u32 4294901760, %v3780_v45  ;;  %v7841_v45 = vand.u32 4294901760, %v3858_v42 }
  0x9a   :  { %1043 = vmatpush2.msra.mxu1 %v7825_v14  ;;  %926 = vmatmul.mubr.f32.vlgmr.msra.gmra.mxu0 %v4655_v38  ;;  %v7831_v14 = vand.u32 4294901760, %v3741_v31  ;;  %v7836_v31 = vand.u32 4294901760, %v4643_v51  ;;  %v7859_v42 = vld [vmem:[#allocation6_spill] sm:$0xff]  ;;  %v7865_v51 = vld [vmem:[#allocation8_spill] sm:$0xff]  ;;  %v7866_v38 = vld [vmem:[#allocation33_spill] sm:$0xff] }
  0x9b   :  { %1045 = vmatprep.subr.mxu1 %v4503_v2  ;;  %1076 = vmatprep.subr.mxu0 %v7826_v41  ;;  %v7868_v41 = vld [vmem:[#allocation9_spill] sm:$0xff] }
  0x9c   :  { %1047 = vmatpush2.msra.mxu1 %v4517_v62  ;;  %1080 = vmatpush1.msra.mxu0 %v7827_v54  ;;  %v7837_v54 = vand.u32 4294901760, %v3815_v59  ;;  %v7842_v59 = vand.u32 4294901760, %v3870_v48  ;;  %v7860_v48 = vld [vmem:[#allocation29_spill] sm:$0xff] }
  0x9d   :  { %1049 = vmatprep.subr.mxu1 %v7828_v52  ;;  %1084 = vmatprep.subr.mxu0 %v7829_v37  ;;  %v7839_v37 = vand.u32 4294901760, %v3830_v0  ;;  %v7843_v0 = vand.u32 4294901760, %v3887_v21  ;;  %v7861_v21 = vand.u32 4294901760, %v7860_v48 }
  0x9e   :  { %1051 = vmatpush2.msra.mxu1 %v7830_v19  ;;  %1088 = vmatpush1.msra.mxu0 %v7831_v14  ;;  %v7867_v14 = vand.u32 4294901760, %v7866_v38  ;;  %v7905_v38 = vld [vmem:[#allocation59_spill] sm:$0xff] }
  0x9f   :  { %1053 = vmatprep.subr.mxu1 %v7832_v50  ;;  %1092 = vmatprep.subr.mxu0 %v7833_v18  ;;  %v7874_v18 = vld [vmem:[#allocation11_spill] sm:$0xff] }
  0xa0   :  { %1055 = vmatpush2.msra.mxu1 %v4581_v58  ;;  %1096 = vmatpush1.msra.mxu0 %v7834_v23  ;;  %v7875_v23 = vld [vmem:[#allocation39_spill] sm:$0xff] }
  0xa1   :  { %1057 = vmatprep.subr.mxu1 %v4597_v39  ;;  %1100 = vmatprep.subr.mxu0 %v7835_v25  ;;  %v7876_v25 = vand.u32 4294901760, %v7875_v23  ;;  %v111_v23 = vld [vmem:[%s7129_s1 + $0x2e0] sm:$0xff] }
  0xa2   :  { %1059 = vmatpush2.msra.mxu1 %v4619_v49  ;;  %1063 = vmatprep.mubr.f32.mxu1 %v7836_v31  ;;  %v7877_v31 = vld [vmem:[#allocation12_spill] sm:$0xff] }
  0xa3   :  { %1104 = vmatpush1.msra.mxu0 %v7837_v54  ;;  %1067 = vmatmul.mubr.f32.vlgmr.msra.gmra.mxu1 %v7838_v35  ;;  %v7878_v54 = vld [vmem:[#allocation41_spill] sm:$0xff] }
  0xa4   :  { %1108 = vmatprep.subr.mxu0 %v7839_v37  ;;  %1339 = vmatprep.subr.mxu1 %v3652_v3  ;;  %v7844_v3 = vand.u32 4294901760, %v3899_v6  ;;  %v7862_v6 = vld [vmem:[#allocation7_spill] sm:$0xff]  ;;  %v7879_v35 = vand.u32 4294901760, %v7878_v54  ;;  %v7880_v37 = vld [vmem:[#allocation13_spill] sm:$0xff]  ;;  %v7914_v54 = vld [vmem:[#allocation30_spill] sm:$0xff] }
  0xa5   :  { %1112 = vmatpush1.msra.mxu0 %v7840_v40  ;;  %1341 = vmatpush1.msra.mxu1 %v3654_v4  ;;  %v7845_v4 = vand.u32 4294901760, %v3926_v55  ;;  %v7881_v40 = vld [vmem:[#allocation43_spill] sm:$0xff] }
  0xa6   :  { %1116 = vmatprep.subr.mxu0 %v7841_v45  ;;  %1343 = vmatprep.subr.mxu1 %v3656_v5  ;;  %v7846_v5 = vand.u32 4294901760, %v3942_v28  ;;  %v7863_v28 = vld [vmem:[#allocation31_spill] sm:$0xff]  ;;  %v7882_v45 = vand.u32 4294901760, %v7881_v40 }
  0xa7   :  { %1120 = vmatpush1.msra.mxu0 %v7842_v59  ;;  %1345 = vmatpush1.msra.mxu1 %v3667_v9  ;;  %v7847_v9 = vand.u32 4294901760, %v3966_v34  ;;  %v7853_v34 = vld [vmem:[#allocation4_spill] sm:$0xff]  ;;  %v7883_v59 = vld [vmem:[#allocation14_spill] sm:$0xff] }
  0xa8   :  { %1124 = vmatprep.subr.mxu0 %v7843_v0  ;;  %1347 = vmatprep.subr.mxu1 %v3669_v10  ;;  %v7848_v10 = vand.u32 4294901760, %v3982_v46  ;;  %v7864_v46 = vand.u32 4294901760, %v7863_v28  ;;  %v7884_v0 = vld [vmem:[#allocation45_spill] sm:$0xff] }
  0xa9   :  { %1128 = vmatpush1.msra.mxu0 %v7844_v3  ;;  %1349 = vmatpush1.msra.mxu1 %v3671_v11  ;;  %v7849_v11 = vand.u32 4294901760, %v3994_v60  ;;  %v7856_v60 = vld [vmem:[#allocation5_spill] sm:$0xff]  ;;  %v7885_v3 = vand.u32 4294901760, %v7884_v0  ;;  %v109_v0 = vld [vmem:[%s7129_s1 + $0x2d0] sm:$0xff] }
  0xaa   :  { %1132 = vmatprep.subr.mxu0 %v7845_v4  ;;  %1351 = vmatprep.subr.mxu1 %v3683_v15  ;;  %v7850_v15 = vand.u32 4294901760, %v7747_v44  ;;  %v7869_v44 = vld [vmem:[#allocation35_spill] sm:$0xff]  ;;  %v7902_v28 = vld [vmem:[#allocation57_spill] sm:$0xff] }
  0xab   :  { %1136 = vmatpush1.msra.mxu0 %v7846_v5  ;;  %1353 = vmatpush1.msra.mxu1 %v3685_v16  ;;  %v7851_v16 = vand.u32 4294901760, %v7749_v7  ;;  %v7871_v7 = vld [vmem:[#allocation10_spill] sm:$0xff]  ;;  %v7886_v4 = vld [vmem:[#allocation15_spill] sm:$0xff] }
  0xac   :  { %1140 = vmatprep.subr.mxu0 %v7847_v9  ;;  %1355 = vmatprep.subr.mxu1 %v3687_v17  ;;  %v7852_v17 = vand.u32 4294901760, %v7751_v29  ;;  %v7887_v5 = vld [vmem:[#allocation47_spill] sm:$0xff] }
  0xad   :  { %1144 = vmatpush1.msra.mxu0 %v7848_v10  ;;  %1357 = vmatpush1.msra.mxu1 %v3709_v22  ;;  %v7854_v22 = vld [vmem:[#allocation25_spill] sm:$0xff]  ;;  %v7888_v9 = vand.u32 4294901760, %v7887_v5  ;;  %v7889_v10 = vld [vmem:[#allocation16_spill] sm:$0xff]  ;;  %v7921_v5 = vld [vmem:[#allocation34_spill] sm:$0xff] }
  0xae   :  { %1148 = vmatprep.subr.mxu0 %v7849_v11  ;;  %1359 = vmatprep.subr.mxu1 %v3715_v24  ;;  %v7855_v55 = vand.u32 4294901760, %v7854_v22  ;;  %v7857_v24 = vld [vmem:[#allocation27_spill] sm:$0xff]  ;;  %v7890_v11 = vld [vmem:[#allocation49_spill] sm:$0xff]  ;;  %v7895_v22 = vld [vmem:[#allocation18_spill] sm:$0xff] }
  0xaf   :  { %1152 = vmatpush1.msra.mxu0 %v7850_v15  ;;  %1361 = vmatpush1.msra.mxu1 %v7748_v26  ;;  %v7858_v8 = vand.u32 4294901760, %v7857_v24  ;;  %v7870_v26 = vand.u32 4294901760, %v7869_v44  ;;  %v7891_v15 = vand.u32 4294901760, %v7890_v11  ;;  %v7898_v24 = vld [vmem:[#allocation20_spill] sm:$0xff]  ;;  %v7923_v11 = vld [vmem:[#allocation69_spill] sm:$0xff] }
  0xb0   :  { %1156 = vmatprep.subr.mxu0 %v7851_v16  ;;  %1363 = vmatprep.subr.mxu1 %v7750_v43  ;;  %v7872_v43 = vld [vmem:[#allocation37_spill] sm:$0xff] }
  0xb1   :  { %1160 = vmatpush1.msra.mxu0 %v7852_v17  ;;  %1365 = vmatpush1.msra.mxu1 %v7853_v34  ;;  %v7873_v29 = vand.u32 4294901760, %v7872_v43  ;;  %v7892_v16 = vld [vmem:[#allocation17_spill] sm:$0xff]  ;;  %v7893_v17 = vld [vmem:[#allocation51_spill] sm:$0xff] }
  0xb2   :  { %1164 = vmatprep.subr.mxu0 %v7855_v55  ;;  %1367 = vmatprep.subr.mxu1 %v7856_v60  ;;  %v7894_v34 = vand.u32 4294901760, %v7893_v17  ;;  %v7896_v55 = vld [vmem:[#allocation53_spill] sm:$0xff] }
  0xb3   :  { %1168 = vmatpush1.msra.mxu0 %v7858_v8  ;;  %1369 = vmatpush1.msra.mxu1 %v7859_v42  ;;  %v7897_v60 = vand.u32 4294901760, %v7896_v55  ;;  %v114_v8 = vld [vmem:[%s7129_s1 + $0x2f8] sm:$0xff]  ;;  %v7899_v42 = vld [vmem:[#allocation55_spill] sm:$0xff] }
  0xb4   :  { %1172 = vmatprep.subr.mxu0 %v7861_v21  ;;  %1371 = vmatprep.subr.mxu1 %v7862_v6  ;;  %v7900_v48 = vand.u32 4294901760, %v7899_v42  ;;  %v7901_v21 = vld [vmem:[#allocation22_spill] sm:$0xff]  ;;  %v113_v6 = vld [vmem:[%s7129_s1 + $0x2f0] sm:$0xff]  ;;  %v4973_v44 = vand.u32 4294901760, %v114_v8  ;;  %v7927_v55 = vld [vmem:[#allocation71_spill] sm:$0xff] }
  0xb5   :  { %1176 = vmatpush1.msra.mxu0 %v7864_v46  ;;  %1373 = vmatpush1.msra.mxu1 %v7865_v51  ;;  %v7903_v46 = vand.u32 4294901760, %v7902_v28  ;;  %v7904_v51 = vld [vmem:[#allocation24_spill] sm:$0xff]  ;;  %v107_v42 = vld [vmem:[%s7129_s1 + $0x2c0] sm:$0xff]  ;;  %v106_v28 = vld [vmem:[%s7129_s1 + $0x2b8] sm:$0xff] }
  0xb6   :  { %1180 = vmatprep.subr.mxu0 %v7867_v14  ;;  %1375 = vmatprep.subr.mxu1 %v7868_v41  ;;  %v7906_v14 = vand.u32 4294901760, %v7905_v38  ;;  %v7907_v41 = vld [vmem:[#allocation26_spill] sm:$0xff]  ;;  %7908 = vst [vmem:[#allocation19_spill] sm:$0xff] %v4973_v44  ;;  %v7934_v38 = vld [vmem:[#allocation75_spill] sm:$0xff] }
  0xb7   :  { %1184 = vmatpush1.msra.mxu0 %v7870_v26  ;;  %1377 = vmatpush1.msra.mxu1 %v7871_v7  ;;  %v112_v26 = vld [vmem:[%s7129_s1 + $0x2e8] sm:$0xff]  ;;  %v7909_v7 = vld [vmem:[#allocation61_spill] sm:$0xff] }
  0xb8   :  { %1188 = vmatprep.subr.mxu0 %v7873_v29  ;;  %1379 = vmatprep.subr.mxu1 %v7874_v18  ;;  %v7910_v43 = vand.u32 4294901760, %v7909_v7  ;;  %v7911_v29 = vld [vmem:[#allocation28_spill] sm:$0xff]  ;;  %v4981_v18 = vand.u32 4294901760, %v113_v6 }
  0xb9   :  { %1192 = vmatpush1.msra.mxu0 %v7876_v25  ;;  %1381 = vmatpush1.msra.mxu1 %v7877_v31  ;;  %v7912_v25 = vld [vmem:[#allocation63_spill] sm:$0xff] }
  0xba   :  { %1196 = vmatprep.subr.mxu0 %v7879_v35  ;;  %1383 = vmatprep.subr.mxu1 %v7880_v37  ;;  %v7913_v31 = vand.u32 4294901760, %v7912_v25  ;;  %v110_v35 = vld [vmem:[%s7129_s1 + $0x2d8] sm:$0xff]  ;;  %v5012_v17 = vsub.f32 %v113_v6, %v4981_v18  ;;  %v7933_v6 = vld [vmem:[#allocation40_spill] sm:$0xff] }
  0xbb   :  { %1200 = vmatpush1.msra.mxu0 %v7882_v45  ;;  %1385 = vmatpush1.msra.mxu1 %v7883_v59  ;;  %v7915_v37 = vld [vmem:[#allocation65_spill] sm:$0xff]  ;;  %v7917_v45 = vld [vmem:[#allocation32_spill] sm:$0xff]  ;;  %v4995_v59 = vand.u32 4294901760, %v112_v26 }
  0xbc   :  { %1204 = vmatprep.subr.mxu0 %v7885_v3  ;;  %1387 = vmatprep.subr.mxu1 %v7886_v4  ;;  %v7916_v40 = vand.u32 4294901760, %v7915_v37  ;;  %v7919_v3 = vld [vmem:[#allocation67_spill] sm:$0xff] }
  0xbd   :  { %1208 = vmatpush2.msra.mxu0 %v7888_v9  ;;  %1389 = vmatpush1.msra.mxu1 %v7889_v10  ;;  %7918 = vst [vmem:[#allocation2_spill] sm:$0xff] %v4995_v59  ;;  %v7920_v4 = vand.u32 4294901760, %v7919_v3  ;;  %v5003_v9 = vand.u32 4294901760, %v111_v23  ;;  %v5006_v10 = vsub.f32 %v114_v8, %v4973_v44  ;;  %v5022_v8 = vand.u32 4294901760, %v109_v0  ;;  %v104_v3 = vld [vmem:[%s7129_s1 + $0x2a8] sm:$0xff] }
  0xbe   :  { %1212 = vmatprep.subr.mxu0 %v7891_v15  ;;  %1391 = vmatprep.subr.mxu1 %v7892_v16  ;;  %v7924_v15 = vand.u32 4294901760, %v7923_v11  ;;  %v7925_v16 = vld [vmem:[#allocation36_spill] sm:$0xff]  ;;  %v7949_v11 = vld [vmem:[#allocation81_spill] sm:$0xff] }
  0xbf   :  { %1216 = vmatpush2.msra.mxu0 %v7894_v34  ;;  %1393 = vmatpush1.msra.mxu1 %v7895_v22  ;;  %7922 = vst [vmem:[#allocation21_spill] sm:$0xff] %v5003_v9  ;;  %v5014_v34 = vand.u32 4294901760, %v110_v35  ;;  %v108_v22 = vld [vmem:[%s7129_s1 + $0x2c8] sm:$0xff]  ;;  %7930 = vst [vmem:[#allocation23_spill] sm:$0xff] %v5022_v8 }
  0xc0   :  { %1220 = vmatprep.subr.mxu0 %v7897_v60  ;;  %1395 = vmatprep.subr.mxu1 %v7898_v24  ;;  %v7928_v60 = vand.u32 4294901760, %v7927_v55  ;;  %v7929_v24 = vld [vmem:[#allocation38_spill] sm:$0xff]  ;;  %v5045_v7 = vand.u32 4294901760, %v108_v22  ;;  %v101_v55 = vld [vmem:[%s7129_s1 + $0x290] sm:$0xff] }
  0xc1   :  { %1224 = vmatpush2.msra.mxu0 %v7900_v48  ;;  %1397 = vmatpush1.msra.mxu1 %v7901_v21  ;;  %7926 = vst [vmem:[#allocation3_spill] sm:$0xff] %v5014_v34  ;;  %v7931_v48 = vld [vmem:[#allocation73_spill] sm:$0xff] }
  0xc2   :  { %1228 = vmatprep.subr.mxu0 %v7903_v46  ;;  %1399 = vmatprep.subr.mxu1 %v7904_v51  ;;  %v7932_v21 = vand.u32 4294901760, %v7931_v48  ;;  %v105_v46 = vld [vmem:[%s7129_s1 + $0x2b0] sm:$0xff]  ;;  %v5037_v51 = vsub.f32 %v112_v26, %v4995_v59  ;;  %7937 = vst [vmem:[#allocation44_spill] sm:$0xff] %v5045_v7  ;;  %v7347_v26 = vand.u32 4294901760, %v5012_v17 }
  0xc3   :  { %1232 = vmatpush2.msra.mxu0 %v7906_v14  ;;  %1401 = vmatpush1.msra.mxu1 %v7907_v41  ;;  %v7935_v14 = vand.u32 4294901760, %v7934_v38  ;;  %v5043_v41 = vsub.f32 %v111_v23, %v5003_v9  ;;  %v5058_v23 = vsub.f32 %v110_v35, %v5014_v34 }
  0xc4   :  { %1236 = vmatprep.subr.mxu0 %v7910_v43  ;;  %1403 = vmatprep.subr.mxu1 %v7911_v29  ;;  %v7348_v43 = vand.u32 4294901760, %v5006_v10  ;;  %v7938_v29 = vld [vmem:[#allocation76_spill] sm:$0xff]  ;;  %v7345_v35 = vand.u32 4294901760, %v5037_v51 }
  0xc5   :  { %1240 = vmatpush2.msra.mxu0 %v7913_v31  ;;  %1405 = vmatpush2.msra.mxu1 %v7914_v54  ;;  %7936 = vst [vmem:[#allocation42_spill] sm:$0xff] %v5043_v41  ;;  %v7939_v25 = vand.u32 4294901760, %v7938_v29  ;;  %v5051_v31 = vand.u32 4294901760, %v107_v42  ;;  %7941 = vst [vmem:[#allocation48_spill] sm:$0xff] %v5058_v23  ;;  %v7942_v54 = vld [vmem:[#allocation77_spill] sm:$0xff]  ;;  %v7343_v38 = vand.u32 4294901760, %v5058_v23 }
  0xc6   :  { %1244 = vmatprep.subr.mxu0 %v7916_v40  ;;  %1407 = vmatprep.subr.mxu1 %v7917_v45  ;;  %v7943_v37 = vand.u32 4294901760, %v7942_v54  ;;  %v5064_v40 = vsub.f32 %v109_v0, %v5022_v8  ;;  %v5068_v45 = vand.u32 4294901760, %v105_v46  ;;  %v5083_v0 = vsub.f32 %v5006_v10, %v7348_v43 }
  0xc7   :  { %1248 = vmatpush2.msra.mxu0 %v7920_v4  ;;  %1409 = vmatpush2.msra.mxu1 %v7921_v5  ;;  %7940 = vst [vmem:[#allocation46_spill] sm:$0xff] %v5051_v31  ;;  %v7947_v4 = vld [vmem:[#allocation79_spill] sm:$0xff]  ;;  %v5101_v48 = vsub.f32 %v107_v42, %v5051_v31  ;;  %v7978_v43 = vand.u32 4294901760, %v4666_v33 }
  0xc8   :  { %1252 = vmatprep.subr.mxu0 %v7924_v15  ;;  %1411 = vmatprep.subr.mxu1 %v7925_v16  ;;  %7944 = vst [vmem:[#allocation50_spill] sm:$0xff] %v5064_v40  ;;  %7946 = vst [vmem:[#allocation54_spill] sm:$0xff] %v5068_v45  ;;  %v7948_v5 = vand.u32 4294901760, %v7947_v4  ;;  %v7344_v16 = vand.u32 4294901760, %v5043_v41  ;;  %v5115_v29 = vsub.f32 %v105_v46, %v5068_v45  ;;  %v99_v46 = vld [vmem:[%s7129_s1 + $0x280] sm:$0xff] }
  0xc9   :  { %1256 = vmatpush2.msra.mxu0 %v7928_v60  ;;  %1413 = vmatpush2.msra.mxu1 %v7929_v24  ;;  %v5095_v60 = vsub.f32 %v108_v22, %v5045_v7  ;;  %7955 = vst [vmem:[#allocation60_spill] sm:$0xff] %v5101_v48 }
  0xca   :  { %1260 = vmatprep.subr.mxu0 %v7932_v21  ;;  %1415 = vmatprep.subr.mxu1 %v7933_v6  ;;  %v5106_v21 = vsub.f32 %v5012_v17, %v7347_v26  ;;  %v5108_v6 = vand.u32 4294901760, %v104_v3  ;;  %7959 = vst [vmem:[#allocation64_spill] sm:$0xff] %v5115_v29 }
  0xcb   :  { %1264 = vmatpush2.msra.mxu0 %v7935_v14  ;;  %1417 = vmatpush2.msra.mxu1 %v7804_v20  ;;  %v103_v20 = vld [vmem:[%s7129_s1 + $0x2a0] sm:$0xff]  ;;  %7952 = vst [vmem:[#allocation58_spill] sm:$0xff] %v5095_v60  ;;  %v7957_v14 = vld [vmem:[#allocation84_spill] sm:$0xff] }
  0xcc   :  { %1268 = vmatprep.subr.mxu0 %v7939_v25  ;;  %1419 = vmatprep.subr.mxu1 %v7806_v63  ;;  %v5066_v63 = vand.u32 4294901760, %v106_v28  ;;  %v5085_v15 = vand.u32 4294901760, %v103_v20  ;;  %7956 = vst [vmem:[#allocation62_spill] sm:$0xff] %v5108_v6  ;;  %v7958_v22 = vand.u32 4294901760, %v7957_v14  ;;  %v7961_v25 = vld [vmem:[#allocation85_spill] sm:$0xff]  ;;  %v7967_v14 = vld [vmem:[#allocation88_spill] sm:$0xff] }
  0xcd   :  { %1272 = vmatpush2.msra.mxu0 %v7943_v37  ;;  %1421 = vmatpush2.msra.mxu1 %v7808_v36  ;;  %v7950_v36 = vand.u32 4294901760, %v7949_v11  ;;  %v7962_v54 = vand.u32 4294901760, %v7961_v25  ;;  %v5127_v37 = vsub.f32 %v5037_v51, %v7345_v35  ;;  %v7350_v25 = vand.u32 4294901760, %v5101_v48  ;;  %v7973_v35 = vld [vmem:[#allocation91_spill] sm:$0xff] }
  0xce   :  { %7945 = vst [vmem:[#allocation52_spill] sm:$0xff] %v5066_v63  ;;  %1276 = vmatprep.subr.mxu0 %v7948_v5  ;;  %1423 = vmatprep.subr.mxu1 %v7810_v27  ;;  %7951 = vst [vmem:[#allocation56_spill] sm:$0xff] %v5085_v15  ;;  %v102_v27 = vld [vmem:[%s7129_s1 + $0x298] sm:$0xff]  ;;  %v5119_v42 = vsub.f32 %v106_v28, %v5066_v63  ;;  %v7964_v28 = vld [vmem:[#allocation86_spill] sm:$0xff]  ;;  %v5141_v11 = vsub.f32 %v103_v20, %v5085_v15 }
  0xcf   :  { %1280 = vmatpush2.msra.mxu0 %v7950_v36  ;;  %1425 = vmatpush2.msra.mxu1 %v7812_v13  ;;  %v7953_v13 = vld [vmem:[#allocation83_spill] sm:$0xff]  ;;  %v5129_v4 = vand.u32 4294901760, %v102_v27  ;;  %v7965_v5 = vand.u32 4294901760, %v7964_v28  ;;  %v5146_v36 = vsub.f32 %v5043_v41, %v7344_v16  ;;  %v5159_v20 = vsub.f32 %v5058_v23, %v7343_v38  ;;  %v97_v16 = vld [vmem:[%s7129_s1 + $0x270] sm:$0xff] }
  0xd0   :  { %v7954_v24 = vand.u32 4294901760, %v7953_v13  ;;  %1427 = vmatprep.subr.mxu1 %v7814_v53  ;;  %v7346_v53 = vand.u32 4294901760, %v5064_v40  ;;  %7960 = vst [vmem:[#allocation66_spill] sm:$0xff] %v5119_v42  ;;  %7966 = vst [vmem:[#allocation78_spill] sm:$0xff] %v5141_v11  ;;  %v100_v13 = vld [vmem:[%s7129_s1 + $0x288] sm:$0xff]  ;;  %v5166_v28 = vsub.f32 %v104_v3, %v5108_v6  ;;  %v7351_v38 = vand.u32 4294901760, %v5119_v42 }
  0xd1   :  { %1429 = vmatpush2.msra.mxu1 %v7815_v32  ;;  %v5131_v32 = vand.u32 4294901760, %v101_v55  ;;  %v7352_v3 = vand.u32 4294901760, %v5115_v29  ;;  %v5193_v26 = vsub.f32 %v102_v27, %v5129_v4 }
  0xd2   :  { %1284 = vmatprep.subr.mxu0 %v7954_v24  ;;  %1431 = vmatprep.subr.mxu1 %v7816_v61  ;;  %v7349_v24 = vand.u32 4294901760, %v5095_v60  ;;  %7969 = vst [vmem:[#allocation80_spill] sm:$0xff] %v5166_v28  ;;  %v7983_v61 = vld [vmem:[#allocation93_spill] sm:$0xff] }
  0xd3   :  { %1288 = vmatpush2.msra.mxu0 %v7958_v22  ;;  %7963 = vst [vmem:[#allocation68_spill] sm:$0xff] %v5131_v32  ;;  %1433 = vmatpush2.msra.mxu1 %v7817_v56  ;;  %v7968_v22 = vand.u32 4294901760, %v7967_v14  ;;  %7977 = vst [vmem:[#allocation5_spill] sm:$0xff] %v5193_v26  ;;  %v5240_v27 = vsub.f32 %v5115_v29, %v7352_v3  ;;  %v7996_v56 = vand.u32 4294901760, %v5141_v11  ;;  %v7998_v3 = vld [vmem:[#allocation74_spill] sm:$0xff] }
  0xd4   :  { %1292 = vmatprep.subr.mxu0 %v7962_v54  ;;  %1435 = vmatprep.subr.mxu1 %v7818_v47  ;;  %v98_v54 = vld [vmem:[%s7129_s1 + $0x278] sm:$0xff]  ;;  %v5174_v47 = vsub.f32 %v5064_v40, %v7346_v53  ;;  %v5190_v53 = vand.u32 4294901760, %v100_v13 }
  0xd5   :  { %1296 = vmatpush2.msra.mxu0 %v7965_v5  ;;  %v7970_v5 = vld [vmem:[#allocation90_spill] sm:$0xff]  ;;  %1437 = vmatpush2.msra.mxu1 %v7819_v57  ;;  %v7980_v57 = vld [vmem:[#allocation92_spill] sm:$0xff] }
  0xd6   :  { %1300 = vmatprep.subr.mxu0 %v7968_v22  ;;  %v7971_v14 = vand.u32 4294901760, %v7970_v5  ;;  %v5176_v22 = vand.u32 4294901760, %v99_v46  ;;  %v7974_v5 = vand.u32 4294901760, %v7973_v35  ;;  %1439 = vmatprep.subr.mxu1 %v7820_v1  ;;  %7976 = vst [vmem:[#allocation25_spill] sm:$0xff] %v5190_v53  ;;  %v5202_v1 = vsub.f32 %v5095_v60, %v7349_v24  ;;  %v96_v35 = vld [vmem:[%s7129_s1 + $0x268] sm:$0xff] }
  0xd7   :  { %1441 = vmatpush2.msra.mxu1 %v7821_v12  ;;  %v7981_v33 = vand.u32 4294901760, %v7980_v57  ;;  %v5219_v24 = vand.u32 4294901760, %v97_v16  ;;  %v7984_v57 = vand.u32 4294901760, %v7983_v61  ;;  %v94_v61 = vld [vmem:[%s7129_s1 + $0x258] sm:$0xff]  ;;  %v5256_v29 = vsub.f32 %v100_v13, %v5190_v53 }
  0xd8   :  { %1304 = vmatpush2.msra.mxu0 %v7971_v14  ;;  %7972 = vst [vmem:[#allocation82_spill] sm:$0xff] %v5176_v22  ;;  %v5188_v14 = vsub.f32 %v101_v55, %v5131_v32  ;;  %v95_v55 = vld [vmem:[%s7129_s1 + $0x260] sm:$0xff]  ;;  %1443 = vmatprep.subr.mxu1 %v7822_v30  ;;  %v5230_v12 = vsub.f32 %v99_v46, %v5176_v22  ;;  %v7989_v30 = vld [vmem:[#allocation72_spill] sm:$0xff]  ;;  %v7999_v13 = vld [vmem:[#allocation89_spill] sm:$0xff]  ;;  %v5283_v41 = vand.u32 4294901760, %v94_v61 }
  0xd9   :  { %1308 = vmatprep.subr.mxu0 %v7974_v5  ;;  %v5204_v5 = vand.u32 4294901760, %v98_v54  ;;  %7982 = vst [vmem:[#allocation6_spill] sm:$0xff] %v5219_v24  ;;  %v5248_v46 = vand.u32 4294901760, %v95_v55  ;;  %7991 = vst [vmem:[#allocation31_spill] sm:$0xff] %v5256_v29  ;;  %v5267_v60 = vsub.f32 %v5141_v11, %v7996_v56  ;;  %v91_v56 = vld [vmem:[%s7129_s1 + $0x240] sm:$0xff]  ;;  %v8005_v11 = vand.u32 4294901760, %v5193_v26 }
  0xda   :  { %7975 = vst [vmem:[#allocation4_spill] sm:$0xff] %v5188_v14  ;;  %1312 = vmatpush2.msra.mxu0 %v7978_v43  ;;  %v5217_v43 = vsub.f32 %v5101_v48, %v7350_v25  ;;  %7986 = vst [vmem:[#allocation29_spill] sm:$0xff] %v5230_v12  ;;  %v5235_v25 = vsub.f32 %v5119_v42, %v7351_v38  ;;  %v93_v38 = vld [vmem:[%s7129_s1 + $0x250] sm:$0xff]  ;;  %v7992_v42 = vld [vmem:[#allocation95_spill] sm:$0xff] }
  0xdb   :  { %7979 = vst [vmem:[#allocation27_spill] sm:$0xff] %v5204_v5  ;;  %1316 = vmatprep.subr.mxu0 %v7981_v33  ;;  %v7985_v33 = vld [vmem:[#allocation70_spill] sm:$0xff]  ;;  %7990 = vst [vmem:[#allocation7_spill] sm:$0xff] %v5248_v46  ;;  %v7993_v48 = vand.u32 4294901760, %v7992_v42  ;;  %v5270_v40 = vsub.f32 %v98_v54, %v5204_v5  ;;  %v5276_v42 = vsub.f32 %v97_v16, %v5219_v24  ;;  %v8006_v16 = vand.u32 4294901760, %v5188_v14 }
  0xdc   :  { %1320 = vmatpush2.msra.mxu0 %v7984_v57  ;;  %1445 = vmatpush2.msra.mxu1 %v7985_v33  ;;  %v7987_v57 = vld [vmem:[#allocation94_spill] sm:$0xff]  ;;  %8002 = vst [vmem:[#allocation35_spill] sm:$0xff] %v5283_v41  ;;  %v5306_v54 = vsub.f32 %v5193_v26, %v8005_v11 }
  0xdd   :  { %v7988_v33 = vand.u32 4294901760, %v7987_v57  ;;  %1447 = vmatprep.subr.mxu1 %v7989_v30  ;;  %v7994_v57 = vld [vmem:[#allocation87_spill] sm:$0xff]  ;;  %7997 = vst [vmem:[#allocation33_spill] sm:$0xff] %v5270_v40  ;;  %8000 = vst [vmem:[#allocation9_spill] sm:$0xff] %v5276_v42  ;;  %v8001_v30 = vand.u32 4294901760, %v5166_v28  ;;  %v87_v11 = vld [vmem:[%s7129_s1 + $0x220] sm:$0xff] }
  0xde   :  { %1330 = vmatprep.mubr.f32.mxu0 %v7994_v57  ;;  %1449 = vmatpush2.msra.mxu1 %v7998_v3  ;;  %v5292_v3 = vand.u32 4294901760, %v93_v38 }
  0xdf   :  { %1324 = vmatprep.subr.mxu0 %v7988_v33  ;;  %v5262_v33 = vand.u32 4294901760, %v96_v35  ;;  %v5281_v23 = vsub.f32 %v5166_v28, %v8001_v30  ;;  %1451 = vmatprep.subr.mxu1 %v4503_v2  ;;  %v92_v30 = vld [vmem:[%s7129_s1 + $0x248] sm:$0xff]  ;;  %v5301_v2 = vsub.f32 %v95_v55, %v5248_v46  ;;  %v5311_v28 = vsub.f32 %v5188_v14, %v8006_v16  ;;  %v89_v55 = vld [vmem:[%s7129_s1 + $0x230] sm:$0xff] }
  0xe0   :  { %1328 = vmatpush2.msra.mxu0 %v7993_v48  ;;  %8003 = vst [vmem:[#allocation10_spill] sm:$0xff] %v5292_v3  ;;  %1453 = vmatpush2.msra.mxu1 %v4517_v62  ;;  %v90_v62 = vld [vmem:[%s7129_s1 + $0x238] sm:$0xff]  ;;  %v5323_v48 = vand.u32 4294901760, %v91_v56  ;;  %v5332_v26 = vand.u32 4294901760, %v92_v30  ;;  %v5353_v16 = vand.u32 4294901760, %v89_v55 }
  0xe1   :  { %7995 = vst [vmem:[#allocation8_spill] sm:$0xff] %v5262_v33  ;;  %1332 = vmatmul.mubr.f32.vlgmr.msra.gmra.mxu0 %v7999_v13  ;;  %1476 = vmatprep.subr.mxu0 %v4973_v44  ;;  %8004 = vst [vmem:[#allocation37_spill] sm:$0xff] %v5301_v2  ;;  %v5327_v44 = vsub.f32 %v96_v35, %v5262_v33  ;;  %v8012_v35 = vand.u32 4294901760, %v5230_v12 }
  0xe2   :  { %1478 = vmatpush1.msra.mxu0 %v4981_v18  ;;  %1455 = vmatprep.subr.mxu1 %v7828_v52  ;;  %8007 = vst [vmem:[#allocation11_spill] sm:$0xff] %v5323_v48  ;;  %8009 = vst [vmem:[#allocation12_spill] sm:$0xff] %v5332_v26  ;;  %v5351_v52 = vand.u32 4294901760, %v90_v62 }
  0xe3   :  { %1480 = vmatprep.subr.mxu0 %v4995_v59  ;;  %8008 = vst [vmem:[#allocation39_spill] sm:$0xff] %v5327_v44  ;;  %1457 = vmatpush2.msra.mxu1 %v7830_v19  ;;  %v5339_v59 = vsub.f32 %v94_v61, %v5283_v41  ;;  %v5344_v19 = vsub.f32 %v93_v38, %v5292_v3  ;;  %8014 = vst [vmem:[#allocation14_spill] sm:$0xff] %v5353_v16  ;;  %v88_v61 = vld [vmem:[%s7129_s1 + $0x228] sm:$0xff] }
  0xe4   :  { %1482 = vmatpush1.msra.mxu0 %v5003_v9  ;;  %1459 = vmatprep.subr.mxu1 %v7832_v50  ;;  %v5349_v14 = vsub.f32 %v5230_v12, %v8012_v35  ;;  %8013 = vst [vmem:[#allocation43_spill] sm:$0xff] %v5351_v52  ;;  %v5371_v9 = vsub.f32 %v91_v56, %v5323_v48  ;;  %v8019_v56 = vand.u32 4294901760, %v5276_v42  ;;  %v5394_v38 = vand.u32 4294901760, %v88_v61 }
  0xe5   :  { %8010 = vst [vmem:[#allocation41_spill] sm:$0xff] %v5339_v59  ;;  %1484 = vmatprep.subr.mxu0 %v5014_v34  ;;  %8011 = vst [vmem:[#allocation13_spill] sm:$0xff] %v5344_v19  ;;  %1461 = vmatpush2.msra.mxu1 %v4581_v58  ;;  %v8015_v34 = vand.u32 4294901760, %v5256_v29  ;;  %v8017_v58 = vand.u32 4294901760, %v5270_v40  ;;  %v5411_v12 = vsub.f32 %v90_v62, %v5351_v52  ;;  %v84_v62 = vld [vmem:[%s7129_s1 + $0x208] sm:$0xff] }
  0xe6   :  { %1486 = vmatpush1.msra.mxu0 %v5022_v8  ;;  %1463 = vmatprep.subr.mxu1 %v4597_v39  ;;  %8016 = vst [vmem:[#allocation45_spill] sm:$0xff] %v5371_v9  ;;  %v5379_v8 = vand.u32 4294901760, %v87_v11  ;;  %v85_v39 = vld [vmem:[%s7129_s1 + $0x210] sm:$0xff]  ;;  %8020 = vst [vmem:[#allocation47_spill] sm:$0xff] %v5394_v38 }
  0xe7   :  { %v5365_v35 = vsub.f32 %v5256_v29, %v8015_v34  ;;  %1488 = vmatprep.subr.mxu0 %v5045_v7  ;;  %v5376_v50 = vsub.f32 %v5270_v40, %v8017_v58  ;;  %v86_v34 = vld [vmem:[%s7129_s1 + $0x218] sm:$0xff]  ;;  %1465 = vmatpush2.msra.mxu1 %v4619_v49  ;;  %v5392_v58 = vsub.f32 %v5276_v42, %v8019_v56  ;;  %v83_v56 = vld [vmem:[%s7129_s1 + $0x200] sm:$0xff]  ;;  %v8024_v49 = vand.u32 4294901760, %v5301_v2 }
  0xe8   :  { %8018 = vst [vmem:[#allocation15_spill] sm:$0xff] %v5379_v8  ;;  %1467 = vmatprep.mubr.f32.mxu1 %v7994_v57  ;;  %v5398_v40 = vsub.f32 %v92_v30, %v5332_v26  ;;  %1490 = vmatpush1.msra.mxu0 %v5051_v31  ;;  %v5404_v57 = vsub.f32 %v89_v55, %v5353_v16  ;;  %8022 = vst [vmem:[#allocation49_spill] sm:$0xff] %v5411_v12  ;;  %v8023_v30 = vand.u32 4294901760, %v5083_v0 }
  0xe9   :  { %1469 = vmatmul.mubr.f32.vlgmr.msra.gmra.mxu1 %v7999_v13  ;;  %1492 = vmatprep.subr.mxu0 %v5066_v63  ;;  %v5420_v55 = vsub.f32 %v5301_v2, %v8024_v49  ;;  %v5422_v7 = vand.u32 4294901760, %v86_v34  ;;  %v5424_v42 = vand.u32 4294901760, %v85_v39  ;;  %v8027_v0 = vand.u32 4294901760, %v5106_v21 }
  0xea   :  { %8021 = vst [vmem:[#allocation16_spill] sm:$0xff] %v5404_v57  ;;  %1625 = vmatprep.subr.mxu1 %v8023_v30  ;;  %1494 = vmatpush1.msra.mxu0 %v5068_v45  ;;  %v8028_v13 = vand.u32 4294901760, %v5327_v44  ;;  %v5439_v2 = vsub.f32 %v87_v11, %v5379_v8  ;;  %v8030_v31 = vand.u32 4294901760, %v5127_v37  ;;  %v145_v11 = vld [vmem:[%s7129_s1 + $0x3f0] sm:$0xff]  ;;  %v8033_v37 = vand.u32 4294901760, %v5146_v36 }
  0xeb   :  { %8025 = vst [vmem:[#allocation17_spill] sm:$0xff] %v5422_v7  ;;  %8026 = vst [vmem:[#allocation51_spill] sm:$0xff] %v5424_v42  ;;  %1631 = vmatpush1.msra.mxu1 %v8027_v0  ;;  %1496 = vmatprep.subr.mxu0 %v5108_v6  ;;  %v8031_v0 = vand.u32 4294901760, %v5339_v59  ;;  %v8037_v36 = vand.u32 4294901760, %v5159_v20  ;;  %v5486_v63 = vsub.f32 %v86_v34, %v5422_v7  ;;  %v8044_v20 = vand.u32 4294901760, %v5398_v40 }
  0xec   :  { %v5436_v49 = vsub.f32 %v5327_v44, %v8028_v13  ;;  %8029 = vst [vmem:[#allocation18_spill] sm:$0xff] %v5439_v2  ;;  %1637 = vmatprep.subr.mxu1 %v8030_v31  ;;  %v5452_v44 = vand.u32 4294901760, %v83_v56  ;;  %1498 = vmatpush1.msra.mxu0 %v5085_v15  ;;  %v8034_v31 = vand.u32 4294901760, %v5344_v19  ;;  %v146_v13 = vld [vmem:[%s7129_s1 + $0x3f8] sm:$0xff]  ;;  %v143_v15 = vld [vmem:[%s7129_s1 + $0x3e0] sm:$0xff]  ;;  %v8047_v34 = vand.u32 4294901760, %v5217_v43 }
  0xed   :  { %v5449_v30 = vsub.f32 %v5339_v59, %v8031_v0  ;;  %1643 = vmatpush1.msra.mxu1 %v8033_v37  ;;  %v5465_v0 = vand.u32 4294901760, %v84_v62  ;;  %v5472_v59 = vsub.f32 %v88_v61, %v5394_v38  ;;  %1500 = vmatprep.subr.mxu0 %v5129_v4  ;;  %8039 = vst [vmem:[#allocation57_spill] sm:$0xff] %v5486_v63  ;;  %v8040_v61 = vand.u32 4294901760, %v5174_v47 }
  0xee   :  { %8032 = vst [vmem:[#allocation53_spill] sm:$0xff] %v5452_v44  ;;  %v5463_v21 = vsub.f32 %v5344_v19, %v8034_v31  ;;  %1649 = vmatprep.subr.mxu1 %v8037_v36  ;;  %v5479_v31 = vsub.f32 %v85_v39, %v5424_v42  ;;  %1502 = vmatpush1.msra.mxu0 %v5131_v32  ;;  %v8041_v36 = vand.u32 4294901760, %v5371_v9  ;;  %v5497_v37 = vand.u32 4294901760, %v145_v11  ;;  %v144_v19 = vld [vmem:[%s7129_s1 + $0x3e8] sm:$0xff] }
  0xef   :  { %8035 = vst [vmem:[#allocation20_spill] sm:$0xff] %v5465_v0  ;;  %8036 = vst [vmem:[#allocation55_spill] sm:$0xff] %v5472_v59  ;;  %1655 = vmatpush1.msra.mxu1 %v8040_v61  ;;  %1504 = vmatprep.subr.mxu0 %v5190_v53  ;;  %v8043_v47 = vand.u32 4294901760, %v5202_v1  ;;  %v5515_v32 = vand.u32 4294901760, %v146_v13  ;;  %v5527_v53 = vand.u32 4294901760, %v143_v15  ;;  %v8050_v43 = vand.u32 4294901760, %v5235_v25 }
  0xf0   :  { %8038 = vst [vmem:[#allocation22_spill] sm:$0xff] %v5479_v31  ;;  %v5495_v39 = vsub.f32 %v5371_v9, %v8041_v36  ;;  %8042 = vst [vmem:[#allocation24_spill] sm:$0xff] %v5497_v37  ;;  %v5510_v36 = vsub.f32 %v5398_v40, %v8044_v20  ;;  %v5513_v9 = vsub.f32 %v83_v56, %v5452_v44  ;;  %1506 = vmatpush1.msra.mxu0 %v5176_v22  ;;  %v142_v56 = vld [vmem:[%s7129_s1 + $0x3d8] sm:$0xff] }
  0xf1   :  { %1661 = vmatprep.subr.mxu1 %v8043_v47  ;;  %8046 = vst [vmem:[#allocation26_spill] sm:$0xff] %v5515_v32  ;;  %v8048_v47 = vand.u32 4294901760, %v5411_v12  ;;  %8049 = vst [vmem:[#allocation61_spill] sm:$0xff] %v5527_v53  ;;  %1508 = vmatprep.subr.mxu0 %v5204_v5  ;;  %v5547_v22 = vsub.f32 %v84_v62, %v5465_v0  ;;  %v8054_v25 = vand.u32 4294901760, %v5240_v27  ;;  %v139_v62 = vld [vmem:[%s7129_s1 + $0x3c0] sm:$0xff]  ;;  %v8057_v27 = vand.u32 4294901760, %v5281_v23 }
  0xf2   :  { %8045 = vst [vmem:[#allocation59_spill] sm:$0xff] %v5513_v9  ;;  %1667 = vmatpush1.msra.mxu1 %v8047_v34  ;;  %v8051_v34 = vand.u32 4294901760, %v5404_v57  ;;  %1510 = vmatpush1.msra.mxu0 %v5219_v24  ;;  %v5578_v5 = vsub.f32 %v146_v13, %v5515_v32  ;;  %v8064_v13 = vand.u32 4294901760, %v5306_v54  ;;  %v8067_v54 = vand.u32 4294901760, %v5311_v28 }
  0xf3   :  { %v5524_v61 = vsub.f32 %v5411_v12, %v8048_v47  ;;  %1673 = vmatprep.subr.mxu1 %v8050_v43  ;;  %v5540_v47 = vand.u32 4294901760, %v144_v19  ;;  %v141_v12 = vld [vmem:[%s7129_s1 + $0x3d0] sm:$0xff]  ;;  %8053 = vst [vmem:[#allocation63_spill] sm:$0xff] %v5547_v22  ;;  %1512 = vmatprep.subr.mxu0 %v5262_v33  ;;  %v5590_v33 = vsub.f32 %v143_v15, %v5527_v53  ;;  %v5604_v43 = vand.u32 4294901760, %v139_v62 }
  0xf4   :  { %v5538_v1 = vsub.f32 %v5404_v57, %v8051_v34  ;;  %1679 = vmatpush1.msra.mxu1 %v8054_v25  ;;  %v5554_v34 = vsub.f32 %v145_v11, %v5497_v37  ;;  %v8056_v57 = vand.u32 4294901760, %v5439_v2  ;;  %v5569_v11 = vand.u32 4294901760, %v142_v56  ;;  %8059 = vst [vmem:[#allocation32_spill] sm:$0xff] %v5578_v5  ;;  %1514 = vmatpush1.msra.mxu0 %v5248_v46  ;;  %v137_v15 = vld [vmem:[%s7129_s1 + $0x3b0] sm:$0xff] }
  0xf5   :  { %8052 = vst [vmem:[#allocation28_spill] sm:$0xff] %v5540_v47  ;;  %1685 = vmatprep.subr.mxu1 %v8057_v27  ;;  %v8061_v27 = vand.u32 4294901760, %v5472_v59  ;;  %8062 = vst [vmem:[#allocation67_spill] sm:$0xff] %v5590_v33  ;;  %v5592_v24 = vand.u32 4294901760, %v141_v12  ;;  %1516 = vmatprep.subr.mxu0 %v5283_v41  ;;  %v138_v41 = vld [vmem:[%s7129_s1 + $0x3b8] sm:$0xff]  ;;  %v8071_v28 = vand.u32 4294901760, %v5365_v35 }
  0xf6   :  { %8055 = vst [vmem:[#allocation30_spill] sm:$0xff] %v5554_v34  ;;  %v5559_v20 = vsub.f32 %v5439_v2, %v8056_v57  ;;  %8058 = vst [vmem:[#allocation65_spill] sm:$0xff] %v5569_v11  ;;  %v5574_v57 = vld [vmem:[%s7129_s1 + $0x3c8] sm:$0xff]  ;;  %v8060_v2 = vand.u32 4294901760, %v5267_v60  ;;  %1518 = vmatpush1.msra.mxu0 %v5292_v3  ;;  %v8068_v60 = vand.u32 4294901760, %v5479_v31  ;;  %v5644_v35 = vsub.f32 %v142_v56, %v5569_v11 }
  0xf7   :  { %v5587_v25 = vsub.f32 %v5472_v59, %v8061_v27  ;;  %8063 = vst [vmem:[#allocation34_spill] sm:$0xff] %v5592_v24  ;;  %8066 = vst [vmem:[#allocation69_spill] sm:$0xff] %v5604_v43  ;;  %v5619_v27 = vand.u32 4294901760, %v5574_v57  ;;  %1520 = vmatprep.subr.mxu0 %v5332_v26  ;;  %v5651_v3 = vsub.f32 %v141_v12, %v5592_v24  ;;  %v8077_v26 = vand.u32 4294901760, %v5376_v50 }
  0xf8   :  { %1691 = vmatpush1.msra.mxu1 %v8060_v2  ;;  %v8065_v2 = vand.u32 4294901760, %v5486_v63  ;;  %8073 = vst [vmem:[#allocation38_spill] sm:$0xff] %v5644_v35  ;;  %1522 = vmatpush1.msra.mxu0 %v5323_v48  ;;  %v8078_v48 = vand.u32 4294901760, %v5547_v22  ;;  %v5668_v12 = vand.u32 4294901760, %v138_v41  ;;  %v8086_v56 = vand.u32 4294901760, %v5554_v34 }
  0xf9   :  { %1697 = vmatprep.subr.mxu1 %v8064_v13  ;;  %8069 = vst [vmem:[#allocation36_spill] sm:$0xff] %v5619_v27  ;;  %8075 = vst [vmem:[#allocation73_spill] sm:$0xff] %v5651_v3  ;;  %v5653_v13 = vand.u32 4294901760, %v137_v15  ;;  %1524 = vmatprep.subr.mxu0 %v5351_v52  ;;  %v134_v52 = vld [vmem:[%s7129_s1 + $0x398] sm:$0xff] }
  0xfa   :  { %v5601_v23 = vsub.f32 %v5486_v63, %v8065_v2  ;;  %1703 = vmatpush1.msra.mxu1 %v8067_v54  ;;  %v5616_v2 = vsub.f32 %v5479_v31, %v8068_v60  ;;  %v5625_v63 = vsub.f32 %v144_v19, %v5540_v47  ;;  %v8072_v54 = vand.u32 4294901760, %v5513_v9  ;;  %v136_v31 = vld [vmem:[%s7129_s1 + $0x3a8] sm:$0xff]  ;;  %v135_v19 = vld [vmem:[%s7129_s1 + $0x3a0] sm:$0xff]  ;;  %8080 = vst [vmem:[#allocation76_spill] sm:$0xff] %v5668_v12 }
  0xfb   :  { %1709 = vmatprep.subr.mxu1 %v8071_v28  ;;  %v8074_v28 = vand.u32 4294901760, %v5349_v14  ;;  %8076 = vst [vmem:[#allocation40_spill] sm:$0xff] %v5653_v13  ;;  %v5663_v14 = vsub.f32 %v5547_v22, %v8078_v48  ;;  %1526 = vmatpush1.msra.mxu0 %v5353_v16  ;;  %v133_v48 = vld [vmem:[%s7129_s1 + $0x390] sm:$0xff]  ;;  %v5694_v16 = vsub.f32 %v5554_v34, %v8086_v56  ;;  %v8089_v56 = vand.u32 4294901760, %v5590_v33 }
  0xfc   :  { %8070 = vst [vmem:[#allocation71_spill] sm:$0xff] %v5625_v63  ;;  %v5633_v60 = vsub.f32 %v5513_v9, %v8072_v54  ;;  %v8081_v54 = vand.u32 4294901760, %v5392_v58  ;;  %v5677_v9 = vand.u32 4294901760, %v135_v19  ;;  %1528 = vmatprep.subr.mxu0 %v5394_v38  ;;  %v5717_v38 = vsub.f32 %v5574_v57, %v5619_v27 }
  0xfd   :  { %1715 = vmatpush1.msra.mxu1 %v8074_v28  ;;  %v5666_v28 = vsub.f32 %v139_v62, %v5604_v43  ;;  %v8084_v62 = vand.u32 4294901760, %v5436_v49  ;;  %v131_v49 = vld [vmem:[%s7129_s1 + $0x380] sm:$0xff]  ;;  %1530 = vmatpush1.msra.mxu0 %v5379_v8  ;;  %v5712_v58 = vsub.f32 %v5590_v33, %v8089_v56  ;;  %v8091_v8 = vand.u32 4294901760, %v5449_v30 }
  0xfe   :  { %1721 = vmatprep.subr.mxu1 %v8077_v26  ;;  %v5674_v26 = vand.u32 4294901760, %v136_v31  ;;  %8083 = vst [vmem:[#allocation79_spill] sm:$0xff] %v5677_v9  ;;  %8090 = vst [vmem:[#allocation83_spill] sm:$0xff] %v5717_v38  ;;  %1532 = vmatprep.subr.mxu0 %v5422_v7  ;;  %v5730_v34 = vsub.f32 %v138_v41, %v5668_v12  ;;  %v8094_v57 = vand.u32 4294901760, %v5463_v21  ;;  %v5743_v7 = vand.u32 4294901760, %v134_v52 }
  0xff   :  { %8079 = vst [vmem:[#allocation75_spill] sm:$0xff] %v5666_v28  ;;  %1727 = vmatpush1.msra.mxu1 %v8081_v54  ;;  %v8085_v54 = vand.u32 4294901760, %v5578_v5  ;;  %1534 = vmatpush1.msra.mxu0 %v5424_v42  ;;  %v5745_v33 = vand.u32 4294901760, %v131_v49  ;;  %v8099_v41 = vand.u32 4294901760, %v5510_v36  ;;  %v8100_v56 = vand.u32 4294901760, %v5644_v35 }
 0x100   :  { %8082 = vst [vmem:[#allocation77_spill] sm:$0xff] %v5674_v26  ;;  %1733 = vmatprep.subr.mxu1 %v8084_v62  ;;  %v8087_v62 = vand.u32 4294901760, %v5420_v55  ;;  %8093 = vst [vmem:[#allocation85_spill] sm:$0xff] %v5730_v34  ;;  %v5741_v55 = vsub.f32 %v135_v19, %v5677_v9  ;;  %1536 = vmatprep.subr.mxu0 %v5465_v0  ;;  %v5758_v19 = vsub.f32 %v136_v31, %v5674_v26  ;;  %v130_v31 = vld [vmem:[%s7129_s1 + $0x378] sm:$0xff]  ;;  %v125_v0 = vld [vmem:[%s7129_s1 + $0x350] sm:$0xff] }
 0x101   :  { %v5689_v50 = vsub.f32 %v5578_v5, %v8085_v54  ;;  %v5707_v54 = vsub.f32 %v137_v15, %v5653_v13  ;;  %v5723_v15 = vand.u32 4294901760, %v133_v48  ;;  %8097 = vst [vmem:[#allocation88_spill] sm:$0xff] %v5743_v7  ;;  %8098 = vst [vmem:[#allocation90_spill] sm:$0xff] %v5745_v33  ;;  %1538 = vmatpush1.msra.mxu0 %v5452_v44  ;;  %v8102_v42 = vand.u32 4294901760, %v5495_v39  ;;  %v129_v39 = vld [vmem:[%s7129_s1 + $0x370] sm:$0xff] }
 0x102   :  { %1739 = vmatpush1.msra.mxu1 %v8087_v62  ;;  %v132_v62 = vld [vmem:[%s7129_s1 + $0x388] sm:$0xff]  ;;  %8096 = vst [vmem:[#allocation86_spill] sm:$0xff] %v5741_v55  ;;  %8101 = vst [vmem:[#allocation91_spill] sm:$0xff] %v5758_v19  ;;  %1540 = vmatprep.subr.mxu0 %v5515_v32  ;;  %v8107_v36 = vand.u32 4294901760, %v5666_v28  ;;  %v5808_v44 = vsub.f32 %v134_v52, %v5743_v7  ;;  %v8114_v52 = vand.u32 4294901760, %v5559_v20  ;;  %v123_v32 = vld [vmem:[%s7129_s1 + $0x340] sm:$0xff] }
 0x103   :  { %8088 = vst [vmem:[#allocation81_spill] sm:$0xff] %v5707_v54  ;;  %1745 = vmatprep.subr.mxu1 %v8091_v8  ;;  %8092 = vst [vmem:[#allocation84_spill] sm:$0xff] %v5723_v15  ;;  %v8095_v8 = vand.u32 4294901760, %v5625_v63  ;;  %1542 = vmatpush2.msra.mxu0 %v5497_v37  ;;  %v8118_v20 = vand.u32 4294901760, %v5601_v23  ;;  %v8122_v23 = vand.u32 4294901760, %v5616_v2  ;;  %v124_v2 = vld [vmem:[%s7129_s1 + $0x348] sm:$0xff] }
 0x104   :  { %1751 = vmatpush1.msra.mxu1 %v8094_v57  ;;  %v5769_v57 = vand.u32 4294901760, %v132_v62  ;;  %8110 = vst [vmem:[#allocation94_spill] sm:$0xff] %v5808_v44  ;;  %1544 = vmatprep.subr.mxu0 %v5540_v47 }
 0x105   :  { %v5738_v30 = vsub.f32 %v5625_v63, %v8095_v8  ;;  %1757 = vmatprep.subr.mxu1 %v8099_v41  ;;  %v5755_v8 = vsub.f32 %v5644_v35, %v8100_v56  ;;  %v8103_v41 = vand.u32 4294901760, %v5651_v3  ;;  %v5787_v56 = vsub.f32 %v5666_v28, %v8107_v36  ;;  %v5804_v36 = vld [vmem:[%s7129_s1 + $0x368] sm:$0xff]  ;;  %1546 = vmatpush2.msra.mxu0 %v5527_v53 }
 0x106   :  { %1763 = vmatpush1.msra.mxu1 %v8102_v42  ;;  %8104 = vst [vmem:[#allocation92_spill] sm:$0xff] %v5769_v57  ;;  %v8105_v42 = vand.u32 4294901760, %v5524_v61  ;;  %v8108_v61 = vand.u32 4294901760, %v5538_v1  ;;  %v8111_v1 = vand.u32 4294901760, %v5587_v25  ;;  %v5834_v37 = vsub.f32 %v132_v62, %v5769_v57  ;;  %1548 = vmatprep.subr.mxu0 %v5569_v11 }
 0x107   :  { %v5767_v21 = vsub.f32 %v5651_v3, %v8103_v41  ;;  %v5782_v41 = vsub.f32 %v133_v48, %v5723_v15  ;;  %v127_v3 = vld [vmem:[%s7129_s1 + $0x360] sm:$0xff]  ;;  %v1828_v48 = vand.u32 4294901760, %v5738_v30  ;;  %v8119_v25 = vand.u32 4294901760, %v5730_v34  ;;  %1550 = vmatpush2.msra.mxu0 %v5592_v24 }
 0x108   :  { %1769 = vmatprep.subr.mxu1 %v8105_v42  ;;  %v5799_v42 = vsub.f32 %v131_v49, %v5745_v33  ;;  %v5816_v49 = vand.u32 4294901760, %v129_v39  ;;  %v5831_v47 = vand.u32 4294901760, %v127_v3  ;;  %8117 = vst [vmem:[#allocation74_spill] sm:$0xff] %v5834_v37  ;;  %v8120_v53 = vand.u32 4294901760, %v5707_v54  ;;  %1552 = vmatprep.subr.mxu0 %v5619_v27 }
 0x109   :  { %8106 = vst [vmem:[#allocation93_spill] sm:$0xff] %v5782_v41  ;;  %1775 = vmatpush1.msra.mxu1 %v8108_v61  ;;  %v5814_v61 = vand.u32 4294901760, %v130_v31  ;;  %v5854_v28 = vand.u32 4294901760, %v5804_v36  ;;  %v5868_v11 = vand.u32 4294901760, %v125_v0  ;;  %v8127_v24 = vand.u32 4294901760, %v5758_v19  ;;  %1554 = vmatpush2.msra.mxu0 %v5604_v43 }
 0x10a   :  { %8109 = vst [vmem:[#allocation70_spill] sm:$0xff] %v5799_v42  ;;  %1781 = vmatprep.subr.mxu1 %v8111_v1  ;;  %8113 = vst [vmem:[#allocation95_spill] sm:$0xff] %v5816_v49  ;;  %v8115_v1 = vand.u32 4294901760, %v5717_v38  ;;  %v5851_v62 = vsub.f32 %v5707_v54, %v8120_v53  ;;  %v8130_v27 = vand.u32 4294901760, %v5633_v60  ;;  %1556 = vmatprep.subr.mxu0 %v5668_v12 }
 0x10b   :  { %8112 = vst [vmem:[#allocation72_spill] sm:$0xff] %v5814_v61  ;;  %1787 = vmatpush1.msra.mxu1 %v8114_v52  ;;  %8116 = vst [vmem:[#allocation87_spill] sm:$0xff] %v5831_v47  ;;  %v5883_v53 = vsub.f32 %v5758_v19, %v8127_v24  ;;  %v5888_v54 = vsub.f32 %v130_v31, %v5814_v61  ;;  %v8132_v19 = vand.u32 4294901760, %v5689_v50  ;;  %1558 = vmatpush2.msra.mxu0 %v5653_v13 }
 0x10c   :  { %v5829_v30 = vsub.f32 %v5717_v38, %v8115_v1  ;;  %1793 = vmatprep.subr.mxu1 %v8118_v20  ;;  %v5846_v1 = vsub.f32 %v5730_v34, %v8119_v25  ;;  %8121 = vst [vmem:[#allocation89_spill] sm:$0xff] %v5854_v28  ;;  %v8123_v20 = vand.u32 4294901760, %v5741_v55  ;;  %v126_v25 = vld [vmem:[%s7129_s1 + $0x358] sm:$0xff]  ;;  %8124 = vst [vmem:[#allocation96_spill] sm:$0xff] %v5868_v11  ;;  %v1870_v43 = vand.u32 4294901760, %v5851_v62 }
 0x10d   :  { %1799 = vmatpush1.msra.mxu1 %v8122_v23  ;;  %v8125_v23 = vand.u32 4294901760, %v5663_v14  ;;  %8129 = vst [vmem:[#allocation99_spill] sm:$0xff] %v5888_v54  ;;  %v5904_v60 = vand.u32 4294901760, %v126_v25  ;;  %v8134_v50 = vand.u32 4294901760, %v5694_v16  ;;  %v5924_v24 = vsub.f32 %v125_v0, %v5868_v11  ;;  %v119_v16 = vld [vmem:[%s7129_s1 + $0x320] sm:$0xff]  ;;  %1560 = vmatprep.subr.mxu0 %v5674_v26 }
 0x10e   :  { %v5862_v52 = vsub.f32 %v5741_v55, %v8123_v20  ;;  %v5878_v20 = vsub.f32 %v129_v39, %v5816_v49  ;;  %v5885_v55 = vand.u32 4294901760, %v123_v32  ;;  %v1852_v14 = vand.u32 4294901760, %v5829_v30  ;;  %v17_v30 = vld [vmem:[%s7130_s0 + $0x18] sm:$0xff]  ;;  %1562 = vmatpush2.msra.mxu0 %v5677_v9 }
 0x10f   :  { %1805 = vmatprep.subr.mxu1 %v8125_v23  ;;  %v5895_v39 = vsub.f32 %v127_v3, %v5831_v47  ;;  %v1864_v31 = vand.u32 4294901760, %v5846_v1  ;;  %8133 = vst [vmem:[#allocation101_spill] sm:$0xff] %v5904_v60  ;;  %v121_v3 = vld [vmem:[%s7129_s1 + $0x330] sm:$0xff]  ;;  %v8135_v1 = vand.u32 4294901760, %v5808_v44  ;;  %8136 = vst [vmem:[#allocation102_spill] sm:$0xff] %v5924_v24  ;;  %v8137_v23 = vand.u32 4294901760, %v5782_v41  ;;  %1564 = vmatprep.subr.mxu0 %v5743_v7 }
 0x110   :  { %8126 = vst [vmem:[#allocation97_spill] sm:$0xff] %v5878_v20  ;;  %8128 = vst [vmem:[#allocation98_spill] sm:$0xff] %v5885_v55  ;;  %1811 = vmatpush1.msra.mxu1 %v8130_v27  ;;  %v5906_v27 = vand.u32 4294901760, %v124_v2  ;;  %v5940_v0 = vsub.f32 %v123_v32, %v5885_v55  ;;  %v5948_v13 = vsub.f32 %v5804_v36, %v5854_v28  ;;  %v8140_v26 = vand.u32 4294901760, %v5712_v58  ;;  %v120_v36 = vld [vmem:[%s7129_s1 + $0x328] sm:$0xff] }
 0x111   :  { %8131 = vst [vmem:[#allocation100_spill] sm:$0xff] %v5895_v39  ;;  %1817 = vmatprep.subr.mxu1 %v8132_v19  ;;  %v5921_v62 = vsub.f32 %v5808_v44, %v8135_v1  ;;  %v5929_v12 = vsub.f32 %v5782_v41, %v8137_v23  ;;  %v1876_v1 = vand.u32 4294901760, %v5883_v53  ;;  %v122_v23 = vld [vmem:[%s7129_s1 + $0x338] sm:$0xff]  ;;  %v8142_v53 = vand.u32 4294901760, %v5799_v42  ;;  %1566 = vmatpush2.msra.mxu0 %v5723_v15 }
 0x112   :  { %1823 = vmatpush2.msra.mxu1 %v8134_v50  ;;  %v16_v50 = vld [vmem:[%s7130_s0 + $0x10] sm:$0xff]  ;;  %8138 = vst [vmem:[#allocation103_spill] sm:$0xff] %v5940_v0  ;;  %8139 = vst [vmem:[#allocation104_spill] sm:$0xff] %v5948_v13  ;;  %v5963_v19 = vand.u32 4294901760, %v121_v3  ;;  %v5968_v9 = vand.u32 4294901760, %v17_v30  ;;  %1568 = vmatprep.subr.mxu0 %v5769_v57  ;;  %v5995_v15 = vand.u32 4294901760, %v120_v36 }
 0x113   :  { %1829 = vmatprep.subr.mxu1 %v1828_v48  ;;  %v8141_v48 = vand.u32 4294901760, %v5834_v37  ;;  %v5961_v41 = vsub.f32 %v5799_v42, %v8142_v53  ;;  %v5977_v53 = vsub.f32 %v126_v25, %v5904_v60  ;;  %v5979_v42 = vand.u32 4294901760, %v16_v50  ;;  %1570 = vmatpush2.msra.mxu0 %v5745_v33 }
 0x114   :  { %1835 = vmatpush2.msra.mxu1 %v8140_v26  ;;  %8143 = vst [vmem:[#allocation105_spill] sm:$0xff] %v5968_v9  ;;  %v8144_v26 = vand.u32 4294901760, %v5755_v8  ;;  %v1888_v44 = vand.u32 4294901760, %v5921_v62  ;;  %v1894_v7 = vand.u32 4294901760, %v5929_v12  ;;  %v5986_v8 = vand.u32 4294901760, %v122_v23  ;;  %8149 = vst [vmem:[#allocation108_spill] sm:$0xff] %v5995_v15  ;;  %1572 = vmatprep.subr.mxu0 %v5814_v61 }
 0x115   :  { %v5956_v32 = vsub.f32 %v5834_v37, %v8141_v48  ;;  %v5974_v48 = vand.u32 4294901760, %v119_v16  ;;  %8145 = vst [vmem:[#allocation106_spill] sm:$0xff] %v5977_v53  ;;  %8146 = vst [vmem:[#allocation107_spill] sm:$0xff] %v5979_v42  ;;  %v8147_v37 = vand.u32 4294901760, %v5767_v21  ;;  %v8148_v25 = vand.u32 4294901760, %v5888_v54  ;;  %v118_v12 = vld [vmem:[%s7129_s1 + $0x318] sm:$0xff]  ;;  %1574 = vmatpush2.msra.mxu0 %v5816_v49  ;;  %2005 = vmatprep.mubr.f32.mxu1 %v5968_v9 }
 0x116   :  { %1841 = vmatprep.subr.mxu1 %v8144_v26  ;;  %v6002_v21 = vsub.f32 %v124_v2, %v5906_v27  ;;  %v6010_v26 = vsub.f32 %v121_v3, %v5963_v19  ;;  %v6016_v57 = vsub.f32 %v17_v30, %v5968_v9  ;;  %v116_v3 = vld [vmem:[%s7129_s1 + $0x308] sm:$0xff]  ;;  %v115_v30 = vld [vmem:[%s7129_s1 + $0x300] sm:$0xff]  ;;  %v6043_v61 = vsub.f32 %v122_v23, %v5986_v8  ;;  %v8188_v9 = vld [vmem:[#allocation33_spill] sm:$0xff] }
 0x117   :  { %1847 = vmatpush2.msra.mxu1 %v8147_v37  ;;  %v5993_v58 = vsub.f32 %v5888_v54, %v8148_v25  ;;  %v1900_v62 = vand.u32 4294901760, %v5956_v32  ;;  %v1906_v25 = vand.u32 4294901760, %v5961_v41  ;;  %v117_v37 = vld [vmem:[%s7129_s1 + $0x310] sm:$0xff]  ;;  %v6023_v32 = vsub.f32 %v119_v16, %v5974_v48  ;;  %1576 = vmatprep.subr.mxu0 %v5854_v28 }
 0x118   :  { %1853 = vmatprep.subr.mxu1 %v1852_v14  ;;  %8150 = vst [vmem:[#allocation109_spill] sm:$0xff] %v6002_v21  ;;  %v8151_v14 = vand.u32 4294901760, %v5787_v56  ;;  %v8152_v56 = vand.u32 4294901760, %v5878_v20  ;;  %v8154_v33 = vand.u32 4294901760, %v5948_v13  ;;  %v6050_v49 = vand.u32 4294901760, %v117_v37  ;;  %1578 = vmatpush2.msra.mxu0 %v5831_v47 }
 0x119   :  { %v8155_v41 = vand.u32 4294901760, %v5862_v52  ;;  %v6056_v23 = vand.u32 4294901760, %v116_v3  ;;  %1580 = vmatprep.subr.mxu0 %v5904_v60  ;;  %v7523_v52 = vand.u32 4294901760, %v5940_v0 }
 0x11a   :  { %1859 = vmatpush2.msra.mxu1 %v8151_v14  ;;  %v1917_v2 = vsub.f32 %v5878_v20, %v8152_v56  ;;  %v6033_v14 = vsub.f32 %v16_v50, %v5979_v42  ;;  %v6039_v56 = vand.u32 4294901760, %v118_v12  ;;  %v1912_v50 = vand.u32 4294901760, %v5993_v58  ;;  %1582 = vmatpush2.msra.mxu0 %v5868_v11 }
 0x11b   :  { %1865 = vmatprep.subr.mxu1 %v1864_v31  ;;  %v8153_v31 = vand.u32 4294901760, %v5895_v39  ;;  %v6062_v58 = vsub.f32 %v120_v36, %v5995_v15  ;;  %1584 = vmatprep.subr.mxu0 %v5906_v27 }
 0x11c   :  { %1871 = vmatpush2.msra.mxu1 %v1870_v43  ;;  %v1923_v43 = vsub.f32 %v5948_v13, %v8154_v33  ;;  %v1918_v33 = vand.u32 4294901760, %v1917_v2  ;;  %1586 = vmatpush2.msra.mxu0 %v5885_v55 }
 0x11d   :  { %v1929_v16 = vsub.f32 %v5895_v39, %v8153_v31  ;;  %1877 = vmatprep.subr.mxu1 %v1876_v1  ;;  %v6058_v39 = vand.u32 4294901760, %v115_v30  ;;  %v8156_v31 = vand.u32 4294901760, %v5977_v53  ;;  %v8157_v1 = vand.u32 4294901760, %v5924_v24  ;;  %1588 = vmatprep.subr.mxu0 %v5986_v8 }
 0x11e   :  { %1883 = vmatpush2.msra.mxu1 %v8155_v41  ;;  %v1924_v2 = vand.u32 4294901760, %v1923_v43  ;;  %v8158_v41 = vand.u32 4294901760, %v6002_v21  ;;  %1590 = vmatpush2.msra.mxu0 %v5963_v19 }
 0x11f   :  { %1889 = vmatprep.subr.mxu1 %v1888_v44  ;;  %v1935_v47 = vsub.f32 %v5977_v53, %v8156_v31  ;;  %v1930_v28 = vand.u32 4294901760, %v1929_v16  ;;  %v1941_v36 = vsub.f32 %v5924_v24, %v8157_v1  ;;  %v6076_v44 = vsub.f32 %v118_v12, %v6039_v56  ;;  %1592 = vmatprep.subr.mxu0 %v5995_v15 }
 0x120   :  { %1895 = vmatpush2.msra.mxu1 %v1894_v7  ;;  %v6080_v31 = vsub.f32 %v117_v37, %v6050_v49  ;;  %v1947_v7 = vsub.f32 %v6002_v21, %v8158_v41  ;;  %v6088_v1 = vsub.f32 %v115_v30, %v6058_v39  ;;  %v8160_v12 = vand.u32 4294901760, %v6016_v57  ;;  %1594 = vmatpush2.msra.mxu0 %v5974_v48 }
 0x121   :  { %1901 = vmatprep.subr.mxu1 %v1900_v62  ;;  %v6095_v37 = vsub.f32 %v116_v3, %v6056_v23  ;;  %v1936_v41 = vand.u32 4294901760, %v1935_v47  ;;  %v8162_v30 = vand.u32 4294901760, %v6033_v14  ;;  %v8163_v3 = vand.u32 4294901760, %v6043_v61  ;;  %1596 = vmatprep.subr.mxu0 %v6039_v56 }
 0x122   :  { %1907 = vmatpush2.msra.mxu1 %v1906_v25  ;;  %8159 = vst [vmem:[#allocation110_spill] sm:$0xff] %v6088_v1  ;;  %v1606_v62 = vsub.f32 %v6016_v57, %v8160_v12  ;;  %v1953_v25 = vsub.f32 %v5940_v0, %v7523_v52  ;;  %v1942_v12 = vand.u32 4294901760, %v1941_v36  ;;  %v8164_v52 = vand.u32 4294901760, %v6010_v26  ;;  %1598 = vmatpush2.msra.mxu0 %v6050_v49 }
 0x123   :  { %8161 = vst [vmem:[#allocation111_spill] sm:$0xff] %v6095_v37  ;;  %1913 = vmatprep.subr.mxu1 %v1912_v50  ;;  %v1612_v16 = vsub.f32 %v6033_v14, %v8162_v30  ;;  %v1959_v43 = vsub.f32 %v6043_v61, %v8163_v3  ;;  %v1948_v50 = vand.u32 4294901760, %v1947_v7  ;;  %v8165_v36 = vand.u32 4294901760, %v6062_v58  ;;  %1600 = vmatprep.subr.mxu0 %v6056_v23 }
 0x124   :  { %1919 = vmatpush2.msra.mxu1 %v1918_v33  ;;  %v1965_v30 = vsub.f32 %v6010_v26, %v8164_v52  ;;  %v1607_v33 = vand.u32 4294901760, %v1606_v62  ;;  %v7527_v47 = vand.u32 4294901760, %v6095_v37  ;;  %v8166_v15 = vand.u32 4294901760, %v6023_v32  ;;  %1602 = vmatpush2.msra.mxu0 %v6058_v39 }
 0x125   :  { %1925 = vmatprep.subr.mxu1 %v1924_v2  ;;  %v1971_v3 = vsub.f32 %v6062_v58, %v8165_v36  ;;  %v1954_v2 = vand.u32 4294901760, %v1953_v25  ;;  %v1613_v7 = vand.u32 4294901760, %v1612_v16  ;;  %v7526_v60 = vand.u32 4294901760, %v6088_v1  ;;  %2015 = vmatprep.subr.mxu0 %v5006_v10 }
 0x126   :  { %1931 = vmatpush2.msra.mxu1 %v1930_v28  ;;  %v1977_v52 = vsub.f32 %v6023_v32, %v8166_v15  ;;  %v1960_v28 = vand.u32 4294901760, %v1959_v43  ;;  %v8167_v62 = vand.u32 4294901760, %v6076_v44  ;;  %v8168_v16 = vand.u32 4294901760, %v6080_v31  ;;  %1608 = vmatprep.mubr.f32.mxu0 %v1607_v33 }
 0x127   :  { %1937 = vmatprep.subr.mxu1 %v1936_v41  ;;  %v1966_v41 = vand.u32 4294901760, %v1965_v30  ;;  %v1972_v15 = vand.u32 4294901760, %v1971_v3  ;;  %v1995_v43 = vsub.f32 %v6095_v37, %v7527_v47  ;;  %1614 = vmatmul.mubr.f32.vlgmr.msra.gmra.mxu0 %v1613_v7  ;;  %v8186_v47 = vld [vmem:[#allocation29_spill] sm:$0xff] }
 0x128   :  { %1943 = vmatpush2.msra.mxu1 %v1942_v12  ;;  %v1983_v36 = vsub.f32 %v6076_v44, %v8167_v62  ;;  %v1989_v25 = vsub.f32 %v6080_v31, %v8168_v16  ;;  %v1978_v12 = vand.u32 4294901760, %v1977_v52  ;;  %2018 = vmatpush1.msra.mxu0 %v5012_v17  ;;  %v8170_v52 = vld [vmem:[#allocation48_spill] sm:$0xff]  ;;  %v8172_v62 = vld [vmem:[#allocation58_spill] sm:$0xff]  ;;  %v8175_v16 = vld [vmem:[#allocation19_spill] sm:$0xff] }
 0x129   :  { %1949 = vmatprep.subr.mxu1 %v1948_v50  ;;  %v2001_v50 = vsub.f32 %v6088_v1, %v7526_v60  ;;  %2021 = vmatprep.subr.mxu0 %v5037_v51  ;;  %v1996_v3 = vand.u32 4294901760, %v1995_v43  ;;  %v8178_v43 = vld [vmem:[#allocation2_spill] sm:$0xff]  ;;  %v8185_v60 = vld [vmem:[#allocation44_spill] sm:$0xff] }
 0x12a   :  { %1955 = vmatpush2.msra.mxu1 %v1954_v2  ;;  %v1984_v30 = vand.u32 4294901760, %v1983_v36  ;;  %v1990_v33 = vand.u32 4294901760, %v1989_v25  ;;  %v8169_v2 = vld [vmem:[#allocation42_spill] sm:$0xff]  ;;  %v8173_v36 = vld [vmem:[#allocation60_spill] sm:$0xff]  ;;  %2207 = vmatprep.mubr.f32.mxu0 %v6016_v57 }
 0x12b   :  { %1961 = vmatprep.subr.mxu1 %v1960_v28  ;;  %2024 = vmatpush1.msra.mxu0 %v8169_v2  ;;  %v2002_v7 = vand.u32 4294901760, %v2001_v50  ;;  %v8171_v28 = vld [vmem:[#allocation50_spill] sm:$0xff]  ;;  %v8176_v25 = vld [vmem:[#allocation64_spill] sm:$0xff]  ;;  %v8180_v50 = vld [vmem:[#allocation21_spill] sm:$0xff] }
 0x12c   :  { %1967 = vmatpush2.msra.mxu1 %v1966_v41  ;;  %2027 = vmatprep.subr.mxu0 %v8170_v52  ;;  %v8174_v41 = vld [vmem:[#allocation66_spill] sm:$0xff] }
 0x12d   :  { %1973 = vmatprep.subr.mxu1 %v1972_v15  ;;  %2030 = vmatpush1.msra.mxu0 %v8171_v28  ;;  %v8177_v15 = vld [vmem:[#allocation80_spill] sm:$0xff] }
 0x12e   :  { %1979 = vmatpush2.msra.mxu1 %v1978_v12  ;;  %2033 = vmatprep.subr.mxu0 %v8172_v62  ;;  %v8179_v12 = vld [vmem:[#allocation78_spill] sm:$0xff] }
 0x12f   :  { %1985 = vmatprep.subr.mxu1 %v1984_v30  ;;  %2036 = vmatpush1.msra.mxu0 %v8173_v36  ;;  %v8181_v30 = vld [vmem:[#allocation5_spill] sm:$0xff] }
 0x130   :  { %1991 = vmatpush2.msra.mxu1 %v1990_v33  ;;  %2039 = vmatprep.subr.mxu0 %v8174_v41  ;;  %v8182_v33 = vld [vmem:[#allocation3_spill] sm:$0xff] }
 0x131   :  { %1997 = vmatprep.subr.mxu1 %v1996_v3  ;;  %2042 = vmatpush1.msra.mxu0 %v8176_v25  ;;  %v8183_v3 = vld [vmem:[#allocation4_spill] sm:$0xff] }
 0x132   :  { %2003 = vmatpush2.msra.mxu1 %v2002_v7  ;;  %2045 = vmatprep.subr.mxu0 %v8177_v15  ;;  %v8184_v7 = vld [vmem:[#allocation23_spill] sm:$0xff] }
 0x133   :  { %2007 = vmatmul.mubr.f32.vlgmr.msra.gmra.mxu1 %v5979_v42  ;;  %2217 = vmatprep.subr.mxu1 %v8175_v16  ;;  %v8187_v42 = vld [vmem:[#allocation46_spill] sm:$0xff] }
 0x134   :  { %2219 = vmatpush1.msra.mxu1 %v4981_v18  ;;  %2048 = vmatpush1.msra.mxu0 %v8179_v12  ;;  %v8189_v12 = vld [vmem:[#allocation52_spill] sm:$0xff] }
 0x135   :  { %2221 = vmatprep.subr.mxu1 %v8178_v43  ;;  %2051 = vmatprep.subr.mxu0 %v8181_v30 }
 0x136   :  { %2223 = vmatpush1.msra.mxu1 %v8180_v50  ;;  %2054 = vmatpush1.msra.mxu0 %v8183_v3  ;;  %v8190_v50 = vld [vmem:[#allocation9_spill] sm:$0xff] }
 0x137   :  { %2225 = vmatprep.subr.mxu1 %v8182_v33  ;;  %2057 = vmatprep.subr.mxu0 %v5256_v29  ;;  %v8191_v33 = vld [vmem:[#allocation39_spill] sm:$0xff]  ;;  %v8193_v29 = vld [vmem:[#allocation56_spill] sm:$0xff] }
 0x138   :  { %2227 = vmatpush1.msra.mxu1 %v8184_v7  ;;  %2060 = vmatpush1.msra.mxu0 %v8186_v47  ;;  %v8192_v7 = vld [vmem:[#allocation37_spill] sm:$0xff] }
 0x139   :  { %2229 = vmatprep.subr.mxu1 %v8185_v60  ;;  %2063 = vmatprep.subr.mxu0 %v8188_v9  ;;  %v8194_v60 = vld [vmem:[#allocation41_spill] sm:$0xff]  ;;  %v8196_v9 = vld [vmem:[#allocation68_spill] sm:$0xff] }
 0x13a   :  { %2231 = vmatpush1.msra.mxu1 %v8187_v42  ;;  %2066 = vmatpush1.msra.mxu0 %v8190_v50  ;;  %v8195_v42 = vld [vmem:[#allocation13_spill] sm:$0xff] }
 0x13b   :  { %2233 = vmatprep.subr.mxu1 %v8189_v12  ;;  %2069 = vmatprep.subr.mxu0 %v8191_v33  ;;  %v8197_v50 = vld [vmem:[#allocation25_spill] sm:$0xff]  ;;  %v8199_v33 = vld [vmem:[#allocation82_spill] sm:$0xff] }
 0x13c   :  { %2235 = vmatpush1.msra.mxu1 %v5068_v45  ;;  %2072 = vmatpush1.msra.mxu0 %v8192_v7  ;;  %v8198_v45 = vld [vmem:[#allocation45_spill] sm:$0xff]  ;;  %v8201_v7 = vld [vmem:[#allocation27_spill] sm:$0xff] }
 0x13d   :  { %2237 = vmatprep.subr.mxu1 %v5108_v6  ;;  %2075 = vmatprep.subr.mxu0 %v8194_v60  ;;  %v8200_v6 = vld [vmem:[#allocation49_spill] sm:$0xff]  ;;  %v8203_v60 = vld [vmem:[#allocation6_spill] sm:$0xff] }
 0x13e   :  { %2239 = vmatpush1.msra.mxu1 %v8193_v29  ;;  %2078 = vmatpush1.msra.mxu0 %v8195_v42  ;;  %v8202_v29 = vld [vmem:[#allocation16_spill] sm:$0xff] }
 0x13f   :  { %2241 = vmatprep.subr.mxu1 %v5129_v4  ;;  %2081 = vmatprep.subr.mxu0 %v5398_v40  ;;  %v8204_v42 = vld [vmem:[#allocation8_spill] sm:$0xff] }
 0x140   :  { %2243 = vmatpush1.msra.mxu1 %v8196_v9  ;;  %2084 = vmatpush1.msra.mxu0 %v8198_v45  ;;  %v8205_v9 = vld [vmem:[#allocation18_spill] sm:$0xff]  ;;  %v8207_v45 = vld [vmem:[#allocation35_spill] sm:$0xff] }
 0x141   :  { %2245 = vmatprep.subr.mxu1 %v8197_v50  ;;  %2087 = vmatprep.subr.mxu0 %v8200_v6  ;;  %v8206_v50 = vld [vmem:[#allocation57_spill] sm:$0xff]  ;;  %v8209_v6 = vld [vmem:[#allocation10_spill] sm:$0xff] }
 0x142   :  { %2247 = vmatpush1.msra.mxu1 %v8199_v33  ;;  %2090 = vmatpush1.msra.mxu0 %v8202_v29  ;;  %v8208_v33 = vld [vmem:[#allocation22_spill] sm:$0xff]  ;;  %v8210_v29 = vld [vmem:[#allocation12_spill] sm:$0xff] }
 0x143   :  { %2249 = vmatprep.subr.mxu1 %v8201_v7  ;;  %2093 = vmatprep.subr.mxu0 %v5472_v59  ;;  %v8212_v59 = vld [vmem:[#allocation11_spill] sm:$0xff] }
 0x144   :  { %2251 = vmatpush1.msra.mxu1 %v8203_v60  ;;  %2096 = vmatpush1.msra.mxu0 %v8205_v9  ;;  %v8211_v60 = vld [vmem:[#allocation59_spill] sm:$0xff] }
 0x145   :  { %2253 = vmatprep.subr.mxu1 %v8204_v42  ;;  %2099 = vmatprep.subr.mxu0 %v8206_v50  ;;  %v8213_v9 = vld [vmem:[#allocation43_spill] sm:$0xff]  ;;  %v8215_v50 = vld [vmem:[#allocation14_spill] sm:$0xff] }
 0x146   :  { %2255 = vmatpush1.msra.mxu1 %v5248_v46  ;;  %2102 = vmatpush1.msra.mxu0 %v8208_v33  ;;  %v8214_v46 = vld [vmem:[#allocation30_spill] sm:$0xff]  ;;  %v8216_v33 = vld [vmem:[#allocation47_spill] sm:$0xff] }
 0x147   :  { %2257 = vmatprep.subr.mxu1 %v8207_v45  ;;  %2105 = vmatprep.subr.mxu0 %v5547_v22  ;;  %v8218_v22 = vld [vmem:[#allocation15_spill] sm:$0xff] }
 0x148   :  { %2259 = vmatpush1.msra.mxu1 %v8209_v6  ;;  %2108 = vmatpush1.msra.mxu0 %v8211_v60  ;;  %v8217_v6 = vld [vmem:[#allocation67_spill] sm:$0xff]  ;;  %v8219_v60 = vld [vmem:[#allocation17_spill] sm:$0xff] }
 0x149   :  { %2261 = vmatprep.subr.mxu1 %v8210_v29  ;;  %2111 = vmatprep.subr.mxu0 %v5578_v5  ;;  %v8221_v5 = vld [vmem:[#allocation51_spill] sm:$0xff] }
 0x14a   :  { %2263 = vmatpush1.msra.mxu1 %v8212_v59  ;;  %2114 = vmatpush2.msra.mxu0 %v8214_v46  ;;  %v8220_v59 = vld [vmem:[#allocation73_spill] sm:$0xff]  ;;  %v8222_v46 = vld [vmem:[#allocation20_spill] sm:$0xff] }
 0x14b   :  { %2265 = vmatprep.subr.mxu1 %v8213_v9  ;;  %2117 = vmatprep.subr.mxu0 %v5625_v63  ;;  %v8224_v63 = vld [vmem:[#allocation53_spill] sm:$0xff] }
 0x14c   :  { %2267 = vmatpush1.msra.mxu1 %v8215_v50  ;;  %2120 = vmatpush2.msra.mxu0 %v8217_v6  ;;  %v8223_v50 = vld [vmem:[#allocation75_spill] sm:$0xff]  ;;  %v8225_v6 = vld [vmem:[#allocation26_spill] sm:$0xff] }
 0x14d   :  { %2269 = vmatprep.subr.mxu1 %v8216_v33  ;;  %2123 = vmatprep.subr.mxu0 %v5644_v35  ;;  %v8227_v35 = vld [vmem:[#allocation24_spill] sm:$0xff] }
 0x14e   :  { %2271 = vmatpush1.msra.mxu1 %v8218_v22  ;;  %2126 = vmatpush2.msra.mxu0 %v8220_v59  ;;  %v8226_v22 = vld [vmem:[#allocation81_spill] sm:$0xff]  ;;  %v8229_v59 = vld [vmem:[#allocation28_spill] sm:$0xff] }
 0x14f   :  { %2273 = vmatprep.subr.mxu1 %v8219_v60  ;;  %2129 = vmatprep.subr.mxu0 %v5717_v38  ;;  %v8228_v60 = vld [vmem:[#allocation91_spill] sm:$0xff]  ;;  %v8231_v38 = vld [vmem:[#allocation61_spill] sm:$0xff] }
 0x150   :  { %2275 = vmatpush1.msra.mxu1 %v8221_v5  ;;  %2132 = vmatpush2.msra.mxu0 %v8223_v50  ;;  %v8230_v5 = vld [vmem:[#allocation86_spill] sm:$0xff]  ;;  %v8233_v50 = vld [vmem:[#allocation65_spill] sm:$0xff] }
 0x151   :  { %2277 = vmatprep.subr.mxu1 %v8222_v46  ;;  %2135 = vmatprep.subr.mxu0 %v5730_v34  ;;  %v8232_v46 = vld [vmem:[#allocation94_spill] sm:$0xff] }
 0x152   :  { %2279 = vmatpush1.msra.mxu1 %v8224_v63  ;;  %2138 = vmatpush2.msra.mxu0 %v8226_v22  ;;  %v8234_v63 = vld [vmem:[#allocation93_spill] sm:$0xff]  ;;  %v8235_v34 = vld [vmem:[#allocation34_spill] sm:$0xff]  ;;  %v8237_v22 = vld [vmem:[#allocation36_spill] sm:$0xff] }
 0x153   :  { %2281 = vmatprep.subr.mxu1 %v8225_v6  ;;  %2141 = vmatprep.subr.mxu0 %v8228_v60  ;;  %v8236_v6 = vld [vmem:[#allocation74_spill] sm:$0xff]  ;;  %v8239_v60 = vld [vmem:[#allocation69_spill] sm:$0xff] }
 0x154   :  { %2283 = vmatpush2.msra.mxu1 %v8227_v35  ;;  %2144 = vmatpush2.msra.mxu0 %v8230_v5  ;;  %v8238_v35 = vld [vmem:[#allocation70_spill] sm:$0xff]  ;;  %v8240_v5 = vld [vmem:[#allocation76_spill] sm:$0xff] }
 0x155   :  { %2285 = vmatprep.subr.mxu1 %v8229_v59  ;;  %2147 = vmatprep.subr.mxu0 %v8232_v46  ;;  %v8241_v46 = vld [vmem:[#allocation40_spill] sm:$0xff] }
 0x156   :  { %2287 = vmatpush2.msra.mxu1 %v8231_v38  ;;  %2150 = vmatpush2.msra.mxu0 %v8234_v63  ;;  %v8242_v63 = vld [vmem:[#allocation77_spill] sm:$0xff] }
 0x157   :  { %2289 = vmatprep.subr.mxu1 %v8233_v50  ;;  %2153 = vmatprep.subr.mxu0 %v8236_v6  ;;  %v8244_v6 = vld [vmem:[#allocation79_spill] sm:$0xff] }
 0x158   :  { %2291 = vmatpush2.msra.mxu1 %v8235_v34  ;;  %2156 = vmatpush2.msra.mxu0 %v8238_v35  ;;  %v8243_v34 = vld [vmem:[#allocation100_spill] sm:$0xff] }
 0x159   :  { %2293 = vmatprep.subr.mxu1 %v8237_v22  ;;  %2159 = vmatprep.subr.mxu0 %v5888_v54  ;;  %v8245_v35 = vld [vmem:[#allocation88_spill] sm:$0xff] }
 0x15a   :  { %2295 = vmatpush2.msra.mxu1 %v8239_v60  ;;  %2162 = vmatpush2.msra.mxu0 %v5878_v20  ;;  %v8246_v54 = vld [vmem:[#allocation84_spill] sm:$0xff] }
 0x15b   :  { %2297 = vmatprep.subr.mxu1 %v8240_v5  ;;  %2165 = vmatprep.subr.mxu0 %v5948_v13  ;;  %v8247_v20 = vld [vmem:[#allocation92_spill] sm:$0xff]  ;;  %v8248_v13 = vld [vmem:[#allocation90_spill] sm:$0xff] }
 0x15c   :  { %2299 = vmatpush2.msra.mxu1 %v8241_v46  ;;  %2168 = vmatpush2.msra.mxu0 %v8243_v34  ;;  %v8249_v34 = vld [vmem:[#allocation72_spill] sm:$0xff] }
 0x15d   :  { %2301 = vmatprep.subr.mxu1 %v8242_v63  ;;  %2171 = vmatprep.subr.mxu0 %v5977_v53  ;;  %v8250_v53 = vld [vmem:[#allocation95_spill] sm:$0xff] }
 0x15e   :  { %2303 = vmatpush2.msra.mxu1 %v8244_v6  ;;  %2174 = vmatpush2.msra.mxu0 %v5924_v24  ;;  %v8251_v24 = vld [vmem:[#allocation89_spill] sm:$0xff] }
 0x15f   :  { %2305 = vmatprep.subr.mxu1 %v8245_v35  ;;  %2177 = vmatprep.subr.mxu0 %v6002_v21  ;;  %v8252_v21 = vld [vmem:[#allocation87_spill] sm:$0xff] }
 0x160   :  { %2307 = vmatpush2.msra.mxu1 %v8246_v54  ;;  %2180 = vmatpush2.msra.mxu0 %v5940_v0  ;;  %v8253_v0 = vld [vmem:[#allocation101_spill] sm:$0xff] }
 0x161   :  { %2309 = vmatprep.subr.mxu1 %v8247_v20  ;;  %2183 = vmatprep.subr.mxu0 %v6043_v61 }
 0x162   :  { %2311 = vmatpush2.msra.mxu1 %v8248_v13  ;;  %2186 = vmatpush2.msra.mxu0 %v6010_v26 }
 0x163   :  { %2313 = vmatprep.subr.mxu1 %v8249_v34  ;;  %2189 = vmatprep.subr.mxu0 %v6062_v58 }
 0x164   :  { %2315 = vmatpush2.msra.mxu1 %v8250_v53  ;;  %2192 = vmatpush2.msra.mxu0 %v6023_v32 }
 0x165   :  { %2317 = vmatprep.subr.mxu1 %v8251_v24  ;;  %2195 = vmatprep.subr.mxu0 %v6076_v44 }
 0x166   :  { %2319 = vmatpush2.msra.mxu1 %v8252_v21  ;;  %2198 = vmatpush2.msra.mxu0 %v6080_v31 }
 0x167   :  { %2321 = vmatprep.subr.mxu1 %v8253_v0  ;;  %2201 = vmatprep.subr.mxu0 %v6095_v37  ;;  %v8254_v0 = vand.u32 4294901760, %v5006_v10  ;;  %v8256_v37 = vld [vmem:[#allocation108_spill] sm:$0xff]  ;;  %v8259_v10 = vand.u32 4294901760, %v8170_v52  ;;  %v8267_v52 = vand.u32 4294901760, %v8177_v15 }
 0x168   :  { %2323 = vmatpush2.msra.mxu1 %v5868_v11  ;;  %2204 = vmatpush2.msra.mxu0 %v6088_v1  ;;  %v8255_v11 = vand.u32 4294901760, %v5012_v17  ;;  %v8257_v1 = vand.u32 4294901760, %v5037_v51  ;;  %v8260_v17 = vand.u32 4294901760, %v8171_v28  ;;  %v8261_v51 = vand.u32 4294901760, %v8172_v62  ;;  %v8277_v15 = vld [vmem:[#allocation44_spill] sm:$0xff] }
 0x169   :  { %2325 = vmatprep.subr.mxu1 %v5906_v27  ;;  %2210 = vmatmul.mubr.f32.vlgmr.msra.gmra.mxu0 %v6033_v14  ;;  %v8271_v62 = vand.u32 4294901760, %v8181_v30 }
 0x16a   :  { %2327 = vmatpush2.msra.mxu1 %v5885_v55  ;;  %2360 = vmatprep.subr.mxu0 %v8254_v0  ;;  %v8258_v55 = vand.u32 4294901760, %v8169_v2  ;;  %v8264_v0 = vand.u32 4294901760, %v6033_v14  ;;  %v8266_v2 = vand.u32 4294901760, %v8176_v25  ;;  %v8270_v14 = vld [vmem:[#allocation21_spill] sm:$0xff] }
 0x16b   :  { %2329 = vmatprep.subr.mxu1 %v5986_v8  ;;  %2364 = vmatpush1.msra.mxu0 %v8255_v11  ;;  %v8262_v11 = vand.u32 4294901760, %v6016_v57  ;;  %v8268_v57 = vld [vmem:[#allocation78_spill] sm:$0xff] }
 0x16c   :  { %2331 = vmatpush2.msra.mxu1 %v5963_v19  ;;  %2368 = vmatprep.subr.mxu0 %v8257_v1  ;;  %v8265_v1 = vand.u32 4294901760, %v8174_v41  ;;  %v8269_v28 = vand.u32 4294901760, %v8268_v57  ;;  %v8273_v41 = vand.u32 4294901760, %v8183_v3  ;;  %v8291_v57 = vld [vmem:[#allocation41_spill] sm:$0xff] }
 0x16d   :  { %2333 = vmatprep.subr.mxu1 %v8256_v37  ;;  %2372 = vmatpush1.msra.mxu0 %v8258_v55  ;;  %v8263_v55 = vand.u32 4294901760, %v8173_v36  ;;  %v8272_v36 = vld [vmem:[#allocation3_spill] sm:$0xff] }
 0x16e   :  { %2335 = vmatpush2.msra.mxu1 %v5974_v48  ;;  %2376 = vmatprep.subr.mxu0 %v8259_v10  ;;  %v8279_v10 = vld [vmem:[#allocation46_spill] sm:$0xff] }
 0x16f   :  { %2337 = vmatprep.subr.mxu1 %v6039_v56  ;;  %2380 = vmatpush1.msra.mxu0 %v8260_v17  ;;  %v8280_v17 = vld [vmem:[#allocation33_spill] sm:$0xff] }
 0x170   :  { %2339 = vmatpush2.msra.mxu1 %v6050_v49  ;;  %2384 = vmatprep.subr.mxu0 %v8261_v51  ;;  %v8281_v30 = vand.u32 4294901760, %v8280_v17  ;;  %v8282_v51 = vld [vmem:[#allocation9_spill] sm:$0xff]  ;;  %v8305_v17 = vld [vmem:[#allocation6_spill] sm:$0xff] }
 0x171   :  { %2341 = vmatprep.subr.mxu1 %v6056_v23  ;;  %2347 = vmatprep.mubr.f32.mxu1 %v8262_v11  ;;  %v8283_v3 = vand.u32 4294901760, %v8282_v51  ;;  %v8284_v11 = vld [vmem:[#allocation54_spill] sm:$0xff] }
 0x172   :  { %2343 = vmatpush2.msra.mxu1 %v6058_v39  ;;  %2388 = vmatpush1.msra.mxu0 %v8263_v55  ;;  %v8285_v55 = vld [vmem:[#allocation39_spill] sm:$0xff]  ;;  %v8308_v51 = vld [vmem:[#allocation18_spill] sm:$0xff] }
 0x173   :  { %2351 = vmatmul.mubr.f32.vlgmr.msra.gmra.mxu1 %v8264_v0  ;;  %2392 = vmatprep.subr.mxu0 %v8265_v1  ;;  %v8286_v0 = vand.u32 4294901760, %v8285_v55  ;;  %v8287_v1 = vld [vmem:[#allocation62_spill] sm:$0xff]  ;;  %v8311_v55 = vld [vmem:[#allocation57_spill] sm:$0xff] }
 0x174   :  { %2623 = vmatprep.subr.mxu1 %v8175_v16  ;;  %2396 = vmatpush1.msra.mxu0 %v8266_v2  ;;  %v8274_v16 = vld [vmem:[#allocation23_spill] sm:$0xff]  ;;  %v8288_v2 = vld [vmem:[#allocation37_spill] sm:$0xff] }
 0x175   :  { %2625 = vmatpush1.msra.mxu1 %v4981_v18  ;;  %2400 = vmatprep.subr.mxu0 %v8267_v52  ;;  %v8275_v18 = vld [vmem:[#allocation31_spill] sm:$0xff]  ;;  %v8290_v52 = vld [vmem:[#allocation56_spill] sm:$0xff] }
 0x176   :  { %2627 = vmatprep.subr.mxu1 %v8178_v43  ;;  %2404 = vmatpush1.msra.mxu0 %v8269_v28  ;;  %v8276_v25 = vand.u32 4294901760, %v8275_v18  ;;  %v8278_v43 = vand.u32 4294901760, %v8186_v47  ;;  %v8289_v47 = vand.u32 4294901760, %v8288_v2  ;;  %v8292_v28 = vand.u32 4294901760, %v8291_v57  ;;  %v8315_v2 = vld [vmem:[#allocation10_spill] sm:$0xff] }
 0x177   :  { %2629 = vmatpush1.msra.mxu1 %v8270_v14  ;;  %2408 = vmatprep.subr.mxu0 %v8271_v62  ;;  %v8295_v62 = vld [vmem:[#allocation68_spill] sm:$0xff] }
 0x178   :  { %2631 = vmatprep.subr.mxu1 %v8272_v36  ;;  %2412 = vmatpush1.msra.mxu0 %v8273_v41  ;;  %v8296_v36 = vand.u32 4294901760, %v5398_v40  ;;  %v8297_v41 = vld [vmem:[#allocation25_spill] sm:$0xff] }
 0x179   :  { %2633 = vmatpush1.msra.mxu1 %v8274_v16  ;;  %2416 = vmatprep.subr.mxu0 %v8276_v25  ;;  %v8298_v16 = vld [vmem:[#allocation45_spill] sm:$0xff]  ;;  %v8300_v25 = vld [vmem:[#allocation82_spill] sm:$0xff] }
 0x17a   :  { %2635 = vmatprep.subr.mxu1 %v8277_v15  ;;  %2420 = vmatpush1.msra.mxu0 %v8278_v43  ;;  %v8299_v18 = vand.u32 4294901760, %v8298_v16  ;;  %v8301_v15 = vld [vmem:[#allocation49_spill] sm:$0xff] }
 0x17b   :  { %2637 = vmatpush1.msra.mxu1 %v8279_v10  ;;  %2424 = vmatprep.subr.mxu0 %v8281_v30  ;;  %v8302_v43 = vand.u32 4294901760, %v8301_v15  ;;  %v8306_v30 = vld [vmem:[#allocation55_spill] sm:$0xff]  ;;  %v8331_v15 = vld [vmem:[#allocation38_spill] sm:$0xff] }
 0x17c   :  { %2639 = vmatprep.subr.mxu1 %v8189_v12  ;;  %2428 = vmatpush1.msra.mxu0 %v8283_v3  ;;  %v8293_v12 = vld [vmem:[#allocation13_spill] sm:$0xff]  ;;  %v8307_v40 = vand.u32 4294901760, %v8306_v30  ;;  %v8309_v3 = vand.u32 4294901760, %v8308_v51  ;;  %v8337_v30 = vld [vmem:[#allocation83_spill] sm:$0xff]  ;;  %v8339_v51 = vld [vmem:[#allocation20_spill] sm:$0xff] }
 0x17d   :  { %2641 = vmatpush1.msra.mxu1 %v8284_v11  ;;  %2432 = vmatprep.subr.mxu0 %v8286_v0  ;;  %v8294_v14 = vand.u32 4294901760, %v8293_v12  ;;  %v8310_v11 = vld [vmem:[#allocation7_spill] sm:$0xff]  ;;  %v8312_v0 = vand.u32 4294901760, %v8311_v55  ;;  %v8321_v12 = vld [vmem:[#allocation32_spill] sm:$0xff]  ;;  %v8343_v55 = vld [vmem:[#allocation85_spill] sm:$0xff] }
 0x17e   :  { %2643 = vmatprep.subr.mxu1 %v8287_v1  ;;  %2436 = vmatpush1.msra.mxu0 %v8289_v47  ;;  %v8316_v47 = vld [vmem:[#allocation63_spill] sm:$0xff] }
 0x17f   :  { %2645 = vmatpush1.msra.mxu1 %v8290_v52  ;;  %2440 = vmatprep.subr.mxu0 %v8292_v28  ;;  %v8317_v52 = vand.u32 4294901760, %v8316_v47  ;;  %v8320_v28 = vld [vmem:[#allocation11_spill] sm:$0xff]  ;;  %v8348_v47 = vld [vmem:[#allocation24_spill] sm:$0xff] }
 0x180   :  { %2647 = vmatprep.subr.mxu1 %v5129_v4  ;;  %2444 = vmatpush1.msra.mxu0 %v8294_v14  ;;  %v8303_v4 = vld [vmem:[#allocation16_spill] sm:$0xff]  ;;  %v8322_v14 = vand.u32 4294901760, %v8321_v12  ;;  %v8353_v12 = vld [vmem:[#allocation94_spill] sm:$0xff] }
 0x181   :  { %2649 = vmatpush1.msra.mxu1 %v8295_v62  ;;  %2448 = vmatprep.subr.mxu0 %v8296_v36  ;;  %v8304_v10 = vand.u32 4294901760, %v8303_v4  ;;  %v8325_v36 = vld [vmem:[#allocation14_spill] sm:$0xff]  ;;  %v8333_v4 = vld [vmem:[#allocation17_spill] sm:$0xff] }
 0x182   :  { %2651 = vmatprep.subr.mxu1 %v8297_v41  ;;  %2452 = vmatpush1.msra.mxu0 %v8299_v18  ;;  %v8326_v41 = vld [vmem:[#allocation71_spill] sm:$0xff] }
 0x183   :  { %2653 = vmatpush1.msra.mxu1 %v8300_v25  ;;  %2456 = vmatprep.subr.mxu0 %v8302_v43  ;;  %v8327_v16 = vand.u32 4294901760, %v8326_v41  ;;  %v8330_v25 = vld [vmem:[#allocation15_spill] sm:$0xff]  ;;  %v8332_v43 = vand.u32 4294901760, %v8331_v15  ;;  %v8358_v41 = vld [vmem:[#allocation74_spill] sm:$0xff]  ;;  %v8364_v15 = vld [vmem:[#allocation97_spill] sm:$0xff] }
 0x184   :  { %2655 = vmatprep.subr.mxu1 %v8201_v7  ;;  %2460 = vmatpush1.msra.mxu0 %v8304_v10  ;;  %v8313_v7 = vld [vmem:[#allocation22_spill] sm:$0xff] }
 0x185   :  { %2657 = vmatpush1.msra.mxu1 %v8305_v17  ;;  %2464 = vmatprep.subr.mxu0 %v8307_v40  ;;  %v8314_v1 = vand.u32 4294901760, %v8313_v7  ;;  %v8336_v17 = vld [vmem:[#allocation51_spill] sm:$0xff]  ;;  %v8338_v40 = vand.u32 4294901760, %v8337_v30  ;;  %v8345_v7 = vld [vmem:[#allocation26_spill] sm:$0xff]  ;;  %v8368_v30 = vld [vmem:[#allocation100_spill] sm:$0xff] }
 0x186   :  { %2659 = vmatprep.subr.mxu1 %v8204_v42  ;;  %2468 = vmatpush1.msra.mxu0 %v8309_v3  ;;  %v8318_v42 = vld [vmem:[#allocation59_spill] sm:$0xff] }
 0x187   :  { %2661 = vmatpush1.msra.mxu1 %v8310_v11  ;;  %2472 = vmatprep.subr.mxu0 %v8312_v0  ;;  %v8319_v57 = vand.u32 4294901760, %v8318_v42  ;;  %v8342_v11 = vld [vmem:[#allocation53_spill] sm:$0xff]  ;;  %v8344_v0 = vand.u32 4294901760, %v8343_v55 }
 0x188   :  { %2663 = vmatprep.subr.mxu1 %v8207_v45  ;;  %2476 = vmatpush1.msra.mxu0 %v8314_v1  ;;  %v8323_v45 = vld [vmem:[#allocation30_spill] sm:$0xff]  ;;  %v8346_v1 = vld [vmem:[#allocation81_spill] sm:$0xff] }
 0x189   :  { %2665 = vmatpush1.msra.mxu1 %v8315_v2  ;;  %2480 = vmatprep.subr.mxu0 %v8317_v52  ;;  %v8324_v62 = vand.u32 4294901760, %v8323_v45  ;;  %v8347_v2 = vand.u32 4294901760, %v8346_v1  ;;  %v8349_v52 = vld [vmem:[#allocation91_spill] sm:$0xff]  ;;  %v8355_v45 = vld [vmem:[#allocation93_spill] sm:$0xff] }
 0x18a   :  { %2667 = vmatprep.subr.mxu1 %v8210_v29  ;;  %2484 = vmatpush1.msra.mxu0 %v8319_v57  ;;  %v8328_v29 = vld [vmem:[#allocation67_spill] sm:$0xff]  ;;  %v8350_v42 = vand.u32 4294901760, %v8349_v52  ;;  %v8351_v57 = vld [vmem:[#allocation86_spill] sm:$0xff]  ;;  %v8374_v1 = vld [vmem:[#allocation109_spill] sm:$0xff] }
 0x18b   :  { %2669 = vmatpush1.msra.mxu1 %v8320_v28  ;;  %2488 = vmatprep.subr.mxu0 %v8322_v14  ;;  %v8329_v18 = vand.u32 4294901760, %v8328_v29  ;;  %v8352_v28 = vand.u32 4294901760, %v8351_v57  ;;  %v8354_v14 = vand.u32 4294901760, %v8353_v12 }
 0x18c   :  { %2671 = vmatprep.subr.mxu1 %v8213_v9  ;;  %2492 = vmatpush2.msra.mxu0 %v8324_v62  ;;  %v8334_v9 = vld [vmem:[#allocation73_spill] sm:$0xff]  ;;  %v8356_v62 = vand.u32 4294901760, %v8355_v45 }
 0x18d   :  { %2673 = vmatpush1.msra.mxu1 %v8325_v36  ;;  %2496 = vmatprep.subr.mxu0 %v8327_v16  ;;  %v8335_v10 = vand.u32 4294901760, %v8334_v9  ;;  %v8357_v36 = vld [vmem:[#allocation34_spill] sm:$0xff]  ;;  %v8359_v16 = vand.u32 4294901760, %v8358_v41  ;;  %v8383_v41 = vand.u32 4294901760, %v6062_v58 }
 0x18e   :  { %2675 = vmatprep.subr.mxu1 %v8216_v33  ;;  %2500 = vmatpush2.msra.mxu0 %v8329_v18  ;;  %v8340_v33 = vld [vmem:[#allocation75_spill] sm:$0xff] }
 0x18f   :  { %2677 = vmatpush1.msra.mxu1 %v8330_v25  ;;  %2504 = vmatprep.subr.mxu0 %v8332_v43  ;;  %v8341_v3 = vand.u32 4294901760, %v8340_v33  ;;  %v8362_v18 = vld [vmem:[#allocation99_spill] sm:$0xff]  ;;  %v8365_v43 = vand.u32 4294901760, %v8364_v15  ;;  %v8389_v15 = vand.u32 4294901760, %v6080_v31 }
 0x190   :  { %2679 = vmatprep.subr.mxu1 %v8333_v4  ;;  %2508 = vmatpush2.msra.mxu0 %v8335_v10  ;;  %v8363_v25 = vand.u32 4294901760, %v8362_v18  ;;  %v8366_v4 = vld [vmem:[#allocation104_spill] sm:$0xff] }
 0x191   :  { %2681 = vmatpush1.msra.mxu1 %v8336_v17  ;;  %2512 = vmatprep.subr.mxu0 %v8338_v40  ;;  %v8367_v9 = vand.u32 4294901760, %v8366_v4  ;;  %v174_v17 = vld [vmem:[%s7129_s1 + $0x4d8] sm:$0xff]  ;;  %v8369_v40 = vand.u32 4294901760, %v8368_v30 }
 0x192   :  { %2683 = vmatprep.subr.mxu1 %v8339_v51  ;;  %2516 = vmatpush2.msra.mxu0 %v8341_v3  ;;  %v173_v51 = vld [vmem:[%s7129_s1 + $0x4d0] sm:$0xff] }
 0x193   :  { %2685 = vmatpush1.msra.mxu1 %v8342_v11  ;;  %2520 = vmatprep.subr.mxu0 %v8344_v0  ;;  %v8372_v11 = vld [vmem:[#allocation102_spill] sm:$0xff]  ;;  %v6456_v0 = vand.u32 4294901760, %v174_v17 }
 0x194   :  { %2687 = vmatprep.subr.mxu1 %v8345_v7  ;;  %2524 = vmatpush2.msra.mxu0 %v8347_v2  ;;  %v8373_v55 = vand.u32 4294901760, %v8372_v11  ;;  %v171_v7 = vld [vmem:[%s7129_s1 + $0x4c0] sm:$0xff]  ;;  %v8375_v2 = vand.u32 4294901760, %v8374_v1 }
 0x195   :  { %2689 = vmatpush2.msra.mxu1 %v8348_v47  ;;  %2528 = vmatprep.subr.mxu0 %v8350_v42  ;;  %v6470_v47 = vand.u32 4294901760, %v173_v51  ;;  %v8376_v42 = vld [vmem:[#allocation103_spill] sm:$0xff]  ;;  %v6492_v45 = vand.u32 4294901760, %v171_v7 }
 0x196   :  { %2691 = vmatprep.subr.mxu1 %v8229_v59  ;;  %2532 = vmatpush2.msra.mxu0 %v8352_v28  ;;  %v8360_v59 = vld [vmem:[#allocation70_spill] sm:$0xff]  ;;  %v8377_v57 = vand.u32 4294901760, %v8376_v42  ;;  %v8400_v42 = vld [vmem:[#allocation107_spill] sm:$0xff] }
 0x197   :  { %2693 = vmatpush2.msra.mxu1 %v8231_v38  ;;  %2536 = vmatprep.subr.mxu0 %v8354_v14  ;;  %v8361_v29 = vand.u32 4294901760, %v8360_v59  ;;  %v178_v38 = vld [vmem:[%s7129_s1 + $0x4f8] sm:$0xff]  ;;  %8380 = vst [vmem:[#allocation48_spill] sm:$0xff] %v6492_v45  ;;  %v168_v59 = vld [vmem:[%s7129_s1 + $0x4a8] sm:$0xff]  ;;  %v6529_v18 = vsub.f32 %v171_v7, %v6492_v45 }
 0x198   :  { %2695 = vmatprep.subr.mxu1 %v8233_v50  ;;  %2540 = vmatpush2.msra.mxu0 %v8356_v62  ;;  %v177_v50 = vld [vmem:[%s7129_s1 + $0x4f0] sm:$0xff]  ;;  %v6433_v10 = vand.u32 4294901760, %v178_v38 }
 0x199   :  { %2697 = vmatpush2.msra.mxu1 %v8357_v36  ;;  %2544 = vmatprep.subr.mxu0 %v8359_v16  ;;  %v169_v62 = vld [vmem:[%s7129_s1 + $0x4b0] sm:$0xff]  ;;  %v6506_v36 = vsub.f32 %v174_v17, %v6456_v0  ;;  %v6512_v16 = vsub.f32 %v173_v51, %v6470_v47  ;;  %v8392_v17 = vld [vmem:[#allocation111_spill] sm:$0xff] }
 0x19a   :  { %2699 = vmatprep.subr.mxu1 %v8237_v22  ;;  %2548 = vmatpush2.msra.mxu0 %v8361_v29  ;;  %v176_v22 = vld [vmem:[%s7129_s1 + $0x4e8] sm:$0xff]  ;;  %v6476_v52 = vsub.f32 %v178_v38, %v6433_v10  ;;  %v8384_v29 = vand.u32 4294901760, %v6023_v32  ;;  %v6522_v58 = vand.u32 4294901760, %v169_v62  ;;  %v8386_v38 = vand.u32 4294901760, %v6076_v44  ;;  %v165_v32 = vld [vmem:[%s7129_s1 + $0x490] sm:$0xff] }
 0x19b   :  { %2701 = vmatpush2.msra.mxu1 %v8239_v60  ;;  %2552 = vmatprep.subr.mxu0 %v8363_v25  ;;  %v175_v60 = vld [vmem:[%s7129_s1 + $0x4e0] sm:$0xff]  ;;  %v7558_v4 = vand.u32 4294901760, %v6506_v36  ;;  %v8393_v30 = vand.u32 4294901760, %v8392_v17  ;;  %v7557_v51 = vand.u32 4294901760, %v6512_v16  ;;  %v6582_v1 = vand.u32 4294901760, %v165_v32  ;;  %v162_v17 = vld [vmem:[%s7129_s1 + $0x478] sm:$0xff] }
 0x19c   :  { %2703 = vmatprep.subr.mxu1 %v8240_v5  ;;  %2556 = vmatpush2.msra.mxu0 %v8365_v43  ;;  %v6435_v5 = vand.u32 4294901760, %v177_v50  ;;  %v6451_v3 = vand.u32 4294901760, %v175_v60  ;;  %8385 = vst [vmem:[#allocation58_spill] sm:$0xff] %v6522_v58  ;;  %v8390_v43 = vld [vmem:[#allocation96_spill] sm:$0xff] }
 0x19d   :  { %2705 = vmatpush2.msra.mxu1 %v8241_v46  ;;  %2560 = vmatprep.subr.mxu0 %v8367_v9  ;;  %v6443_v46 = vand.u32 4294901760, %v176_v22  ;;  %8398 = vst [vmem:[#allocation64_spill] sm:$0xff] %v6582_v1 }
 0x19e   :  { %2707 = vmatprep.subr.mxu1 %v8242_v63  ;;  %2564 = vmatpush2.msra.mxu0 %v8369_v40  ;;  %v8370_v63 = vld [vmem:[#allocation106_spill] sm:$0xff]  ;;  %v6488_v12 = vsub.f32 %v175_v60, %v6451_v3  ;;  %v6546_v60 = vand.u32 4294901760, %v168_v59 }
 0x19f   :  { %2709 = vmatpush2.msra.mxu1 %v8244_v6  ;;  %v8371_v33 = vand.u32 4294901760, %v8370_v63  ;;  %v172_v6 = vld [vmem:[%s7129_s1 + $0x4c8] sm:$0xff]  ;;  %v6482_v28 = vsub.f32 %v176_v22, %v6443_v46  ;;  %v163_v63 = vld [vmem:[%s7129_s1 + $0x480] sm:$0xff] }
 0x1a0   :  { %2711 = vmatprep.subr.mxu1 %v8245_v35  ;;  %v6468_v35 = vsub.f32 %v177_v50, %v6435_v5  ;;  %v6490_v14 = vand.u32 4294901760, %v172_v6  ;;  %v8387_v50 = vld [vmem:[#allocation101_spill] sm:$0xff]  ;;  %v7559_v22 = vand.u32 4294901760, %v6488_v12  ;;  %8391 = vst [vmem:[#allocation66_spill] sm:$0xff] %v6546_v60 }
 0x1a1   :  { %2568 = vmatprep.subr.mxu0 %v8371_v33  ;;  %2713 = vmatpush2.msra.mxu1 %v8246_v54  ;;  %v170_v54 = vld [vmem:[%s7129_s1 + $0x4b8] sm:$0xff]  ;;  %v8394_v33 = vld [vmem:[#allocation110_spill] sm:$0xff] }
 0x1a2   :  { %2572 = vmatpush2.msra.mxu0 %v8373_v55  ;;  %2715 = vmatprep.subr.mxu1 %v8247_v20  ;;  %v8378_v20 = vand.u32 4294901760, %v6043_v61  ;;  %8379 = vst [vmem:[#allocation42_spill] sm:$0xff] %v6490_v14  ;;  %v6500_v61 = vand.u32 4294901760, %v170_v54  ;;  %v6541_v44 = vsub.f32 %v172_v6, %v6490_v14  ;;  %v8395_v11 = vand.u32 4294901760, %v8394_v33 }
 0x1a3   :  { %2576 = vmatprep.subr.mxu0 %v8375_v2  ;;  %2717 = vmatpush2.msra.mxu1 %v8248_v13  ;;  %v8381_v13 = vand.u32 4294901760, %v6010_v26  ;;  %v7565_v26 = vand.u32 4294901760, %v6476_v52  ;;  %v6573_v55 = vsub.f32 %v169_v62, %v6522_v58  ;;  %v164_v2 = vld [vmem:[%s7129_s1 + $0x488] sm:$0xff] }
 0x1a4   :  { %2580 = vmatpush2.msra.mxu0 %v8377_v57  ;;  %2719 = vmatprep.subr.mxu1 %v8249_v34  ;;  %8382 = vst [vmem:[#allocation50_spill] sm:$0xff] %v6500_v61  ;;  %v167_v34 = vld [vmem:[%s7129_s1 + $0x4a0] sm:$0xff]  ;;  %v6550_v9 = vsub.f32 %v170_v54, %v6500_v61  ;;  %v7556_v62 = vand.u32 4294901760, %v6541_v44 }
 0x1a5   :  { %2584 = vmatprep.subr.mxu0 %v8378_v20  ;;  %2721 = vmatpush2.msra.mxu1 %v8250_v53  ;;  %v7562_v53 = vand.u32 4294901760, %v6468_v35  ;;  %v6531_v25 = vand.u32 4294901760, %v167_v34  ;;  %v6558_v40 = vsub.f32 %v6476_v52, %v7565_v26  ;;  %v8399_v54 = vld [vmem:[#allocation98_spill] sm:$0xff]  ;;  %v6595_v20 = vsub.f32 %v6488_v12, %v7559_v22 }
 0x1a6   :  { %2588 = vmatpush2.msra.mxu0 %v8381_v13  ;;  %2723 = vmatprep.subr.mxu1 %v8251_v24  ;;  %v7561_v24 = vand.u32 4294901760, %v6482_v28  ;;  %v7554_v13 = vand.u32 4294901760, %v6529_v18 }
 0x1a7   :  { %2592 = vmatprep.subr.mxu0 %v8383_v41  ;;  %2725 = vmatpush2.msra.mxu1 %v8252_v21  ;;  %8388 = vst [vmem:[#allocation60_spill] sm:$0xff] %v6531_v25  ;;  %v166_v21 = vld [vmem:[%s7129_s1 + $0x498] sm:$0xff]  ;;  %v6563_v31 = vsub.f32 %v6468_v35, %v7562_v53  ;;  %v6590_v57 = vsub.f32 %v167_v34, %v6531_v25  ;;  %v6606_v34 = vand.u32 4294901760, %v163_v63 }
 0x1a8   :  { %2596 = vmatpush2.msra.mxu0 %v8384_v29  ;;  %2727 = vmatprep.subr.mxu1 %v8387_v50  ;;  %v6578_v6 = vsub.f32 %v6482_v28, %v7561_v24  ;;  %v6580_v7 = vand.u32 4294901760, %v166_v21  ;;  %v6604_v41 = vsub.f32 %v6506_v36, %v7558_v4  ;;  %v7555_v29 = vand.u32 4294901760, %v6550_v9 }
 0x1a9   :  { %2600 = vmatprep.subr.mxu0 %v8386_v38  ;;  %2729 = vmatpush2.msra.mxu1 %v8390_v43  ;;  %8401 = vst [vmem:[#allocation80_spill] sm:$0xff] %v6606_v34  ;;  %v6610_v38 = vsub.f32 %v168_v59, %v6546_v60  ;;  %v2877_v50 = vand.u32 4294901760, %v6563_v31  ;;  %v6621_v43 = vand.u32 4294901760, %v164_v2  ;;  %v6650_v33 = vsub.f32 %v6529_v18, %v7554_v13 }
 0x1aa   :  { %2604 = vmatpush2.msra.mxu0 %v8389_v15  ;;  %2731 = vmatprep.subr.mxu1 %v5906_v27  ;;  %v8396_v27 = vld [vmem:[#allocation105_spill] sm:$0xff]  ;;  %8397 = vst [vmem:[#allocation19_spill] sm:$0xff] %v6580_v7  ;;  %v6619_v15 = vsub.f32 %v6512_v16, %v7557_v51  ;;  %v2883_v59 = vand.u32 4294901760, %v6578_v6  ;;  %v6637_v31 = vsub.f32 %v166_v21, %v6580_v7  ;;  %v159_v21 = vld [vmem:[%s7129_s1 + $0x460] sm:$0xff] }
 0x1ab   :  { %2608 = vmatprep.subr.mxu0 %v8393_v30  ;;  %2614 = vmatprep.mubr.f32.mxu0 %v8396_v27  ;;  %8402 = vst [vmem:[#allocation2_spill] sm:$0xff] %v6621_v43  ;;  %v161_v30 = vld [vmem:[%s7129_s1 + $0x470] sm:$0xff]  ;;  %v6660_v6 = vsub.f32 %v163_v63, %v6606_v34  ;;  %v7564_v13 = vand.u32 4294901760, %v6610_v38  ;;  %v158_v51 = vld [vmem:[%s7129_s1 + $0x458] sm:$0xff]  ;;  %v2913_v22 = vand.u32 4294901760, %v6650_v33  ;;  %v155_v33 = vld [vmem:[%s7129_s1 + $0x440] sm:$0xff] }
 0x1ac   :  { %2612 = vmatpush2.msra.mxu0 %v8395_v11  ;;  %2733 = vmatpush2.msra.mxu1 %v8399_v54  ;;  %v2895_v11 = vand.u32 4294901760, %v6604_v41  ;;  %v6665_v54 = vsub.f32 %v6550_v9, %v7555_v29  ;;  %v6674_v41 = vand.u32 4294901760, %v162_v17  ;;  %v6676_v63 = vand.u32 4294901760, %v161_v30  ;;  %v157_v29 = vld [vmem:[%s7129_s1 + $0x450] sm:$0xff] }
 0x1ad   :  { %2616 = vmatmul.mubr.f32.vlgmr.msra.gmra.mxu0 %v8400_v42  ;;  %2735 = vmatprep.subr.mxu1 %v5986_v8  ;;  %v2871_v8 = vand.u32 4294901760, %v6558_v40  ;;  %v7560_v40 = vand.u32 4294901760, %v6573_v55  ;;  %8403 = vst [vmem:[#allocation5_spill] sm:$0xff] %v6660_v6  ;;  %v7568_v4 = vand.u32 4294901760, %v6637_v31 }
 0x1ae   :  { %2760 = vmatprep.subr.mxu0 %v6433_v10  ;;  %2737 = vmatpush2.msra.mxu1 %v5963_v19  ;;  %v6627_v19 = vsub.f32 %v165_v32, %v6582_v1  ;;  %v6645_v32 = vsub.f32 %v6541_v44, %v7556_v62  ;;  %8404 = vst [vmem:[#allocation4_spill] sm:$0xff] %v6674_v41  ;;  %8405 = vst [vmem:[#allocation29_spill] sm:$0xff] %v6676_v63  ;;  %v2919_v53 = vand.u32 4294901760, %v6665_v54 }
 0x1af   :  { %2762 = vmatpush1.msra.mxu0 %v6435_v5  ;;  %2739 = vmatprep.subr.mxu1 %v8256_v37  ;;  %v2889_v37 = vand.u32 4294901760, %v6595_v20  ;;  %v160_v20 = vld [vmem:[%s7129_s1 + $0x468] sm:$0xff]  ;;  %v6682_v62 = vsub.f32 %v164_v2, %v6621_v43  ;;  %v6730_v54 = vand.u32 4294901760, %v158_v51  ;;  %v6734_v26 = vsub.f32 %v162_v17, %v6674_v41  ;;  %v153_v2 = vld [vmem:[%s7129_s1 + $0x430] sm:$0xff] }
 0x1b0   :  { %2764 = vmatprep.subr.mxu0 %v6443_v46  ;;  %2741 = vmatpush2.msra.mxu1 %v5974_v48  ;;  %v7563_v48 = vand.u32 4294901760, %v6590_v57  ;;  %v8412_v17 = vand.u32 4294901760, %v6627_v19 }
 0x1b1   :  { %2766 = vmatpush1.msra.mxu0 %v6451_v3  ;;  %2743 = vmatprep.subr.mxu1 %v6039_v56  ;;  %v2901_v56 = vand.u32 4294901760, %v6619_v15  ;;  %8406 = vst [vmem:[#allocation52_spill] sm:$0xff] %v6682_v62  ;;  %v6691_v15 = vand.u32 4294901760, %v159_v21  ;;  %8410 = vst [vmem:[#allocation12_spill] sm:$0xff] %v6730_v54 }
 0x1b2   :  { %2768 = vmatprep.subr.mxu0 %v6456_v0  ;;  %2745 = vmatpush2.msra.mxu1 %v6050_v49  ;;  %v6689_v49 = vsub.f32 %v6573_v55, %v7560_v40  ;;  %v6702_v40 = vand.u32 4294901760, %v160_v20  ;;  %v6707_v24 = vsub.f32 %v6590_v57, %v7563_v48 }
 0x1b3   :  { %2770 = vmatpush1.msra.mxu0 %v6470_v47  ;;  %2747 = vmatprep.subr.mxu1 %v6056_v23  ;;  %8407 = vst [vmem:[#allocation27_spill] sm:$0xff] %v6691_v15  ;;  %v2907_v23 = vand.u32 4294901760, %v6645_v32  ;;  %v156_v32 = vld [vmem:[%s7129_s1 + $0x448] sm:$0xff] }
 0x1b4   :  { %2772 = vmatprep.subr.mxu0 %v6490_v14  ;;  %2749 = vmatpush2.msra.mxu1 %v6058_v39  ;;  %8408 = vst [vmem:[#allocation8_spill] sm:$0xff] %v6702_v40  ;;  %v6715_v39 = vsub.f32 %v6610_v38, %v7564_v13  ;;  %v2925_v48 = vand.u32 4294901760, %v6689_v49  ;;  %v6752_v13 = vsub.f32 %v6627_v19, %v8412_v17  ;;  %v6761_v49 = vand.u32 4294901760, %v155_v33 }
 0x1b5   :  { %2751 = vmatprep.mubr.f32.mxu1 %v8396_v27  ;;  %2774 = vmatpush1.msra.mxu0 %v6492_v45  ;;  %v6717_v27 = vand.u32 4294901760, %v157_v29  ;;  %v6767_v17 = vsub.f32 %v160_v20, %v6702_v40  ;;  %v6779_v45 = vand.u32 4294901760, %v153_v2  ;;  %v151_v20 = vld [vmem:[%s7129_s1 + $0x420] sm:$0xff] }
 0x1b6   :  { %2753 = vmatmul.mubr.f32.vlgmr.msra.gmra.mxu1 %v8400_v42  ;;  %2776 = vmatprep.subr.mxu0 %v6500_v61  ;;  %v6728_v42 = vsub.f32 %v161_v30, %v6676_v63  ;;  %v6747_v30 = vsub.f32 %v6637_v31, %v7568_v4  ;;  %8413 = vst [vmem:[#allocation47_spill] sm:$0xff] %v6761_v49  ;;  %v154_v4 = vld [vmem:[%s7129_s1 + $0x438] sm:$0xff]  ;;  %v2931_v61 = vand.u32 4294901760, %v6715_v39 }
 0x1b7   :  { %8409 = vst [vmem:[#allocation35_spill] sm:$0xff] %v6717_v27  ;;  %2872 = vmatprep.subr.mxu1 %v2871_v8  ;;  %2778 = vmatpush1.msra.mxu0 %v6522_v58  ;;  %v6742_v8 = vsub.f32 %v159_v21, %v6691_v15  ;;  %v18_v58 = vld [vmem:[%s7130_s0 + $0x20] sm:$0xff]  ;;  %v6759_v21 = vand.u32 4294901760, %v156_v32  ;;  %8414 = vst [vmem:[#allocation28_spill] sm:$0xff] %v6767_v17  ;;  %v6807_v14 = vsub.f32 %v155_v33, %v6761_v49 }
 0x1b8   :  { %2878 = vmatpush1.msra.mxu1 %v2877_v50  ;;  %2780 = vmatprep.subr.mxu0 %v6546_v60  ;;  %v2937_v50 = vand.u32 4294901760, %v6707_v24  ;;  %v8415_v24 = vand.u32 4294901760, %v6660_v6 }
 0x1b9   :  { %8411 = vst [vmem:[#allocation43_spill] sm:$0xff] %v6742_v8  ;;  %2884 = vmatprep.subr.mxu1 %v2883_v59  ;;  %2782 = vmatpush1.msra.mxu0 %v6531_v25  ;;  %v6772_v59 = vsub.f32 %v157_v29, %v6717_v27  ;;  %v6795_v25 = vsub.f32 %v158_v51, %v6730_v54  ;;  %8418 = vst [vmem:[#allocation65_spill] sm:$0xff] %v6807_v14  ;;  %v149_v29 = vld [vmem:[%s7129_s1 + $0x410] sm:$0xff]  ;;  %v147_v51 = vld [vmem:[%s7129_s1 + $0x400] sm:$0xff] }
 0x1ba   :  { %2890 = vmatpush1.msra.mxu1 %v2889_v37  ;;  %v6777_v60 = vsub.f32 %v6660_v6, %v8415_v24  ;;  %2784 = vmatprep.subr.mxu0 %v6580_v7  ;;  %v8416_v37 = vand.u32 4294901760, %v6682_v62  ;;  %v152_v24 = vld [vmem:[%s7129_s1 + $0x428] sm:$0xff]  ;;  %v6797_v6 = vand.u32 4294901760, %v18_v58  ;;  %v2949_v7 = vand.u32 4294901760, %v6752_v13 }
 0x1bb   :  { %2896 = vmatprep.subr.mxu1 %v2895_v11  ;;  %2786 = vmatpush1.msra.mxu0 %v6582_v1  ;;  %v2943_v11 = vand.u32 4294901760, %v6747_v30  ;;  %v6816_v13 = vsub.f32 %v156_v32, %v6759_v21  ;;  %v6823_v33 = vand.u32 4294901760, %v152_v24 }
 0x1bc   :  { %v6788_v39 = vsub.f32 %v6682_v62, %v8416_v37  ;;  %8417 = vst [vmem:[#allocation61_spill] sm:$0xff] %v6797_v6  ;;  %2902 = vmatpush1.msra.mxu1 %v2901_v56  ;;  %v6802_v37 = vand.u32 4294901760, %v154_v4  ;;  %2788 = vmatprep.subr.mxu0 %v6621_v43  ;;  %v6810_v62 = vand.u32 4294901760, %v151_v20  ;;  %v150_v56 = vld [vmem:[%s7129_s1 + $0x418] sm:$0xff]  ;;  %v2961_v30 = vand.u32 4294901760, %v6777_v60 }
 0x1bd   :  { %2908 = vmatprep.subr.mxu1 %v2907_v23  ;;  %2790 = vmatpush1.msra.mxu0 %v6606_v34  ;;  %v6821_v23 = vsub.f32 %v153_v2, %v6779_v45  ;;  %v148_v34 = vld [vmem:[%s7129_s1 + $0x408] sm:$0xff]  ;;  %v6842_v43 = vsub.f32 %v18_v58, %v6797_v6  ;;  %v8421_v58 = vand.u32 4294901760, %v6767_v17 }
 0x1be   :  { %2914 = vmatpush1.msra.mxu1 %v2913_v22  ;;  %2792 = vmatprep.subr.mxu0 %v6674_v41  ;;  %v2955_v32 = vand.u32 4294901760, %v6788_v39  ;;  %v8419_v22 = vand.u32 4294901760, %v6734_v26  ;;  %v6852_v41 = vsub.f32 %v154_v4, %v6802_v37  ;;  %v8422_v4 = vand.u32 4294901760, %v6742_v8 }
 0x1bf   :  { %2920 = vmatprep.subr.mxu1 %v2919_v53  ;;  %2794 = vmatpush1.msra.mxu0 %v6676_v63  ;;  %v8420_v53 = vand.u32 4294901760, %v6728_v42  ;;  %v2978_v1 = vsub.f32 %v6767_v17, %v8421_v58  ;;  %v6861_v63 = vand.u32 4294901760, %v149_v29  ;;  %v6873_v58 = vsub.f32 %v152_v24, %v6823_v33 }
 0x1c0   :  { %v2966_v60 = vsub.f32 %v6734_v26, %v8419_v22  ;;  %2926 = vmatpush1.msra.mxu1 %v2925_v48  ;;  %v6848_v22 = vand.u32 4294901760, %v150_v56  ;;  %2796 = vmatprep.subr.mxu0 %v6702_v40  ;;  %v6859_v48 = vsub.f32 %v151_v20, %v6810_v62  ;;  %v2984_v2 = vsub.f32 %v6742_v8, %v8422_v4 }
 0x1c1   :  { %v2972_v39 = vsub.f32 %v6728_v42, %v8420_v53  ;;  %2932 = vmatprep.subr.mxu1 %v2931_v61  ;;  %2798 = vmatpush1.msra.mxu0 %v6691_v15  ;;  %v6868_v40 = vand.u32 4294901760, %v148_v34  ;;  %v6870_v61 = vand.u32 4294901760, %v147_v51  ;;  %8423 = vst [vmem:[#allocation36_spill] sm:$0xff] %v6873_v58  ;;  %v8424_v53 = vand.u32 4294901760, %v6795_v25 }
 0x1c2   :  { %2938 = vmatpush1.msra.mxu1 %v2937_v50  ;;  %2800 = vmatprep.subr.mxu0 %v6730_v54  ;;  %v2967_v20 = vand.u32 4294901760, %v2966_v60  ;;  %v7605_v50 = vand.u32 4294901760, %v6807_v14  ;;  %v8425_v8 = vand.u32 4294901760, %v6772_v59  ;;  %v2979_v60 = vand.u32 4294901760, %v2978_v1 }
 0x1c3   :  { %2944 = vmatprep.subr.mxu1 %v2943_v11  ;;  %v2990_v15 = vsub.f32 %v6795_v25, %v8424_v53  ;;  %2802 = vmatpush1.msra.mxu0 %v6717_v27  ;;  %v2973_v4 = vand.u32 4294901760, %v2972_v39  ;;  %v6887_v11 = vsub.f32 %v150_v56, %v6848_v22  ;;  %v6891_v53 = vsub.f32 %v149_v29, %v6861_v63 }
 0x1c4   :  { %2950 = vmatpush1.msra.mxu1 %v2949_v7  ;;  %v2996_v24 = vsub.f32 %v6772_v59, %v8425_v8  ;;  %2804 = vmatprep.subr.mxu0 %v6759_v21  ;;  %v8426_v17 = vand.u32 4294901760, %v6816_v13  ;;  %v7606_v39 = vand.u32 4294901760, %v6821_v23  ;;  %v2985_v8 = vand.u32 4294901760, %v2984_v2 }
 0x1c5   :  { %2956 = vmatprep.subr.mxu1 %v2955_v32  ;;  %2806 = vmatpush1.msra.mxu0 %v6761_v49  ;;  %v6899_v56 = vsub.f32 %v147_v51, %v6870_v61  ;;  %v6903_v1 = vsub.f32 %v148_v34, %v6868_v40  ;;  %v2991_v29 = vand.u32 4294901760, %v2990_v15  ;;  %v8428_v32 = vand.u32 4294901760, %v6842_v43 }
 0x1c6   :  { %v3002_v7 = vsub.f32 %v6816_v13, %v8426_v17  ;;  %2962 = vmatpush1.msra.mxu1 %v2961_v30  ;;  %2808 = vmatprep.subr.mxu0 %v6802_v37  ;;  %v3008_v17 = vsub.f32 %v6807_v14, %v7605_v50  ;;  %v7607_v51 = vand.u32 4294901760, %v6859_v48  ;;  %v2997_v2 = vand.u32 4294901760, %v2996_v24 }
 0x1c7   :  { %8427 = vst [vmem:[#allocation69_spill] sm:$0xff] %v6899_v56  ;;  %2968 = vmatprep.subr.mxu1 %v2967_v20  ;;  %v2859_v30 = vsub.f32 %v6842_v43, %v8428_v32  ;;  %2810 = vmatpush1.msra.mxu0 %v6779_v45  ;;  %v8429_v34 = vand.u32 4294901760, %v6852_v41  ;;  %v7608_v15 = vand.u32 4294901760, %v6887_v11  ;;  %v3020_v32 = vsub.f32 %v6821_v23, %v7606_v39 }
 0x1c8   :  { %2974 = vmatpush1.msra.mxu1 %v2973_v4  ;;  %2812 = vmatprep.subr.mxu0 %v6823_v33  ;;  %v3003_v20 = vand.u32 4294901760, %v3002_v7  ;;  %v8430_v4 = vand.u32 4294901760, %v6873_v58  ;;  %v3032_v39 = vsub.f32 %v6859_v48, %v7607_v51  ;;  %v7610_v51 = vmov 0.0  }
 0x1c9   :  { %v3014_v54 = vsub.f32 %v6852_v41, %v8429_v34  ;;  %2980 = vmatprep.subr.mxu1 %v2979_v60  ;;  %2814 = vmatpush1.msra.mxu0 %v6810_v62  ;;  %v7609_v34 = vand.u32 4294901760, %v6903_v1  ;;  %v3009_v60 = vand.u32 4294901760, %v3008_v17  ;;  %v2860_v7 = vand.u32 4294901760, %v2859_v30 }
 0x1ca   :  { %2986 = vmatpush1.msra.mxu1 %v2985_v8  ;;  %v3026_v24 = vsub.f32 %v6873_v58, %v8430_v4  ;;  %2816 = vmatprep.subr.mxu0 %v6848_v22  ;;  %v3038_v4 = vsub.f32 %v6887_v11, %v7608_v15  ;;  %v8431_v17 = vand.u32 4294901760, %v6891_v53 }
 0x1cb   :  { %2992 = vmatprep.subr.mxu1 %v2991_v29  ;;  %2818 = vmatpush1.msra.mxu0 %v6861_v63  ;;  %v3015_v8 = vand.u32 4294901760, %v3014_v54  ;;  %v3021_v29 = vand.u32 4294901760, %v3020_v32  ;;  %v3050_v54 = vsub.f32 %v6903_v1, %v7609_v34  ;;  %v8448_v34 = vld [vmem:[#allocation29_spill] sm:$0xff] }
 0x1cc   :  { %2998 = vmatpush1.msra.mxu1 %v2997_v2  ;;  %2820 = vmatprep.subr.mxu0 %v6868_v40  ;;  %v3044_v30 = vsub.f32 %v6891_v53, %v8431_v17  ;;  %v3027_v50 = vand.u32 4294901760, %v3026_v24  ;;  %v3033_v2 = vand.u32 4294901760, %v3032_v39  ;;  %v3039_v17 = vand.u32 4294901760, %v3038_v4  ;;  %v8438_v4 = vld [vmem:[#allocation58_spill] sm:$0xff] }
 0x1cd   :  { %3004 = vmatprep.subr.mxu1 %v3003_v20  ;;  %2822 = vmatpush1.msra.mxu0 %v6870_v61  ;;  %v8432_v20 = vand.u32 4294901760, %v6899_v56  ;;  %v3051_v24 = vand.u32 4294901760, %v3050_v54  ;;  %v8441_v54 = vld [vmem:[#allocation43_spill] sm:$0xff] }
 0x1ce   :  { %2855 = vmatprep.mubr.f32.mxu0 %v7610_v51  ;;  %3010 = vmatpush1.msra.mxu1 %v3009_v60  ;;  %v3045_v15 = vand.u32 4294901760, %v3044_v30  ;;  %v8435_v60 = vld [vmem:[#allocation5_spill] sm:$0xff]  ;;  %v8440_v30 = vld [vmem:[#allocation66_spill] sm:$0xff] }
 0x1cf   :  { %2861 = vmatmul.mubr.f32.vlgmr.msra.gmra.mxu0 %v2860_v7  ;;  %v3056_v32 = vsub.f32 %v6899_v56, %v8432_v20  ;;  %3016 = vmatprep.subr.mxu1 %v3015_v8  ;;  %v8436_v7 = vld [vmem:[#allocation48_spill] sm:$0xff]  ;;  %v8437_v8 = vld [vmem:[#allocation50_spill] sm:$0xff]  ;;  %v8443_v20 = vld [vmem:[#allocation19_spill] sm:$0xff] }
 0x1d0   :  { %3101 = vmatprep.subr.mxu0 %v6476_v52  ;;  %3022 = vmatpush1.msra.mxu1 %v3021_v29  ;;  %v8439_v29 = vld [vmem:[#allocation28_spill] sm:$0xff] }
 0x1d1   :  { %3104 = vmatpush1.msra.mxu0 %v6468_v35  ;;  %3028 = vmatprep.subr.mxu1 %v3027_v50  ;;  %v3057_v39 = vand.u32 4294901760, %v3056_v32  ;;  %v8433_v50 = vld [vmem:[#allocation52_spill] sm:$0xff] }
 0x1d2   :  { %3107 = vmatprep.subr.mxu0 %v6482_v28  ;;  %3034 = vmatpush1.msra.mxu1 %v3033_v2  ;;  %v8442_v2 = vld [vmem:[#allocation60_spill] sm:$0xff] }
 0x1d3   :  { %3110 = vmatpush1.msra.mxu0 %v6488_v12  ;;  %3040 = vmatprep.subr.mxu1 %v3039_v17  ;;  %v8444_v32 = vld [vmem:[#allocation64_spill] sm:$0xff]  ;;  %v8445_v17 = vld [vmem:[#allocation2_spill] sm:$0xff] }
 0x1d4   :  { %3113 = vmatprep.subr.mxu0 %v6506_v36  ;;  %3046 = vmatpush1.msra.mxu1 %v3045_v15  ;;  %v8434_v15 = vld [vmem:[#allocation42_spill] sm:$0xff] }
 0x1d5   :  { %3116 = vmatpush1.msra.mxu0 %v6512_v16  ;;  %3052 = vmatprep.subr.mxu1 %v3051_v24  ;;  %v8446_v24 = vld [vmem:[#allocation80_spill] sm:$0xff] }
 0x1d6   :  { %3119 = vmatprep.subr.mxu0 %v6541_v44  ;;  %3058 = vmatpush1.msra.mxu1 %v3057_v39  ;;  %v8447_v39 = vld [vmem:[#allocation4_spill] sm:$0xff] }
 0x1d7   :  { %3091 = vmatprep.mubr.f32.mxu1 %v7610_v51  ;;  %3122 = vmatpush1.msra.mxu0 %v6529_v18  ;;  %v8449_v51 = vld [vmem:[#allocation8_spill] sm:$0xff] }
 0x1d8   :  { %3093 = vmatmul.mubr.f32.vlgmr.msra.gmra.mxu1 %v6797_v6  ;;  %3125 = vmatprep.subr.mxu0 %v6550_v9  ;;  %v8450_v6 = vld [vmem:[#allocation27_spill] sm:$0xff] }
 0x1d9   :  { %3237 = vmatprep.subr.mxu1 %v6433_v10  ;;  %3128 = vmatpush1.msra.mxu0 %v6573_v55 }
 0x1da   :  { %3239 = vmatpush1.msra.mxu1 %v6435_v5  ;;  %3131 = vmatprep.subr.mxu0 %v6610_v38 }
 0x1db   :  { %3241 = vmatprep.subr.mxu1 %v6443_v46  ;;  %3134 = vmatpush1.msra.mxu0 %v6590_v57 }
 0x1dc   :  { %3243 = vmatpush1.msra.mxu1 %v6451_v3  ;;  %3137 = vmatprep.subr.mxu0 %v6637_v31 }
 0x1dd   :  { %3245 = vmatprep.subr.mxu1 %v6456_v0  ;;  %3140 = vmatpush1.msra.mxu0 %v6627_v19 }
 0x1de   :  { %3247 = vmatpush1.msra.mxu1 %v6470_v47  ;;  %3143 = vmatprep.subr.mxu0 %v8433_v50 }
 0x1df   :  { %3249 = vmatprep.subr.mxu1 %v8434_v15  ;;  %3146 = vmatpush1.msra.mxu0 %v8435_v60 }
 0x1e0   :  { %3251 = vmatpush1.msra.mxu1 %v8436_v7  ;;  %3149 = vmatprep.subr.mxu0 %v6734_v26 }
 0x1e1   :  { %3253 = vmatprep.subr.mxu1 %v8437_v8  ;;  %3152 = vmatpush1.msra.mxu0 %v6728_v42 }
 0x1e2   :  { %3255 = vmatpush1.msra.mxu1 %v8438_v4  ;;  %3155 = vmatprep.subr.mxu0 %v8439_v29 }
 0x1e3   :  { %3257 = vmatprep.subr.mxu1 %v8440_v30  ;;  %3158 = vmatpush1.msra.mxu0 %v8441_v54 }
 0x1e4   :  { %3259 = vmatpush1.msra.mxu1 %v8442_v2  ;;  %3161 = vmatprep.subr.mxu0 %v6795_v25 }
 0x1e5   :  { %3261 = vmatprep.subr.mxu1 %v8443_v20  ;;  %3164 = vmatpush1.msra.mxu0 %v6772_v59 }
 0x1e6   :  { %3263 = vmatpush1.msra.mxu1 %v8444_v32  ;;  %3167 = vmatprep.subr.mxu0 %v6816_v13 }
 0x1e7   :  { %3265 = vmatprep.subr.mxu1 %v8445_v17  ;;  %3170 = vmatpush1.msra.mxu0 %v6807_v14  ;;  %v8451_v14 = vld [vmem:[#allocation12_spill] sm:$0xff] }
 0x1e8   :  { %3267 = vmatpush1.msra.mxu1 %v8446_v24  ;;  %3173 = vmatprep.subr.mxu0 %v6852_v41 }
 0x1e9   :  { %3269 = vmatprep.subr.mxu1 %v8447_v39  ;;  %3176 = vmatpush1.msra.mxu0 %v6821_v23 }
 0x1ea   :  { %3271 = vmatpush1.msra.mxu1 %v8448_v34  ;;  %3179 = vmatprep.subr.mxu0 %v6873_v58  ;;  %v8452_v58 = vmov 0.0  }
 0x1eb   :  { %3273 = vmatprep.subr.mxu1 %v8449_v51  ;;  %3182 = vmatpush1.msra.mxu0 %v6859_v48 }
 0x1ec   :  { %3275 = vmatpush1.msra.mxu1 %v8450_v6  ;;  %3185 = vmatprep.subr.mxu0 %v6887_v11 }
 0x1ed   :  { %3277 = vmatprep.subr.mxu1 %v8451_v14  ;;  %3188 = vmatpush1.msra.mxu0 %v6891_v53  ;;  %v8453_v14 = vand.u32 4294901760, %v6476_v52  ;;  %v8457_v52 = vand.u32 4294901760, %v6506_v36  ;;  %v8462_v36 = vand.u32 4294901760, %v6550_v9  ;;  %v8466_v9 = vand.u32 4294901760, %v6637_v31 }
 0x1ee   :  { %3279 = vmatpush1.msra.mxu1 %v6717_v27  ;;  %3191 = vmatprep.subr.mxu0 %v6903_v1  ;;  %v8454_v27 = vand.u32 4294901760, %v6468_v35  ;;  %v8458_v35 = vand.u32 4294901760, %v6512_v16  ;;  %v8463_v16 = vand.u32 4294901760, %v6573_v55  ;;  %v8473_v55 = vand.u32 4294901760, %v8441_v54 }
 0x1ef   :  { %3281 = vmatprep.subr.mxu1 %v6759_v21  ;;  %3194 = vmatpush1.msra.mxu0 %v6899_v56  ;;  %v8455_v56 = vand.u32 4294901760, %v6482_v28  ;;  %v8459_v28 = vand.u32 4294901760, %v6541_v44  ;;  %v8464_v44 = vand.u32 4294901760, %v6610_v38  ;;  %v8476_v38 = vand.u32 4294901760, %v6816_v13 }
 0x1f0   :  { %3227 = vmatprep.mubr.f32.mxu0 %v8452_v58  ;;  %3283 = vmatpush1.msra.mxu1 %v6761_v49  ;;  %v8456_v49 = vand.u32 4294901760, %v6488_v12  ;;  %v8460_v12 = vand.u32 4294901760, %v6529_v18  ;;  %v8465_v18 = vand.u32 4294901760, %v6590_v57  ;;  %v8475_v57 = vand.u32 4294901760, %v6772_v59  ;;  %v8485_v59 = vld [vmem:[#allocation12_spill] sm:$0xff] }
 0x1f1   :  { %3230 = vmatmul.mubr.f32.vlgmr.msra.gmra.mxu0 %v6842_v43  ;;  %3285 = vmatprep.subr.mxu1 %v6802_v37  ;;  %v8480_v31 = vand.u32 4294901760, %v6821_v23  ;;  %v8486_v13 = vand.u32 4294901760, %v6891_v53  ;;  %v8487_v23 = vld [vmem:[#allocation35_spill] sm:$0xff] }
 0x1f2   :  { %3345 = vmatprep.subr.mxu0 %v8453_v14  ;;  %3287 = vmatpush1.msra.mxu1 %v6779_v45  ;;  %v8461_v14 = vand.u32 4294901760, %v6842_v43  ;;  %v8477_v43 = vld [vmem:[#allocation65_spill] sm:$0xff] }
 0x1f3   :  { %3349 = vmatpush1.msra.mxu0 %v8454_v27  ;;  %3289 = vmatprep.subr.mxu1 %v6823_v33  ;;  %v8481_v27 = vld [vmem:[#allocation36_spill] sm:$0xff] }
 0x1f4   :  { %3353 = vmatprep.subr.mxu0 %v8455_v56  ;;  %3291 = vmatpush1.msra.mxu1 %v6810_v62  ;;  %v8488_v56 = vand.u32 4294901760, %v6903_v1 }
 0x1f5   :  { %3357 = vmatpush1.msra.mxu0 %v8456_v49  ;;  %3293 = vmatprep.subr.mxu1 %v6848_v22  ;;  %v8483_v49 = vand.u32 4294901760, %v6859_v48 }
 0x1f6   :  { %3361 = vmatprep.subr.mxu0 %v8457_v52  ;;  %3295 = vmatpush1.msra.mxu1 %v6861_v63 }
 0x1f7   :  { %3365 = vmatpush1.msra.mxu0 %v8458_v35  ;;  %3297 = vmatprep.subr.mxu1 %v6868_v40 }
 0x1f8   :  { %3369 = vmatprep.subr.mxu0 %v8459_v28  ;;  %3299 = vmatpush1.msra.mxu1 %v6870_v61 }
 0x1f9   :  { %3332 = vmatprep.mubr.f32.mxu1 %v8452_v58  ;;  %3373 = vmatpush1.msra.mxu0 %v8460_v12 }
 0x1fa   :  { %3336 = vmatmul.mubr.f32.vlgmr.msra.gmra.mxu1 %v8461_v14  ;;  %3377 = vmatprep.subr.mxu0 %v8462_v36 }
 0x1fb   :  { %3511 = vmatprep.subr.mxu1 %v6433_v10  ;;  %3381 = vmatpush1.msra.mxu0 %v8463_v16  ;;  %v8467_v10 = vand.u32 4294901760, %v6627_v19  ;;  %v8478_v19 = vand.u32 4294901760, %v8477_v43 }
 0x1fc   :  { %3513 = vmatpush1.msra.mxu1 %v6435_v5  ;;  %3385 = vmatprep.subr.mxu0 %v8464_v44  ;;  %v8468_v5 = vand.u32 4294901760, %v8433_v50 }
 0x1fd   :  { %3515 = vmatprep.subr.mxu1 %v6443_v46  ;;  %3389 = vmatpush1.msra.mxu0 %v8465_v18  ;;  %v8469_v46 = vand.u32 4294901760, %v8435_v60 }
 0x1fe   :  { %3517 = vmatpush1.msra.mxu1 %v6451_v3  ;;  %3393 = vmatprep.subr.mxu0 %v8466_v9  ;;  %v8470_v3 = vand.u32 4294901760, %v6734_v26  ;;  %v8474_v26 = vand.u32 4294901760, %v6795_v25  ;;  %v8479_v25 = vand.u32 4294901760, %v6852_v41  ;;  %v8484_v41 = vand.u32 4294901760, %v6887_v11  ;;  %v8492_v11 = vld [vmem:[#allocation61_spill] sm:$0xff] }
 0x1ff   :  { %3519 = vmatprep.subr.mxu1 %v6456_v0  ;;  %3397 = vmatpush1.msra.mxu0 %v8467_v10  ;;  %v8471_v0 = vand.u32 4294901760, %v6728_v42  ;;  %v8482_v42 = vand.u32 4294901760, %v8481_v27 }
 0x200   :  { %3521 = vmatpush1.msra.mxu1 %v6470_v47  ;;  %3401 = vmatprep.subr.mxu0 %v8468_v5  ;;  %v8472_v47 = vand.u32 4294901760, %v8439_v29 }
 0x201   :  { %3523 = vmatprep.subr.mxu1 %v8434_v15  ;;  %3405 = vmatpush1.msra.mxu0 %v8469_v46 }
 0x202   :  { %3525 = vmatpush1.msra.mxu1 %v8436_v7  ;;  %3409 = vmatprep.subr.mxu0 %v8470_v3 }
 0x203   :  { %3527 = vmatprep.subr.mxu1 %v8437_v8  ;;  %3413 = vmatpush1.msra.mxu0 %v8471_v0 }
 0x204   :  { %3529 = vmatpush1.msra.mxu1 %v8438_v4  ;;  %3417 = vmatprep.subr.mxu0 %v8472_v47 }
 0x205   :  { %3531 = vmatprep.subr.mxu1 %v8440_v30  ;;  %3421 = vmatpush1.msra.mxu0 %v8473_v55 }
 0x206   :  { %3533 = vmatpush1.msra.mxu1 %v8442_v2  ;;  %3425 = vmatprep.subr.mxu0 %v8474_v26 }
 0x207   :  { %3535 = vmatprep.subr.mxu1 %v8443_v20  ;;  %3429 = vmatpush1.msra.mxu0 %v8475_v57 }
 0x208   :  { %3537 = vmatpush1.msra.mxu1 %v8444_v32  ;;  %3433 = vmatprep.subr.mxu0 %v8476_v38 }
 0x209   :  { %3539 = vmatprep.subr.mxu1 %v8445_v17  ;;  %3437 = vmatpush1.msra.mxu0 %v8478_v19 }
 0x20a   :  { %3541 = vmatpush1.msra.mxu1 %v8446_v24  ;;  %3441 = vmatprep.subr.mxu0 %v8479_v25 }
 0x20b   :  { %3543 = vmatprep.subr.mxu1 %v8447_v39  ;;  %3445 = vmatpush1.msra.mxu0 %v8480_v31 }
 0x20c   :  { %3545 = vmatpush1.msra.mxu1 %v8448_v34  ;;  %3449 = vmatprep.subr.mxu0 %v8482_v42 }
 0x20d   :  { %3547 = vmatprep.subr.mxu1 %v8449_v51  ;;  %3453 = vmatpush1.msra.mxu0 %v8483_v49  ;;  %v8489_v51 = vld [vmem:[#allocation69_spill] sm:$0xff] }
 0x20e   :  { %3549 = vmatpush1.msra.mxu1 %v8450_v6  ;;  %3457 = vmatprep.subr.mxu0 %v8484_v41  ;;  %v8490_v48 = vand.u32 4294901760, %v8489_v51  ;;  %v8491_v6 = vld [vmem:[#allocation47_spill] sm:$0xff] }
 0x20f   :  { %3551 = vmatprep.subr.mxu1 %v8485_v59  ;;  %3461 = vmatpush1.msra.mxu0 %v8486_v13 }
 0x210   :  { %3553 = vmatpush1.msra.mxu1 %v8487_v23  ;;  %3465 = vmatprep.subr.mxu0 %v8488_v56 }
 0x211   :  { %3555 = vmatprep.subr.mxu1 %v6759_v21  ;;  %3469 = vmatpush1.msra.mxu0 %v8490_v48  ;;  %v331_v21 = vpop.f32.mrf.mxu0 }
 0x212   :  { %3502 = vmatprep.mubr.f32.mxu0 %v8452_v58  ;;  %3557 = vmatpush1.msra.mxu1 %v8491_v6 }
 0x213   :  { %3504 = vmatmul.mubr.f32.vlgmr.msra.gmra.mxu0 %v8492_v11  ;;  %3559 = vmatprep.subr.mxu1 %v6802_v37  ;;  %v181_v37 = vlaneseq  ;;  %v333_v53 = vpop.f32.mrf.mxu0 }
 0x214   :  { %3606 = vmatprep.mubr.f32.mxu1 %v8452_v58  ;;  %3561 = vmatpush1.msra.mxu1 %v6779_v45  ;;  %v724_v58 = vpop.f32.mrf.mxu1 }
 0x215   :  { %3563 = vmatprep.subr.mxu1 %v6823_v33  ;;  %v927_v1 = vpop.f32.mrf.mxu0  ;;  %v182_v45 = vshrl.u32 %v181_v37, 7 }
 0x216   :  { %3565 = vmatpush1.msra.mxu1 %v6810_v62  ;;  %v726_v34 = vpop.f32.mrf.mxu1 }
 0x217   :  { %3567 = vmatprep.subr.mxu1 %v6848_v22  ;;  %v929_v33 = vpop.f32.mrf.mxu0  ;;  %v183_v62 = vsub.s32 0, %v182_v45 }
 0x218   :  { %3569 = vmatpush1.msra.mxu1 %v6861_v63  ;;  %v1068_v50 = vpop.f32.mrf.mxu1  ;;  %v179_v63 = vld [vmem:[%s7131_s2] sm:$0x3] }
 0x219   :  { %3571 = vmatprep.subr.mxu1 %v6868_v40  ;;  %v1333_v22 = vpop.f32.mrf.mxu0  ;;  %v187_v40 = vsub.s32 1, %v182_v45 }
 0x21a   :  { %3573 = vmatpush1.msra.mxu1 %v6870_v61  ;;  %v1070_v15 = vpop.f32.mrf.mxu1  ;;  %v184_v61 = vrot.slane %v179_v63, %v183_v62 }
 0x21b   :  { %3608 = vmatmul.mubr.f32.vlgmr.msra.gmra.mxu1 %v8492_v11  ;;  %v1335_v60 = vpop.f32.mrf.mxu0  ;;  %v188_v8 = vrot.slane %v179_v63, %v187_v40 }
 0x21c   :  { %v1470_v7 = vpop.f32.mrf.mxu1  ;;  %v332_v29 = vadd.f32 %v331_v21, %v184_v61 }
 0x21d   :  { %v1615_v4 = vpop.f32.mrf.mxu0  ;;  %v334_v54 = vadd.f32 %v333_v53, %v188_v8 }
 0x21e   :  { %v1472_v30 = vpop.f32.mrf.mxu1  ;;  %v725_v32 = vadd.f32 %v724_v58, %v332_v29 }
 0x21f   :  { %v1617_v2 = vpop.f32.mrf.mxu0  ;;  %v727_v24 = vadd.f32 %v726_v34, %v334_v54 }
 0x220   :  { %v2008_v20 = vpop.f32.mrf.mxu1  ;;  %v928_v39 = vadd.f32 %v927_v1, %v725_v32 }
 0x221   :  { %v930_v35 = vadd.f32 %v929_v33, %v727_v24 }
 0x222   :  { %v2010_v52 = vpop.f32.mrf.mxu1  ;;  %v1069_v28 = vadd.f32 %v1068_v50, %v928_v39 }
 0x223   :  { %v1071_v36 = vadd.f32 %v1070_v15, %v930_v35 }
 0x224   :  { %v1334_v16 = vadd.f32 %v1333_v22, %v1069_v28 }
 0x225   :  { %v1336_v18 = vadd.f32 %v1335_v60, %v1071_v36 }
 0x226   :  { %v1471_v9 = vadd.f32 %v1470_v7, %v1334_v16 }
 0x227   :  { %v1473_v5 = vadd.f32 %v1472_v30, %v1336_v18 }
 0x228   :  { %v1616_v46 = vadd.f32 %v1615_v4, %v1471_v9 }
 0x229   :  { %v2211_v17 = vpop.f32.mrf.mxu0  ;;  %v1618_v47 = vadd.f32 %v1617_v2, %v1473_v5 }
 0x22a   :  { %v2009_v55 = vadd.f32 %v2008_v20, %v1616_v46 }
 0x22b   :  { %v2213_v12 = vpop.f32.mrf.mxu0  ;;  %v2011_v57 = vadd.f32 %v2010_v52, %v1618_v47 }
 0x22c   :  { %v2212_v38 = vadd.f32 %v2211_v17, %v2009_v55 }
 0x22d   :  { %v2214_v19 = vadd.f32 %v2213_v12, %v2011_v57 }
 0x233   :  { %v2352_v14 = vpop.f32.mrf.mxu1 }
 0x234   :  { %v2353_v25 = vadd.f32 %v2352_v14, %v2212_v38 }
 0x235   :  { %v2354_v10 = vpop.f32.mrf.mxu1 }
 0x236   :  { %v2355_v42 = vadd.f32 %v2354_v10, %v2214_v19 }
 0x26d   :  { %v2617_v44 = vpop.f32.mrf.mxu0 }
 0x26e   :  { %v2618_v49 = vadd.f32 %v2617_v44, %v2353_v25 }
 0x26f   :  { %v2619_v3 = vpop.f32.mrf.mxu0 }
 0x270   :  { %v2620_v59 = vadd.f32 %v2619_v3, %v2355_v42 }
 0x276   :  { %v2754_v0 = vpop.f32.mrf.mxu1 }
 0x277   :  { %v2755_v13 = vadd.f32 %v2754_v0, %v2618_v49 }
 0x278   :  { %v2756_v43 = vpop.f32.mrf.mxu1 }
 0x279   :  { %v2757_v56 = vadd.f32 %v2756_v43, %v2620_v59 }
 0x28f   :  { %v2862_v26 = vpop.f32.mrf.mxu0 }
 0x290   :  { %v2863_v51 = vadd.f32 %v2862_v26, %v2755_v13 }
 0x291   :  { %v2864_v31 = vpop.f32.mrf.mxu0 }
 0x292   :  { %v2865_v11 = vadd.f32 %v2864_v31, %v2757_v56 }
 0x298   :  { %v3094_v27 = vpop.f32.mrf.mxu1 }
 0x299   :  { %v3095_v21 = vadd.f32 %v3094_v27, %v2863_v51 }
 0x29a   :  { %v3096_v23 = vpop.f32.mrf.mxu1 }
 0x29b   :  { %v3097_v53 = vadd.f32 %v3096_v23, %v2865_v11 }
 0x2b1   :  { %v3231_v41 = vpop.f32.mrf.mxu0 }
 0x2b2   :  { %v3232_v58 = vadd.f32 %v3231_v41, %v3095_v21 }
 0x2b3   :  { %v3233_v48 = vpop.f32.mrf.mxu0 }
 0x2b4   :  { %v3234_v45 = vadd.f32 %v3233_v48, %v3097_v53 }
 0x2ba   :  { %v3337_v6 = vpop.f32.mrf.mxu1 }
 0x2bb   :  { %v3338_v34 = vadd.f32 %v3337_v6, %v3232_v58 }
 0x2bc   :  { %v3339_v1 = vpop.f32.mrf.mxu1 }
 0x2bd   :  { %v3340_v50 = vadd.f32 %v3339_v1, %v3234_v45 }
 0x2d3   :  { %v3505_v37 = vpop.f32.mrf.mxu0 }
 0x2d4   :  { %v3506_v62 = vadd.f32 %v3505_v37, %v3338_v34 }
 0x2d5   :  { %v3507_v33 = vpop.f32.mrf.mxu0 }
 0x2d6   :  { %v3508_v22 = vadd.f32 %v3507_v33, %v3340_v50 }
 0x2db   :  { %v3609_v63 = vpop.f32.mrf.mxu1 }
 0x2dc   :  { %v3610_v40 = vadd.f32 %v3609_v63, %v3506_v62 }
 0x2dd   :  { %v3611_v15 = vpop.f32.mrf.mxu1 }
 0x2de   :  { %3614 = vst [vmem:[%s7132_s3] sm:$0xff] %v3610_v40  ;;  %v3612_v61 = vadd.f32 %v3611_v15, %v3508_v22 }
 0x2e0   :  { %3616 = vst.msk [vmem:[%s7132_s3 + $0x8] sm:$0xff] %vm3615_vm0, %v3612_v61 }

</bundles_post_ra>
